<compile_context>
chip_gen: v7x
topology: tpu7x:2x2x1
jax: 0.10.0
libtpu: 0.0.40
codegen_flags: <defaults>
</compile_context>

<pallas_src>
import functools

import jax
import jax.numpy as jnp
from jax import lax
from jax.experimental import pallas as pl
from jax.experimental.pallas import tpu as pltpu

EPS = 1e-5      # SynchronizedBatchNorm2d default eps
LANE = 128


def _round_up(x, m):
    return ((x + m - 1) // m) * m


def _pick_tm(m_rows, target=256):
    # Largest multiple-of-8 divisor of M that is <= target.  At real ResNet
    # sizes prefer 512-1024 rows (v5e/v6e roofline) and size the working set
    # against the ~32 MiB scoped-VMEM budget on v7x.
    tm = min(target, m_rows)
    while tm > 8 and (m_rows % tm != 0):
        tm -= 8
    return max(tm, 8)


def _mosaic_params():
    return pltpu.CompilerParams(
        dimension_semantics=("parallel",),
        vmem_limit_bytes=32 * 1024 * 1024,
    )


# ---------------------------------------------------------------------------
# Pallas kernel bodies
# ---------------------------------------------------------------------------
def _mm_stats_kernel(x_ref, w_ref, y_ref, st_ref):
    # y = X @ W (bf16 MXU operands, f32 accumulation) + per-tile (sum, sumsq).
    y = jnp.dot(x_ref[...], w_ref[...], preferred_element_type=jnp.float32)
    y_ref[...] = y
    su = jnp.sum(y, axis=0, keepdims=True)
    sq = jnp.sum(y * y, axis=0, keepdims=True)
    st_ref[...] = jnp.concatenate([su, sq], axis=0)[None]


def _scale_relu_kernel(y_ref, s_ref, b_ref, o_ref):
    # folded-BN apply + ReLU; output may be bf16 (it feeds the next matmul).
    h = jnp.maximum(y_ref[...] * s_ref[...] + b_ref[...], 0.0)
    o_ref[...] = h.astype(o_ref.dtype)


def _scale_relu_mm_stats_kernel(y_ref, s_ref, b_ref, w_ref, o_ref, st_ref):
    # fused: BN2-apply + ReLU -> conv3 (1x1) matmul -> BN3 partial stats.
    # h2 lives only in VMEM / vregs, never in HBM.
    h = jnp.maximum(y_ref[...] * s_ref[...] + b_ref[...], 0.0)
    y = jnp.dot(h.astype(jnp.bfloat16), w_ref[...],
                preferred_element_type=jnp.float32)
    o_ref[...] = y
    su = jnp.sum(y, axis=0, keepdims=True)
    sq = jnp.sum(y * y, axis=0, keepdims=True)
    st_ref[...] = jnp.concatenate([su, sq], axis=0)[None]


def _scale_add_relu_kernel(y_ref, s_ref, b_ref, r_ref, o_ref):
    # folded-BN apply + residual add + ReLU (block output stage).
    o_ref[...] = jnp.maximum(y_ref[...] * s_ref[...] + b_ref[...] + r_ref[...],
                             0.0)


# ---------------------------------------------------------------------------
# pallas_call wrappers
# ---------------------------------------------------------------------------
def mm_stats(x_bf16, w_bf16, tm):
    M, K = x_bf16.shape
    N = w_bf16.shape[1]
    G = M // tm
    return pl.pallas_call(
        _mm_stats_kernel,
        out_shape=(jax.ShapeDtypeStruct((M, N), jnp.float32),
                   jax.ShapeDtypeStruct((G, 2, N), jnp.float32)),
        grid=(G,),
        in_specs=[pl.BlockSpec((tm, K), lambda i: (i, 0)),
                  pl.BlockSpec((K, N), lambda i: (0, 0))],
        out_specs=(pl.BlockSpec((tm, N), lambda i: (i, 0)),
                   pl.BlockSpec((1, 2, N), lambda i: (i, 0, 0))),
        compiler_params=_mosaic_params(),
        cost_estimate=pl.CostEstimate(
            flops=2 * M * K * N, transcendentals=0,
            bytes_accessed=M * K * 2 + K * N * 2 + M * N * 4 + G * 2 * N * 4),
    )(x_bf16, w_bf16)


def scale_relu(y, scale, shift, tm, out_dtype=jnp.bfloat16):
    M, N = y.shape
    return pl.pallas_call(
        _scale_relu_kernel,
        out_shape=jax.ShapeDtypeStruct((M, N), out_dtype),
        grid=(M // tm,),
        in_specs=[pl.BlockSpec((tm, N), lambda i: (i, 0)),
                  pl.BlockSpec((1, N), lambda i: (0, 0)),
                  pl.BlockSpec((1, N), lambda i: (0, 0))],
        out_specs=pl.BlockSpec((tm, N), lambda i: (i, 0)),
        compiler_params=_mosaic_params(),
        cost_estimate=pl.CostEstimate(
            flops=3 * M * N, transcendentals=0,
            bytes_accessed=M * N * 4 + M * N * jnp.dtype(out_dtype).itemsize),
    )(y, scale, shift)


def conv3x3_stats(h_padded_bf16, w_taps_bf16, H, W):
    """3x3 conv (pad=1, stride=1) as 9 in-kernel shifted-tap matmuls per image.

    h_padded_bf16 : (N, H+2, W+2, Cp) bf16 (already spatially zero-padded)
    w_taps_bf16   : (9, Cp, Cp) bf16, tap t = dy*3+dx holds W[:,:,dy,dx].T
    returns y2 (N*H*W, Cp) f32 and per-image (sum, sumsq) partials (N, 2, Cp).
    """
    Nb, Hp, Wp, Cp = h_padded_bf16.shape
    HW = H * W
    M = Nb * HW

    def kernel(hp_ref, w_ref, y_ref, st_ref):
        acc = jnp.zeros((HW, Cp), jnp.float32)
        for t in range(9):                              # static unroll: 9 taps
            dy, dx = t // 3, t % 3
            win = hp_ref[0, dy:dy + H, dx:dx + W, :]    # shifted window (H,W,Cp)
            acc = acc + jnp.dot(win.reshape(HW, Cp), w_ref[t],
                                preferred_element_type=jnp.float32)
        y_ref[...] = acc
        su = jnp.sum(acc, axis=0, keepdims=True)
        sq = jnp.sum(acc * acc, axis=0, keepdims=True)
        st_ref[...] = jnp.concatenate([su, sq], axis=0)[None]

    return pl.pallas_call(
        kernel,
        out_shape=(jax.ShapeDtypeStruct((M, Cp), jnp.float32),
                   jax.ShapeDtypeStruct((Nb, 2, Cp), jnp.float32)),
        grid=(Nb,),
        in_specs=[pl.BlockSpec((1, Hp, Wp, Cp), lambda n: (n, 0, 0, 0)),
                  pl.BlockSpec((9, Cp, Cp), lambda n: (0, 0, 0))],
        out_specs=(pl.BlockSpec((HW, Cp), lambda n: (n, 0)),
                   pl.BlockSpec((1, 2, Cp), lambda n: (n, 0, 0))),
        compiler_params=_mosaic_params(),
        cost_estimate=pl.CostEstimate(
            flops=2 * M * 9 * Cp * Cp, transcendentals=0,
            bytes_accessed=Nb * Hp * Wp * Cp * 2 + 9 * Cp * Cp * 2
                           + M * Cp * 4 + Nb * 2 * Cp * 4),
    )(h_padded_bf16, w_taps_bf16)


def scale_relu_mm_stats(y, scale, shift, w_bf16, tm):
    M, K = y.shape
    N = w_bf16.shape[1]
    G = M // tm
    return pl.pallas_call(
        _scale_relu_mm_stats_kernel,
        out_shape=(jax.ShapeDtypeStruct((M, N), jnp.float32),
                   jax.ShapeDtypeStruct((G, 2, N), jnp.float32)),
        grid=(G,),
        in_specs=[pl.BlockSpec((tm, K), lambda i: (i, 0)),
                  pl.BlockSpec((1, K), lambda i: (0, 0)),
                  pl.BlockSpec((1, K), lambda i: (0, 0)),
                  pl.BlockSpec((K, N), lambda i: (0, 0))],
        out_specs=(pl.BlockSpec((tm, N), lambda i: (i, 0)),
                   pl.BlockSpec((1, 2, N), lambda i: (i, 0, 0))),
        compiler_params=_mosaic_params(),
        cost_estimate=pl.CostEstimate(
            flops=2 * M * K * N + 3 * M * K, transcendentals=0,
            bytes_accessed=M * K * 4 + K * N * 2 + M * N * 4 + G * 2 * N * 4),
    )(y, scale, shift, w_bf16)


def scale_add_relu(y, scale, shift, res, tm):
    M, N = y.shape
    return pl.pallas_call(
        _scale_add_relu_kernel,
        out_shape=jax.ShapeDtypeStruct((M, N), jnp.float32),
        grid=(M // tm,),
        in_specs=[pl.BlockSpec((tm, N), lambda i: (i, 0)),
                  pl.BlockSpec((1, N), lambda i: (0, 0)),
                  pl.BlockSpec((1, N), lambda i: (0, 0)),
                  pl.BlockSpec((tm, N), lambda i: (i, 0))],
        out_specs=pl.BlockSpec((tm, N), lambda i: (i, 0)),
        compiler_params=_mosaic_params(),
        cost_estimate=pl.CostEstimate(
            flops=4 * M * N, transcendentals=0,
            bytes_accessed=3 * M * N * 4),
    )(y, scale, shift, res)


# ---------------------------------------------------------------------------
# host-side (tiny) BN-statistics reduction -> folded scale / shift
# ---------------------------------------------------------------------------
def _finish_stats(partials, m_rows, gamma_p, beta_p):
    total = jnp.sum(partials, axis=0)                          # (2, C)
    mean = total[0] / m_rows
    var = jnp.maximum(total[1] / m_rows - mean * mean, 0.0)    # biased var
    scale = gamma_p * lax.rsqrt(var + EPS)
    shift = beta_p - mean * scale
    return scale.reshape(1, -1), shift.reshape(1, -1)


# ---------------------------------------------------------------------------
# Bottleneck forward (glue in plain JAX, hot path in Pallas)
# ---------------------------------------------------------------------------
def group_bottleneck_forward(x_nchw, params):
    """x_nchw: (N, inplanes, H, W) f32; returns (N, 2*planes, H, W) f32."""
    w1, g1, b1, w2, g2, b2, w3, g3, b3 = params
    N, Cin, H, W = x_nchw.shape
    P = w1.shape[0]
    C3 = w3.shape[0]
    assert Cin == C3, "downsample=None config requires inplanes == 2*planes"
    M = N * H * W
    Cin_p = _round_up(Cin, LANE)
    Pp = _round_up(P, LANE)
    C3p = _round_up(C3, LANE)
    tm = _pick_tm(M)
    assert M % tm == 0

    # ---- layout + lane padding: NCHW -> (M, C), channels padded to 128 -----
    x2d = jnp.transpose(x_nchw, (0, 2, 3, 1)).reshape(M, Cin)
    x2d_p = jnp.pad(x2d, ((0, 0), (0, Cin_p - Cin)))           # f32 residual
    x_bf = x2d_p.astype(jnp.bfloat16)

    w1_p = jnp.pad(jnp.transpose(w1[:, :, 0, 0]),
                   ((0, Cin_p - Cin), (0, Pp - P))).astype(jnp.bfloat16)
    w2_taps = jnp.stack(
        [jnp.pad(jnp.transpose(w2[:, :, dy, dx]), ((0, Pp - P), (0, Pp - P)))
         for dy in range(3) for dx in range(3)], axis=0).astype(jnp.bfloat16)
    w3_p = jnp.pad(jnp.transpose(w3[:, :, 0, 0]),
                   ((0, Pp - P), (0, C3p - C3))).astype(jnp.bfloat16)

    g1_p = jnp.pad(g1, (0, Pp - P));    b1_p = jnp.pad(b1, (0, Pp - P))
    g2_p = jnp.pad(g2, (0, Pp - P));    b2_p = jnp.pad(b2, (0, Pp - P))
    g3_p = jnp.pad(g3, (0, C3p - C3));  b3_p = jnp.pad(b3, (0, C3p - C3))

    # ---- conv1 (1x1): tiled matmul + BN1 partial stats ----------------------
    y1, st1 = mm_stats(x_bf, w1_p, tm)
    s1, sh1 = _finish_stats(st1, M, g1_p, b1_p)
    h1 = scale_relu(y1, s1, sh1, tm, out_dtype=jnp.bfloat16)   # (M, Pp) bf16

    # ---- conv2 (3x3, pad=1): 9-tap in-kernel accumulation (no im2col in HBM)
    h1p = jnp.pad(h1.reshape(N, H, W, Pp), ((0, 0), (1, 1), (1, 1), (0, 0)))
    y2, st2 = conv3x3_stats(h1p, w2_taps, H, W)
    s2, sh2 = _finish_stats(st2, M, g2_p, b2_p)

    # ---- BN2-apply + ReLU + conv3 (1x1) + BN3 stats, fused (h2 stays on-chip)
    y3, st3 = scale_relu_mm_stats(y2, s2, sh2, w3_p, tm)
    s3, sh3 = _finish_stats(st3, M, g3_p, b3_p)

    # ---- BN3-apply + residual + ReLU ----------------------------------------
    out2d = scale_add_relu(y3, s3, sh3, x2d_p, tm)             # (M, C3p) f32

    out = out2d[:, :C3].reshape(N, H, W, C3)
    return jnp.transpose(out, (0, 3, 1, 2))                    # back to NCHW


# ---------------------------------------------------------------------------
# Pure-JAX reference (lax convs) for correctness checks
# ---------------------------------------------------------------------------
def _bn_train(y, gamma, beta):
    mean = jnp.mean(y, axis=(0, 2, 3), keepdims=True)
    var = jnp.mean(jnp.square(y - mean), axis=(0, 2, 3), keepdims=True)
    return ((y - mean) * lax.rsqrt(var + EPS) * gamma.reshape(1, -1, 1, 1)
            + beta.reshape(1, -1, 1, 1))


def reference_forward(x, params, quantize_matmul_inputs):
    w1, g1, b1, w2, g2, b2, w3, g3, b3 = params
    dn = ("NCHW", "OIHW", "NCHW")
    q = ((lambda a: a.astype(jnp.bfloat16).astype(jnp.float32))
         if quantize_matmul_inputs else (lambda a: a))
    conv = functools.partial(lax.conv_general_dilated, dimension_numbers=dn,
                             precision=lax.Precision.HIGHEST)
    h = conv(q(x), q(w1), (1, 1), "VALID")
    h = jnp.maximum(_bn_train(h, g1, b1), 0.0)
    h = conv(q(h), q(w2), (1, 1), ((1, 1), (1, 1)))
    h = jnp.maximum(_bn_train(h, g2, b2), 0.0)
    h = conv(q(h), q(w3), (1, 1), "VALID")
    h = _bn_train(h, g3, b3) + x
    return jnp.maximum(h, 0.0)


if __name__ == "__main__":
    # Small shapes: batch=2, planes=4, inplanes=2*planes=8, spatial=16x16.
    N, H, W = 2, 16, 16
    planes = 4
    inplanes = planes * 2

    key = jax.random.PRNGKey(0)
    kx, k1, k2, k3 = jax.random.split(key, 4)

    x = jax.random.normal(kx, (N, inplanes, H, W), jnp.float32)
    w1 = 0.3 * jax.random.normal(k1, (planes, inplanes, 1, 1), jnp.float32)
    w2 = 0.3 * jax.random.normal(k2, (planes, planes, 3, 3), jnp.float32)
    w3 = 0.3 * jax.random.normal(k3, (planes * 2, planes, 1, 1), jnp.float32)
    g1 = jnp.ones((planes,), jnp.float32);      b1 = jnp.zeros((planes,), jnp.float32)
    g2 = jnp.ones((planes,), jnp.float32);      b2 = jnp.zeros((planes,), jnp.float32)
    g3 = jnp.ones((planes * 2,), jnp.float32);  b3 = jnp.zeros((planes * 2,), jnp.float32)
    params = (w1, g1, b1, w2, g2, b2, w3, g3, b3)

    fwd = jax.jit(group_bottleneck_forward)
    out = jax.block_until_ready(fwd(x, params))
    assert out.shape == (N, inplanes, H, W)

    # Tight check against the same math with bf16-rounded matmul inputs
    # (the kernels deliberately feed the MXU bf16 operands, f32 accumulation).
    ref_q = jax.block_until_ready(reference_forward(x, params, True))
    err_q = float(jnp.max(jnp.abs(out - ref_q)))
    assert jnp.allclose(out, ref_q, rtol=2e-2, atol=2e-2), \
        f"max abs err vs bf16-input reference = {err_q}"

    # Loose check against the pure-f32 module semantics (gap is only the
    # bf16 rounding of MXU operands, amplified by BN's 1/std rescaling).
    ref_f = jax.block_until_ready(reference_forward(x, params, False))
    err_f = float(jnp.max(jnp.abs(out - ref_f)))
    assert jnp.allclose(out, ref_f, rtol=1e-1, atol=1e-1), \
        f"max abs err vs f32 reference = {err_f}"

    print("KERNEL_OK")
</pallas_src>

<mosaic_0001>
module attributes {stable_mosaic.version = 11 : i64} {
  func.func @_mm_stats_kernel(%arg0: i32, %arg1: memref<256x128xbf16, #tpu.memory_space<vmem>>, %arg2: memref<128x128xbf16, #tpu.memory_space<vmem>>, %arg3: memref<256x128xf32, #tpu.memory_space<vmem>>, %arg4: memref<1x2x128xf32, #tpu.memory_space<vmem>>) attributes {dimension_semantics = [#tpu.dimension_semantics<parallel>], iteration_bounds = array<i64: 2>, scalar_prefetch = 0 : i64, scratch_operands = 0 : i64, tpu.core_type = #tpu.core_type<tc>, window_params = [{transform_indices = @transform_0, window_bounds = array<i64: 256, 128>}, {pipeline_mode = #tpu.pipeline_mode<synchronous>, transform_indices = @transform_1, window_bounds = array<i64: 128, 128>}, {transform_indices = @transform_2, window_bounds = array<i64: 256, 128>}, {transform_indices = @transform_3, window_bounds = array<i64: 1, 2, 128>}]} {
    %c0 = arith.constant 0 : index
    %c0_0 = arith.constant 0 : index
    %0 = vector.load %arg1[%c0, %c0_0] : memref<256x128xbf16, #tpu.memory_space<vmem>>, vector<256x128xbf16>
    %c0_1 = arith.constant 0 : index
    %c0_2 = arith.constant 0 : index
    %1 = vector.load %arg2[%c0_1, %c0_2] : memref<128x128xbf16, #tpu.memory_space<vmem>>, vector<128x128xbf16>
    %cst = arith.constant dense<0.000000e+00> : vector<256x128xf32>
    %2 = tpu.matmul %0, %1, %cst {dimension_numbers = #tpu.dot_dimension_numbers<[1], [0], [0], [1], [0, 0, 1, 1], [], []>} : vector<256x128xbf16>, vector<128x128xbf16>, vector<256x128xf32> -> vector<256x128xf32>
    %c0_3 = arith.constant 0 : index
    %c0_4 = arith.constant 0 : index
    %3 = vector.load %arg3[%c0_3, %c0_4] : memref<256x128xf32, #tpu.memory_space<vmem>>, vector<256x128xf32>
    tpu.vector_store %arg3[%c0_3, %c0_4], %2 {strides = array<i32>} : memref<256x128xf32, #tpu.memory_space<vmem>>, vector<256x128xf32>,
    %cst_5 = arith.constant dense<0.000000e+00> : vector<128xf32>
    %4 = vector.multi_reduction <add>, %2, %cst_5 [0] : vector<256x128xf32> to vector<128xf32>
    %5 = vector.shape_cast %4 : vector<128xf32> to vector<1x128xf32>
    %6 = arith.mulf %2, %2 : vector<256x128xf32>
    %cst_6 = arith.constant dense<0.000000e+00> : vector<128xf32>
    %7 = vector.multi_reduction <add>, %6, %cst_6 [0] : vector<256x128xf32> to vector<128xf32>
    %8 = vector.shape_cast %7 : vector<128xf32> to vector<1x128xf32>
    %9 = tpu.concatenate %5, %8 in 0 : vector<1x128xf32>, vector<1x128xf32> -> vector<2x128xf32>
    %10 = vector.shape_cast %9 : vector<2x128xf32> to vector<1x2x128xf32>
    %c0_7 = arith.constant 0 : index
    %c0_8 = arith.constant 0 : index
    %c0_9 = arith.constant 0 : index
    %11 = vector.load %arg4[%c0_7, %c0_8, %c0_9] : memref<1x2x128xf32, #tpu.memory_space<vmem>>, vector<1x2x128xf32>
    tpu.vector_store %arg4[%c0_7, %c0_8, %c0_9], %10 {strides = array<i32>} : memref<1x2x128xf32, #tpu.memory_space<vmem>>, vector<1x2x128xf32>,
    return
  }
  func.func @transform_0(%arg0: i32) -> (i32, i32) {
    %c0_i32 = arith.constant 0 : i32
    %c0_i32_0 = arith.constant 0 : i32
    return %arg0, %c0_i32 : i32, i32
  }
  func.func @transform_1(%arg0: i32) -> (i32, i32) {
    %c0_i32 = arith.constant 0 : i32
    %c0_i32_0 = arith.constant 0 : i32
    %c0_i32_1 = arith.constant 0 : i32
    return %c0_i32, %c0_i32_0 : i32, i32
  }
  func.func @transform_2(%arg0: i32) -> (i32, i32) {
    %c0_i32 = arith.constant 0 : i32
    %c0_i32_0 = arith.constant 0 : i32
    return %arg0, %c0_i32 : i32, i32
  }
  func.func @transform_3(%arg0: i32) -> (i32, i32, i32) {
    %c0_i32 = arith.constant 0 : i32
    %c0_i32_0 = arith.constant 0 : i32
    %c0_i32_1 = arith.constant 0 : i32
    return %arg0, %c0_i32, %c0_i32_0 : i32, i32, i32
  }
}

module attributes {stable_mosaic.version = 11 : i64} {
  func.func @_scale_relu_kernel(%arg0: i32, %arg1: memref<256x128xf32, #tpu.memory_space<vmem>>, %arg2: memref<1x128xf32, #tpu.memory_space<vmem>>, %arg3: memref<1x128xf32, #tpu.memory_space<vmem>>, %arg4: memref<256x128xbf16, #tpu.memory_space<vmem>>) attributes {dimension_semantics = [#tpu.dimension_semantics<parallel>], iteration_bounds = array<i64: 2>, scalar_prefetch = 0 : i64, scratch_operands = 0 : i64, tpu.core_type = #tpu.core_type<tc>, window_params = [{transform_indices = @transform_0, window_bounds = array<i64: 256, 128>}, {pipeline_mode = #tpu.pipeline_mode<synchronous>, transform_indices = @transform_1, window_bounds = array<i64: 1, 128>}, {pipeline_mode = #tpu.pipeline_mode<synchronous>, transform_indices = @transform_2, window_bounds = array<i64: 1, 128>}, {transform_indices = @transform_3, window_bounds = array<i64: 256, 128>}]} {
    %c0 = arith.constant 0 : index
    %c0_0 = arith.constant 0 : index
    %0 = vector.load %arg1[%c0, %c0_0] : memref<256x128xf32, #tpu.memory_space<vmem>>, vector<256x128xf32>
    %c0_1 = arith.constant 0 : index
    %c0_2 = arith.constant 0 : index
    %1 = vector.load %arg2[%c0_1, %c0_2] : memref<1x128xf32, #tpu.memory_space<vmem>>, vector<1x128xf32>
    %2 = vector.broadcast %1 : vector<1x128xf32> to vector<256x128xf32>
    %3 = arith.mulf %0, %2 : vector<256x128xf32>
    %c0_3 = arith.constant 0 : index
    %c0_4 = arith.constant 0 : index
    %4 = vector.load %arg3[%c0_3, %c0_4] : memref<1x128xf32, #tpu.memory_space<vmem>>, vector<1x128xf32>
    %5 = vector.broadcast %4 : vector<1x128xf32> to vector<256x128xf32>
    %6 = arith.addf %3, %5 : vector<256x128xf32>
    %cst = arith.constant 0.000000e+00 : f32
    %7 = vector.broadcast %cst : f32 to vector<256x128xf32>
    %8 = arith.maximumf %6, %7 : vector<256x128xf32>
    %9 = arith.truncf %8 : vector<256x128xf32> to vector<256x128xbf16>
    %c0_5 = arith.constant 0 : index
    %c0_6 = arith.constant 0 : index
    %10 = vector.load %arg4[%c0_5, %c0_6] : memref<256x128xbf16, #tpu.memory_space<vmem>>, vector<256x128xbf16>
    tpu.vector_store %arg4[%c0_5, %c0_6], %9 {strides = array<i32>} : memref<256x128xbf16, #tpu.memory_space<vmem>>, vector<256x128xbf16>,
    return
  }
  func.func @transform_0(%arg0: i32) -> (i32, i32) {
    %c0_i32 = arith.constant 0 : i32
    %c0_i32_0 = arith.constant 0 : i32
    return %arg0, %c0_i32 : i32, i32
  }
  func.func @transform_1(%arg0: i32) -> (i32, i32) {
    %c0_i32 = arith.constant 0 : i32
    %c0_i32_0 = arith.constant 0 : i32
    %c0_i32_1 = arith.constant 0 : i32
    return %c0_i32, %c0_i32_0 : i32, i32
  }
  func.func @transform_2(%arg0: i32) -> (i32, i32) {
    %c0_i32 = arith.constant 0 : i32
    %c0_i32_0 = arith.constant 0 : i32
    %c0_i32_1 = arith.constant 0 : i32
    return %c0_i32, %c0_i32_0 : i32, i32
  }
  func.func @transform_3(%arg0: i32) -> (i32, i32) {
    %c0_i32 = arith.constant 0 : i32
    %c0_i32_0 = arith.constant 0 : i32
    return %arg0, %c0_i32 : i32, i32
  }
}

module attributes {stable_mosaic.version = 11 : i64} {
  func.func @kernel(%arg0: i32, %arg1: memref<1x18x18x128xbf16, #tpu.memory_space<vmem>>, %arg2: memref<9x128x128xbf16, #tpu.memory_space<vmem>>, %arg3: memref<256x128xf32, #tpu.memory_space<vmem>>, %arg4: memref<1x2x128xf32, #tpu.memory_space<vmem>>) attributes {dimension_semantics = [#tpu.dimension_semantics<parallel>], iteration_bounds = array<i64: 2>, scalar_prefetch = 0 : i64, scratch_operands = 0 : i64, tpu.core_type = #tpu.core_type<tc>, window_params = [{transform_indices = @transform_0, window_bounds = array<i64: 1, 18, 18, 128>}, {pipeline_mode = #tpu.pipeline_mode<synchronous>, transform_indices = @transform_1, window_bounds = array<i64: 9, 128, 128>}, {transform_indices = @transform_2, window_bounds = array<i64: 256, 128>}, {transform_indices = @transform_3, window_bounds = array<i64: 1, 2, 128>}]} {
    %cst = arith.constant 0.000000e+00 : f32
    %0 = vector.broadcast %cst : f32 to vector<256x128xf32>
    %c0 = arith.constant 0 : index
    %c0_0 = arith.constant 0 : index
    %c0_1 = arith.constant 0 : index
    %c0_2 = arith.constant 0 : index
    %1 = vector.load %arg1[%c0, %c0_0, %c0_1, %c0_2] : memref<1x18x18x128xbf16, #tpu.memory_space<vmem>>, vector<1x16x16x128xbf16>
    %2 = vector.shape_cast %1 : vector<1x16x16x128xbf16> to vector<16x16x128xbf16>
    %3 = vector.shape_cast %2 : vector<16x16x128xbf16> to vector<256x128xbf16>
    %c0_3 = arith.constant 0 : index
    %c0_4 = arith.constant 0 : index
    %c0_5 = arith.constant 0 : index
    %4 = vector.load %arg2[%c0_3, %c0_4, %c0_5] : memref<9x128x128xbf16, #tpu.memory_space<vmem>>, vector<1x128x128xbf16>
    %5 = vector.shape_cast %4 : vector<1x128x128xbf16> to vector<128x128xbf16>
    %cst_6 = arith.constant dense<0.000000e+00> : vector<256x128xf32>
    %6 = tpu.matmul %3, %5, %cst_6 {dimension_numbers = #tpu.dot_dimension_numbers<[1], [0], [0], [1], [0, 0, 1, 1], [], []>} : vector<256x128xbf16>, vector<128x128xbf16>, vector<256x128xf32> -> vector<256x128xf32>
    %7 = arith.addf %0, %6 : vector<256x128xf32>
    %c0_7 = arith.constant 0 : index
    %c0_8 = arith.constant 0 : index
    %c1 = arith.constant 1 : index
    %c0_9 = arith.constant 0 : index
    %8 = vector.load %arg1[%c0_7, %c0_8, %c1, %c0_9] : memref<1x18x18x128xbf16, #tpu.memory_space<vmem>>, vector<1x16x16x128xbf16>
    %9 = vector.shape_cast %8 : vector<1x16x16x128xbf16> to vector<16x16x128xbf16>
    %10 = vector.shape_cast %9 : vector<16x16x128xbf16> to vector<256x128xbf16>
    %c1_10 = arith.constant 1 : index
    %c0_11 = arith.constant 0 : index
    %c0_12 = arith.constant 0 : index
    %11 = vector.load %arg2[%c1_10, %c0_11, %c0_12] : memref<9x128x128xbf16, #tpu.memory_space<vmem>>, vector<1x128x128xbf16>
    %12 = vector.shape_cast %11 : vector<1x128x128xbf16> to vector<128x128xbf16>
    %cst_13 = arith.constant dense<0.000000e+00> : vector<256x128xf32>
    %13 = tpu.matmul %10, %12, %cst_13 {dimension_numbers = #tpu.dot_dimension_numbers<[1], [0], [0], [1], [0, 0, 1, 1], [], []>} : vector<256x128xbf16>, vector<128x128xbf16>, vector<256x128xf32> -> vector<256x128xf32>
    %14 = arith.addf %7, %13 : vector<256x128xf32>
    %c0_14 = arith.constant 0 : index
    %c0_15 = arith.constant 0 : index
    %c2 = arith.constant 2 : index
    %c0_16 = arith.constant 0 : index
    %15 = vector.load %arg1[%c0_14, %c0_15, %c2, %c0_16] : memref<1x18x18x128xbf16, #tpu.memory_space<vmem>>, vector<1x16x16x128xbf16>
    %16 = vector.shape_cast %15 : vector<1x16x16x128xbf16> to vector<16x16x128xbf16>
    %17 = vector.shape_cast %16 : vector<16x16x128xbf16> to vector<256x128xbf16>
    %c2_17 = arith.constant 2 : index
    %c0_18 = arith.constant 0 : index
    %c0_19 = arith.constant 0 : index
    %18 = vector.load %arg2[%c2_17, %c0_18, %c0_19] : memref<9x128x128xbf16, #tpu.memory_space<vmem>>, vector<1x128x128xbf16>
    %19 = vector.shape_cast %18 : vector<1x128x128xbf16> to vector<128x128xbf16>
    %cst_20 = arith.constant dense<0.000000e+00> : vector<256x128xf32>
    %20 = tpu.matmul %17, %19, %cst_20 {dimension_numbers = #tpu.dot_dimension_numbers<[1], [0], [0], [1], [0, 0, 1, 1], [], []>} : vector<256x128xbf16>, vector<128x128xbf16>, vector<256x128xf32> -> vector<256x128xf32>
    %21 = arith.addf %14, %20 : vector<256x128xf32>
    %c0_21 = arith.constant 0 : index
    %c1_22 = arith.constant 1 : index
    %c0_23 = arith.constant 0 : index
    %c0_24 = arith.constant 0 : index
    %22 = vector.load %arg1[%c0_21, %c1_22, %c0_23, %c0_24] : memref<1x18x18x128xbf16, #tpu.memory_space<vmem>>, vector<1x16x16x128xbf16>
    %23 = vector.shape_cast %22 : vector<1x16x16x128xbf16> to vector<16x16x128xbf16>
    %24 = vector.shape_cast %23 : vector<16x16x128xbf16> to vector<256x128xbf16>
    %c3 = arith.constant 3 : index
    %c0_25 = arith.constant 0 : index
    %c0_26 = arith.constant 0 : index
    %25 = vector.load %arg2[%c3, %c0_25, %c0_26] : memref<9x128x128xbf16, #tpu.memory_space<vmem>>, vector<1x128x128xbf16>
    %26 = vector.shape_cast %25 : vector<1x128x128xbf16> to vector<128x128xbf16>
    %cst_27 = arith.constant dense<0.000000e+00> : vector<256x128xf32>
    %27 = tpu.matmul %24, %26, %cst_27 {dimension_numbers = #tpu.dot_dimension_numbers<[1], [0], [0], [1], [0, 0, 1, 1], [], []>} : vector<256x128xbf16>, vector<128x128xbf16>, vector<256x128xf32> -> vector<256x128xf32>
    %28 = arith.addf %21, %27 : vector<256x128xf32>
    %c0_28 = arith.constant 0 : index
    %c1_29 = arith.constant 1 : index
    %c1_30 = arith.constant 1 : index
    %c0_31 = arith.constant 0 : index
    %29 = vector.load %arg1[%c0_28, %c1_29, %c1_30, %c0_31] : memref<1x18x18x128xbf16, #tpu.memory_space<vmem>>, vector<1x16x16x128xbf16>
    %30 = vector.shape_cast %29 : vector<1x16x16x128xbf16> to vector<16x16x128xbf16>
    %31 = vector.shape_cast %30 : vector<16x16x128xbf16> to vector<256x128xbf16>
    %c4 = arith.constant 4 : index
    %c0_32 = arith.constant 0 : index
    %c0_33 = arith.constant 0 : index
    %32 = vector.load %arg2[%c4, %c0_32, %c0_33] : memref<9x128x128xbf16, #tpu.memory_space<vmem>>, vector<1x128x128xbf16>
    %33 = vector.shape_cast %32 : vector<1x128x128xbf16> to vector<128x128xbf16>
    %cst_34 = arith.constant dense<0.000000e+00> : vector<256x128xf32>
    %34 = tpu.matmul %31, %33, %cst_34 {dimension_numbers = #tpu.dot_dimension_numbers<[1], [0], [0], [1], [0, 0, 1, 1], [], []>} : vector<256x128xbf16>, vector<128x128xbf16>, vector<256x128xf32> -> vector<256x128xf32>
    %35 = arith.addf %28, %34 : vector<256x128xf32>
    %c0_35 = arith.constant 0 : index
    %c1_36 = arith.constant 1 : index
    %c2_37 = arith.constant 2 : index
    %c0_38 = arith.constant 0 : index
    %36 = vector.load %arg1[%c0_35, %c1_36, %c2_37, %c0_38] : memref<1x18x18x128xbf16, #tpu.memory_space<vmem>>, vector<1x16x16x128xbf16>
    %37 = vector.shape_cast %36 : vector<1x16x16x128xbf16> to vector<16x16x128xbf16>
    %38 = vector.shape_cast %37 : vector<16x16x128xbf16> to vector<256x128xbf16>
    %c5 = arith.constant 5 : index
    %c0_39 = arith.constant 0 : index
    %c0_40 = arith.constant 0 : index
    %39 = vector.load %arg2[%c5, %c0_39, %c0_40] : memref<9x128x128xbf16, #tpu.memory_space<vmem>>, vector<1x128x128xbf16>
    %40 = vector.shape_cast %39 : vector<1x128x128xbf16> to vector<128x128xbf16>
    %cst_41 = arith.constant dense<0.000000e+00> : vector<256x128xf32>
    %41 = tpu.matmul %38, %40, %cst_41 {dimension_numbers = #tpu.dot_dimension_numbers<[1], [0], [0], [1], [0, 0, 1, 1], [], []>} : vector<256x128xbf16>, vector<128x128xbf16>, vector<256x128xf32> -> vector<256x128xf32>
    %42 = arith.addf %35, %41 : vector<256x128xf32>
    %c0_42 = arith.constant 0 : index
    %c2_43 = arith.constant 2 : index
    %c0_44 = arith.constant 0 : index
    %c0_45 = arith.constant 0 : index
    %43 = vector.load %arg1[%c0_42, %c2_43, %c0_44, %c0_45] : memref<1x18x18x128xbf16, #tpu.memory_space<vmem>>, vector<1x16x16x128xbf16>
    %44 = vector.shape_cast %43 : vector<1x16x16x128xbf16> to vector<16x16x128xbf16>
    %45 = vector.shape_cast %44 : vector<16x16x128xbf16> to vector<256x128xbf16>
    %c6 = arith.constant 6 : index
    %c0_46 = arith.constant 0 : index
    %c0_47 = arith.constant 0 : index
    %46 = vector.load %arg2[%c6, %c0_46, %c0_47] : memref<9x128x128xbf16, #tpu.memory_space<vmem>>, vector<1x128x128xbf16>
    %47 = vector.shape_cast %46 : vector<1x128x128xbf16> to vector<128x128xbf16>
    %cst_48 = arith.constant dense<0.000000e+00> : vector<256x128xf32>
    %48 = tpu.matmul %45, %47, %cst_48 {dimension_numbers = #tpu.dot_dimension_numbers<[1], [0], [0], [1], [0, 0, 1, 1], [], []>} : vector<256x128xbf16>, vector<128x128xbf16>, vector<256x128xf32> -> vector<256x128xf32>
    %49 = arith.addf %42, %48 : vector<256x128xf32>
    %c0_49 = arith.constant 0 : index
    %c2_50 = arith.constant 2 : index
    %c1_51 = arith.constant 1 : index
    %c0_52 = arith.constant 0 : index
    %50 = vector.load %arg1[%c0_49, %c2_50, %c1_51, %c0_52] : memref<1x18x18x128xbf16, #tpu.memory_space<vmem>>, vector<1x16x16x128xbf16>
    %51 = vector.shape_cast %50 : vector<1x16x16x128xbf16> to vector<16x16x128xbf16>
    %52 = vector.shape_cast %51 : vector<16x16x128xbf16> to vector<256x128xbf16>
    %c7 = arith.constant 7 : index
    %c0_53 = arith.constant 0 : index
    %c0_54 = arith.constant 0 : index
    %53 = vector.load %arg2[%c7, %c0_53, %c0_54] : memref<9x128x128xbf16, #tpu.memory_space<vmem>>, vector<1x128x128xbf16>
    %54 = vector.shape_cast %53 : vector<1x128x128xbf16> to vector<128x128xbf16>
    %cst_55 = arith.constant dense<0.000000e+00> : vector<256x128xf32>
    %55 = tpu.matmul %52, %54, %cst_55 {dimension_numbers = #tpu.dot_dimension_numbers<[1], [0], [0], [1], [0, 0, 1, 1], [], []>} : vector<256x128xbf16>, vector<128x128xbf16>, vector<256x128xf32> -> vector<256x128xf32>
    %56 = arith.addf %49, %55 : vector<256x128xf32>
    %c0_56 = arith.constant 0 : index
    %c2_57 = arith.constant 2 : index
    %c2_58 = arith.constant 2 : index
    %c0_59 = arith.constant 0 : index
    %57 = vector.load %arg1[%c0_56, %c2_57, %c2_58, %c0_59] : memref<1x18x18x128xbf16, #tpu.memory_space<vmem>>, vector<1x16x16x128xbf16>
    %58 = vector.shape_cast %57 : vector<1x16x16x128xbf16> to vector<16x16x128xbf16>
    %59 = vector.shape_cast %58 : vector<16x16x128xbf16> to vector<256x128xbf16>
    %c8 = arith.constant 8 : index
    %c0_60 = arith.constant 0 : index
    %c0_61 = arith.constant 0 : index
    %60 = vector.load %arg2[%c8, %c0_60, %c0_61] : memref<9x128x128xbf16, #tpu.memory_space<vmem>>, vector<1x128x128xbf16>
    %61 = vector.shape_cast %60 : vector<1x128x128xbf16> to vector<128x128xbf16>
    %cst_62 = arith.constant dense<0.000000e+00> : vector<256x128xf32>
    %62 = tpu.matmul %59, %61, %cst_62 {dimension_numbers = #tpu.dot_dimension_numbers<[1], [0], [0], [1], [0, 0, 1, 1], [], []>} : vector<256x128xbf16>, vector<128x128xbf16>, vector<256x128xf32> -> vector<256x128xf32>
    %63 = arith.addf %56, %62 : vector<256x128xf32>
    %c0_63 = arith.constant 0 : index
    %c0_64 = arith.constant 0 : index
    %64 = vector.load %arg3[%c0_63, %c0_64] : memref<256x128xf32, #tpu.memory_space<vmem>>, vector<256x128xf32>
    tpu.vector_store %arg3[%c0_63, %c0_64], %63 {strides = array<i32>} : memref<256x128xf32, #tpu.memory_space<vmem>>, vector<256x128xf32>,
    %cst_65 = arith.constant dense<0.000000e+00> : vector<128xf32>
    %65 = vector.multi_reduction <add>, %63, %cst_65 [0] : vector<256x128xf32> to vector<128xf32>
    %66 = vector.shape_cast %65 : vector<128xf32> to vector<1x128xf32>
    %67 = arith.mulf %63, %63 : vector<256x128xf32>
    %cst_66 = arith.constant dense<0.000000e+00> : vector<128xf32>
    %68 = vector.multi_reduction <add>, %67, %cst_66 [0] : vector<256x128xf32> to vector<128xf32>
    %69 = vector.shape_cast %68 : vector<128xf32> to vector<1x128xf32>
    %70 = tpu.concatenate %66, %69 in 0 : vector<1x128xf32>, vector<1x128xf32> -> vector<2x128xf32>
    %71 = vector.shape_cast %70 : vector<2x128xf32> to vector<1x2x128xf32>
    %c0_67 = arith.constant 0 : index
    %c0_68 = arith.constant 0 : index
    %c0_69 = arith.constant 0 : index
    %72 = vector.load %arg4[%c0_67, %c0_68, %c0_69] : memref<1x2x128xf32, #tpu.memory_space<vmem>>, vector<1x2x128xf32>
    tpu.vector_store %arg4[%c0_67, %c0_68, %c0_69], %71 {strides = array<i32>} : memref<1x2x128xf32, #tpu.memory_space<vmem>>, vector<1x2x128xf32>,
    return
  }
  func.func @transform_0(%arg0: i32) -> (i32, i32, i32, i32) {
    %c0_i32 = arith.constant 0 : i32
    %c0_i32_0 = arith.constant 0 : i32
    %c0_i32_1 = arith.constant 0 : i32
    %c0_i32_2 = arith.constant 0 : i32
    return %arg0, %c0_i32, %c0_i32_0, %c0_i32_1 : i32, i32, i32, i32
  }
  func.func @transform_1(%arg0: i32) -> (i32, i32, i32) {
    %c0_i32 = arith.constant 0 : i32
    %c0_i32_0 = arith.constant 0 : i32
    %c0_i32_1 = arith.constant 0 : i32
    %c0_i32_2 = arith.constant 0 : i32
    return %c0_i32, %c0_i32_0, %c0_i32_1 : i32, i32, i32
  }
  func.func @transform_2(%arg0: i32) -> (i32, i32) {
    %c0_i32 = arith.constant 0 : i32
    %c0_i32_0 = arith.constant 0 : i32
    return %arg0, %c0_i32 : i32, i32
  }
  func.func @transform_3(%arg0: i32) -> (i32, i32, i32) {
    %c0_i32 = arith.constant 0 : i32
    %c0_i32_0 = arith.constant 0 : i32
    %c0_i32_1 = arith.constant 0 : i32
    return %arg0, %c0_i32, %c0_i32_0 : i32, i32, i32
  }
}

module attributes {stable_mosaic.version = 11 : i64} {
  func.func @_scale_relu_mm_stats_kernel(%arg0: i32, %arg1: memref<256x128xf32, #tpu.memory_space<vmem>>, %arg2: memref<1x128xf32, #tpu.memory_space<vmem>>, %arg3: memref<1x128xf32, #tpu.memory_space<vmem>>, %arg4: memref<128x128xbf16, #tpu.memory_space<vmem>>, %arg5: memref<256x128xf32, #tpu.memory_space<vmem>>, %arg6: memref<1x2x128xf32, #tpu.memory_space<vmem>>) attributes {dimension_semantics = [#tpu.dimension_semantics<parallel>], iteration_bounds = array<i64: 2>, scalar_prefetch = 0 : i64, scratch_operands = 0 : i64, tpu.core_type = #tpu.core_type<tc>, window_params = [{transform_indices = @transform_0, window_bounds = array<i64: 256, 128>}, {pipeline_mode = #tpu.pipeline_mode<synchronous>, transform_indices = @transform_1, window_bounds = array<i64: 1, 128>}, {pipeline_mode = #tpu.pipeline_mode<synchronous>, transform_indices = @transform_2, window_bounds = array<i64: 1, 128>}, {pipeline_mode = #tpu.pipeline_mode<synchronous>, transform_indices = @transform_3, window_bounds = array<i64: 128, 128>}, {transform_indices = @transform_4, window_bounds = array<i64: 256, 128>}, {transform_indices = @transform_5, window_bounds = array<i64: 1, 2, 128>}]} {
    %c0 = arith.constant 0 : index
    %c0_0 = arith.constant 0 : index
    %0 = vector.load %arg1[%c0, %c0_0] : memref<256x128xf32, #tpu.memory_space<vmem>>, vector<256x128xf32>
    %c0_1 = arith.constant 0 : index
    %c0_2 = arith.constant 0 : index
    %1 = vector.load %arg2[%c0_1, %c0_2] : memref<1x128xf32, #tpu.memory_space<vmem>>, vector<1x128xf32>
    %2 = vector.broadcast %1 : vector<1x128xf32> to vector<256x128xf32>
    %3 = arith.mulf %0, %2 : vector<256x128xf32>
    %c0_3 = arith.constant 0 : index
    %c0_4 = arith.constant 0 : index
    %4 = vector.load %arg3[%c0_3, %c0_4] : memref<1x128xf32, #tpu.memory_space<vmem>>, vector<1x128xf32>
    %5 = vector.broadcast %4 : vector<1x128xf32> to vector<256x128xf32>
    %6 = arith.addf %3, %5 : vector<256x128xf32>
    %cst = arith.constant 0.000000e+00 : f32
    %7 = vector.broadcast %cst : f32 to vector<256x128xf32>
    %8 = arith.maximumf %6, %7 : vector<256x128xf32>
    %9 = arith.truncf %8 : vector<256x128xf32> to vector<256x128xbf16>
    %c0_5 = arith.constant 0 : index
    %c0_6 = arith.constant 0 : index
    %10 = vector.load %arg4[%c0_5, %c0_6] : memref<128x128xbf16, #tpu.memory_space<vmem>>, vector<128x128xbf16>
    %cst_7 = arith.constant dense<0.000000e+00> : vector<256x128xf32>
    %11 = tpu.matmul %9, %10, %cst_7 {dimension_numbers = #tpu.dot_dimension_numbers<[1], [0], [0], [1], [0, 0, 1, 1], [], []>} : vector<256x128xbf16>, vector<128x128xbf16>, vector<256x128xf32> -> vector<256x128xf32>
    %c0_8 = arith.constant 0 : index
    %c0_9 = arith.constant 0 : index
    %12 = vector.load %arg5[%c0_8, %c0_9] : memref<256x128xf32, #tpu.memory_space<vmem>>, vector<256x128xf32>
    tpu.vector_store %arg5[%c0_8, %c0_9], %11 {strides = array<i32>} : memref<256x128xf32, #tpu.memory_space<vmem>>, vector<256x128xf32>,
    %cst_10 = arith.constant dense<0.000000e+00> : vector<128xf32>
    %13 = vector.multi_reduction <add>, %11, %cst_10 [0] : vector<256x128xf32> to vector<128xf32>
    %14 = vector.shape_cast %13 : vector<128xf32> to vector<1x128xf32>
    %15 = arith.mulf %11, %11 : vector<256x128xf32>
    %cst_11 = arith.constant dense<0.000000e+00> : vector<128xf32>
    %16 = vector.multi_reduction <add>, %15, %cst_11 [0] : vector<256x128xf32> to vector<128xf32>
    %17 = vector.shape_cast %16 : vector<128xf32> to vector<1x128xf32>
    %18 = tpu.concatenate %14, %17 in 0 : vector<1x128xf32>, vector<1x128xf32> -> vector<2x128xf32>
    %19 = vector.shape_cast %18 : vector<2x128xf32> to vector<1x2x128xf32>
    %c0_12 = arith.constant 0 : index
    %c0_13 = arith.constant 0 : index
    %c0_14 = arith.constant 0 : index
    %20 = vector.load %arg6[%c0_12, %c0_13, %c0_14] : memref<1x2x128xf32, #tpu.memory_space<vmem>>, vector<1x2x128xf32>
    tpu.vector_store %arg6[%c0_12, %c0_13, %c0_14], %19 {strides = array<i32>} : memref<1x2x128xf32, #tpu.memory_space<vmem>>, vector<1x2x128xf32>,
    return
  }
  func.func @transform_0(%arg0: i32) -> (i32, i32) {
    %c0_i32 = arith.constant 0 : i32
    %c0_i32_0 = arith.constant 0 : i32
    return %arg0, %c0_i32 : i32, i32
  }
  func.func @transform_1(%arg0: i32) -> (i32, i32) {
    %c0_i32 = arith.constant 0 : i32
    %c0_i32_0 = arith.constant 0 : i32
    %c0_i32_1 = arith.constant 0 : i32
    return %c0_i32, %c0_i32_0 : i32, i32
  }
  func.func @transform_2(%arg0: i32) -> (i32, i32) {
    %c0_i32 = arith.constant 0 : i32
    %c0_i32_0 = arith.constant 0 : i32
    %c0_i32_1 = arith.constant 0 : i32
    return %c0_i32, %c0_i32_0 : i32, i32
  }
  func.func @transform_3(%arg0: i32) -> (i32, i32) {
    %c0_i32 = arith.constant 0 : i32
    %c0_i32_0 = arith.constant 0 : i32
    %c0_i32_1 = arith.constant 0 : i32
    return %c0_i32, %c0_i32_0 : i32, i32
  }
  func.func @transform_4(%arg0: i32) -> (i32, i32) {
    %c0_i32 = arith.constant 0 : i32
    %c0_i32_0 = arith.constant 0 : i32
    return %arg0, %c0_i32 : i32, i32
  }
  func.func @transform_5(%arg0: i32) -> (i32, i32, i32) {
    %c0_i32 = arith.constant 0 : i32
    %c0_i32_0 = arith.constant 0 : i32
    %c0_i32_1 = arith.constant 0 : i32
    return %arg0, %c0_i32, %c0_i32_0 : i32, i32, i32
  }
}

module attributes {stable_mosaic.version = 11 : i64} {
  func.func @_scale_add_relu_kernel(%arg0: i32, %arg1: memref<256x128xf32, #tpu.memory_space<vmem>>, %arg2: memref<1x128xf32, #tpu.memory_space<vmem>>, %arg3: memref<1x128xf32, #tpu.memory_space<vmem>>, %arg4: memref<256x128xf32, #tpu.memory_space<vmem>>, %arg5: memref<256x128xf32, #tpu.memory_space<vmem>>) attributes {dimension_semantics = [#tpu.dimension_semantics<parallel>], iteration_bounds = array<i64: 2>, scalar_prefetch = 0 : i64, scratch_operands = 0 : i64, tpu.core_type = #tpu.core_type<tc>, window_params = [{transform_indices = @transform_0, window_bounds = array<i64: 256, 128>}, {pipeline_mode = #tpu.pipeline_mode<synchronous>, transform_indices = @transform_1, window_bounds = array<i64: 1, 128>}, {pipeline_mode = #tpu.pipeline_mode<synchronous>, transform_indices = @transform_2, window_bounds = array<i64: 1, 128>}, {transform_indices = @transform_3, window_bounds = array<i64: 256, 128>}, {transform_indices = @transform_4, window_bounds = array<i64: 256, 128>}]} {
    %c0 = arith.constant 0 : index
    %c0_0 = arith.constant 0 : index
    %0 = vector.load %arg1[%c0, %c0_0] : memref<256x128xf32, #tpu.memory_space<vmem>>, vector<256x128xf32>
    %c0_1 = arith.constant 0 : index
    %c0_2 = arith.constant 0 : index
    %1 = vector.load %arg2[%c0_1, %c0_2] : memref<1x128xf32, #tpu.memory_space<vmem>>, vector<1x128xf32>
    %2 = vector.broadcast %1 : vector<1x128xf32> to vector<256x128xf32>
    %3 = arith.mulf %0, %2 : vector<256x128xf32>
    %c0_3 = arith.constant 0 : index
    %c0_4 = arith.constant 0 : index
    %4 = vector.load %arg3[%c0_3, %c0_4] : memref<1x128xf32, #tpu.memory_space<vmem>>, vector<1x128xf32>
    %5 = vector.broadcast %4 : vector<1x128xf32> to vector<256x128xf32>
    %6 = arith.addf %3, %5 : vector<256x128xf32>
    %c0_5 = arith.constant 0 : index
    %c0_6 = arith.constant 0 : index
    %7 = vector.load %arg4[%c0_5, %c0_6] : memref<256x128xf32, #tpu.memory_space<vmem>>, vector<256x128xf32>
    %8 = arith.addf %6, %7 : vector<256x128xf32>
    %cst = arith.constant 0.000000e+00 : f32
    %9 = vector.broadcast %cst : f32 to vector<256x128xf32>
    %10 = arith.maximumf %8, %9 : vector<256x128xf32>
    %c0_7 = arith.constant 0 : index
    %c0_8 = arith.constant 0 : index
    %11 = vector.load %arg5[%c0_7, %c0_8] : memref<256x128xf32, #tpu.memory_space<vmem>>, vector<256x128xf32>
    tpu.vector_store %arg5[%c0_7, %c0_8], %10 {strides = array<i32>} : memref<256x128xf32, #tpu.memory_space<vmem>>, vector<256x128xf32>,
    return
  }
  func.func @transform_0(%arg0: i32) -> (i32, i32) {
    %c0_i32 = arith.constant 0 : i32
    %c0_i32_0 = arith.constant 0 : i32
    return %arg0, %c0_i32 : i32, i32
  }
  func.func @transform_1(%arg0: i32) -> (i32, i32) {
    %c0_i32 = arith.constant 0 : i32
    %c0_i32_0 = arith.constant 0 : i32
    %c0_i32_1 = arith.constant 0 : i32
    return %c0_i32, %c0_i32_0 : i32, i32
  }
  func.func @transform_2(%arg0: i32) -> (i32, i32) {
    %c0_i32 = arith.constant 0 : i32
    %c0_i32_0 = arith.constant 0 : i32
    %c0_i32_1 = arith.constant 0 : i32
    return %c0_i32, %c0_i32_0 : i32, i32
  }
  func.func @transform_3(%arg0: i32) -> (i32, i32) {
    %c0_i32 = arith.constant 0 : i32
    %c0_i32_0 = arith.constant 0 : i32
    return %arg0, %c0_i32 : i32, i32
  }
  func.func @transform_4(%arg0: i32) -> (i32, i32) {
    %c0_i32 = arith.constant 0 : i32
    %c0_i32_0 = arith.constant 0 : i32
    return %arg0, %c0_i32 : i32, i32
  }
}

</mosaic_0001>

<bundles_post_ra>
// kernel: group_bottleneck_forward.6
= control target key start
LH: loop header
LB: loop body
LE: loop exit
PB: predicated region body
PF: predicated region fallthrough
CT: control target
= control target key end

     0   :  { %s740_s12 = smov 0   ;;  %s887_s0 = inlined_call_operand.vmem [shape: f32[512,128], index: 0, kind: input, shape index: {}]   ;;  %s888_s1 = inlined_call_operand.vmem [shape: f32[1,128], index: 1, kind: input, shape index: {}]   ;;  %s889_s2 = inlined_call_operand.vmem [shape: f32[1,128], index: 2, kind: input, shape index: {}]   ;;  %s890_s3 = inlined_call_operand.vmem [shape: bf16[512,128], index: 3, kind: output, shape index: {}]  }
   0x1 LB: > { %s532_s13 = sadd.s32 4294967295, %s718_s12   ;;  %p536_p0 = scmp.ge.s32.totalorder %s718_s12, 1  ;;  %s718_s12 = sphi %s740_s12, %s13_s12  }
   0x2   : > { %p138_p1 = scmp.lt.s32.totalorder %s718_s12, 3 }
   0x4   : > { %p139_p2 = pnand %p536_p0, %p138_p1 }
   0x5   : > { %s537_s14 = sshll.u32 (!%p139_p2), %s532_s13, 5  ;;  %v754_v0 = vld [vmem:[%s888_s1] ss:$0 sm:$0xff] (!%p139_p2) }
   0x6   : > { %142 = sbr.rel (%p139_p2) target bundleno = 51 (0x33), region = 32  ;;  %p163_p3 = scmp.lt.s32.totalorder (!%p139_p2), %s537_s14, 63  ;;  %v764_v1 = vld [vmem:[%s889_s2] ss:$0 sm:$0xff] (!%p139_p2) }
   0xd   : > { %s892_s14 = smov (!%p163_p3, %s537_s14), 63 }
   0xe   : > { %s538_s15 = sshll.u32 %s892_s14, 3  ;;  %s540_s23 = sshll.u32 %s892_s14, 2 }
   0xf   : > { %s759_s20 = scalar_lea.vmem %s887_s0, %s538_s15  ;;  %s796_s26 = scalar_lea.vmem %s890_s3, %s540_s23 }
  0x10   : > { %v174_v2 = vld [vmem:[%s759_s20] sm:$0xff]  ;;  %v175_v3 = vld [vmem:[%s759_s20 + $0x8] sm:$0xff]  ;;  %v176_v4 = vld [vmem:[%s759_s20 + $0x10] sm:$0xff] }
  0x11   : > { %v213_v5 = vmul.f32 %v754_v0, %v174_v2  ;;  %v214_v6 = vmul.f32 %v754_v0, %v175_v3  ;;  %v177_v7 = vld [vmem:[%s759_s20 + $0x18] sm:$0xff]  ;;  %v215_v8 = vmul.f32 %v754_v0, %v176_v4  ;;  %v178_v9 = vld [vmem:[%s759_s20 + $0x20] sm:$0xff]  ;;  %v179_v10 = vld [vmem:[%s759_s20 + $0x28] sm:$0xff] }
  0x12   : > { %v216_v11 = vmul.f32 %v754_v0, %v177_v7  ;;  %v217_v12 = vmul.f32 %v754_v0, %v178_v9  ;;  %v218_v13 = vmul.f32 %v754_v0, %v179_v10  ;;  %v180_v14 = vld [vmem:[%s759_s20 + $0x30] sm:$0xff]  ;;  %v181_v15 = vld [vmem:[%s759_s20 + $0x38] sm:$0xff]  ;;  %v182_v24 = vld [vmem:[%s759_s20 + $0x40] sm:$0xff] }
  0x13   : > { %v252_v16 = vadd.f32 %v764_v1, %v213_v5  ;;  %v253_v17 = vadd.f32 %v764_v1, %v214_v6  ;;  %v254_v18 = vadd.f32 %v764_v1, %v215_v8  ;;  %v219_v19 = vmul.f32 %v754_v0, %v180_v14  ;;  %v183_v25 = vld [vmem:[%s759_s20 + $0x48] sm:$0xff]  ;;  %v184_v30 = vld [vmem:[%s759_s20 + $0x50] sm:$0xff]  ;;  %v185_v35 = vld [vmem:[%s759_s20 + $0x58] sm:$0xff] }
  0x14   : > { %v255_v20 = vadd.f32 %v764_v1, %v216_v11  ;;  %v256_v21 = vadd.f32 %v764_v1, %v217_v12  ;;  %v257_v22 = vadd.f32 %v764_v1, %v218_v13  ;;  %v220_v23 = vmul.f32 %v754_v0, %v181_v15  ;;  %v186_v36 = vld [vmem:[%s759_s20 + $0x60] sm:$0xff]  ;;  %v187_v41 = vld [vmem:[%s759_s20 + $0x68] sm:$0xff]  ;;  %v188_v42 = vld [vmem:[%s759_s20 + $0x70] sm:$0xff] }
  0x15   : > { %v284_v26 = vmax.f32 %v252_v16, 0.0  ;;  %v285_v27 = vmax.f32 %v253_v17, 0.0  ;;  %v286_v28 = vmax.f32 %v254_v18, 0.0  ;;  %v258_v29 = vadd.f32 %v764_v1, %v219_v19  ;;  %v189_v51 = vld [vmem:[%s759_s20 + $0x78] sm:$0xff]  ;;  %v190_v56 = vld [vmem:[%s759_s20 + $0x80] sm:$0xff]  ;;  %v191_v61 = vld [vmem:[%s759_s20 + $0x88] sm:$0xff] }
  0x16   : > { %v287_v31 = vmax.f32 %v255_v20, 0.0  ;;  %v288_v32 = vmax.f32 %v256_v21, 0.0  ;;  %v289_v33 = vmax.f32 %v257_v22, 0.0  ;;  %v259_v34 = vadd.f32 %v764_v1, %v220_v23  ;;  %v192_v4 = vld [vmem:[%s759_s20 + $0x90] sm:$0xff]  ;;  %v193_v5 = vld [vmem:[%s759_s20 + $0x98] sm:$0xff]  ;;  %v194_v10 = vld [vmem:[%s759_s20 + $0xa0] sm:$0xff] }
  0x17   : > { %v612_v37 = vpack.c.bf16 %v285_v27, %v284_v26  ;;  %v290_v38 = vmax.f32 %v258_v29, 0.0  ;;  %v221_v39 = vmul.f32 %v754_v0, %v182_v24  ;;  %v222_v40 = vmul.f32 %v754_v0, %v183_v25  ;;  %v195_v15 = vld [vmem:[%s759_s20 + $0xa8] sm:$0xff]  ;;  %v196_v20 = vld [vmem:[%s759_s20 + $0xb0] sm:$0xff]  ;;  %v197_v25 = vld [vmem:[%s759_s20 + $0xb8] sm:$0xff] }
  0x18   : > { %v617_v43 = vpack.c.bf16 %v287_v31, %v286_v28  ;;  %v622_v44 = vpack.c.bf16 %v289_v33, %v288_v32  ;;  %v291_v45 = vmax.f32 %v259_v34, 0.0  ;;  %v223_v46 = vmul.f32 %v754_v0, %v184_v30  ;;  %v198_v30 = vld [vmem:[%s759_s20 + $0xc0] sm:$0xff] }
  0x19   : > { %613 = vst [vmem:[%s796_s26] sm:$0xff] %v612_v37   ;;  %v260_v47 = vadd.f32 %v764_v1, %v221_v39  ;;  %v261_v48 = vadd.f32 %v764_v1, %v222_v40  ;;  %v224_v49 = vmul.f32 %v754_v0, %v185_v35  ;;  %v225_v50 = vmul.f32 %v754_v0, %v186_v36  ;;  %v199_v35 = vld [vmem:[%s759_s20 + $0xc8] sm:$0xff]  ;;  %v200_v40 = vld [vmem:[%s759_s20 + $0xd0] sm:$0xff] }
  0x1a   : > { %689 = vst [vmem:[%s796_s26 + $0x8] sm:$0xff] %v617_v43   ;;  %690 = vst [vmem:[%s796_s26 + $0x10] sm:$0xff] %v622_v44   ;;  %v627_v52 = vpack.c.bf16 %v291_v45, %v290_v38  ;;  %v262_v53 = vadd.f32 %v764_v1, %v223_v46  ;;  %v226_v54 = vmul.f32 %v754_v0, %v187_v41  ;;  %v201_v41 = vld [vmem:[%s759_s20 + $0xd8] sm:$0xff]  ;;  %v202_v46 = vld [vmem:[%s759_s20 + $0xe0] sm:$0xff] }
  0x1b   : > { %v227_v55 = vmul.f32 %v754_v0, %v188_v42  ;;  %v292_v57 = vmax.f32 %v260_v47, 0.0  ;;  %v293_v58 = vmax.f32 %v261_v48, 0.0  ;;  %v263_v59 = vadd.f32 %v764_v1, %v224_v49 }
  0x1c   : > { %v264_v60 = vadd.f32 %v764_v1, %v225_v50  ;;  %691 = vst [vmem:[%s796_s26 + $0x18] sm:$0xff] %v627_v52   ;;  %v294_v62 = vmax.f32 %v262_v53, 0.0  ;;  %v265_v63 = vadd.f32 %v764_v1, %v226_v54  ;;  %v228_v2 = vmul.f32 %v754_v0, %v189_v51  ;;  %v203_v51 = vld [vmem:[%s759_s20 + $0xe8] sm:$0xff] }
  0x1d   : > { %v266_v3 = vadd.f32 %v764_v1, %v227_v55  ;;  %v632_v6 = vpack.c.bf16 %v293_v58, %v292_v57  ;;  %v295_v7 = vmax.f32 %v263_v59, 0.0  ;;  %v229_v9 = vmul.f32 %v754_v0, %v190_v56  ;;  %v204_v56 = vld [vmem:[%s759_s20 + $0xf0] sm:$0xff] }
  0x1e   : > { %v296_v8 = vmax.f32 %v264_v60, 0.0  ;;  %v297_v11 = vmax.f32 %v265_v63, 0.0  ;;  %v267_v12 = vadd.f32 %v764_v1, %v228_v2  ;;  %v230_v14 = vmul.f32 %v754_v0, %v191_v61  ;;  %v205_v61 = vld [vmem:[%s759_s20 + $0xf8] sm:$0xff] }
  0x1f   : > { %v298_v13 = vmax.f32 %v266_v3, 0.0  ;;  %692 = vst [vmem:[%s796_s26 + $0x20] sm:$0xff] %v632_v6   ;;  %v637_v16 = vpack.c.bf16 %v295_v7, %v294_v62  ;;  %v268_v17 = vadd.f32 %v764_v1, %v229_v9  ;;  %v231_v18 = vmul.f32 %v754_v0, %v192_v4 }
  0x20   : > { %v232_v19 = vmul.f32 %v754_v0, %v193_v5  ;;  %v642_v21 = vpack.c.bf16 %v297_v11, %v296_v8  ;;  %v299_v22 = vmax.f32 %v267_v12, 0.0  ;;  %v269_v23 = vadd.f32 %v764_v1, %v230_v14 }
  0x21   : > { %v233_v24 = vmul.f32 %v754_v0, %v194_v10  ;;  %693 = vst [vmem:[%s796_s26 + $0x28] sm:$0xff] %v637_v16   ;;  %v300_v26 = vmax.f32 %v268_v17, 0.0  ;;  %v270_v27 = vadd.f32 %v764_v1, %v231_v18  ;;  %v234_v29 = vmul.f32 %v754_v0, %v195_v15 }
  0x22   : > { %v271_v28 = vadd.f32 %v764_v1, %v232_v19  ;;  %694 = vst [vmem:[%s796_s26 + $0x30] sm:$0xff] %v642_v21   ;;  %v647_v31 = vpack.c.bf16 %v299_v22, %v298_v13  ;;  %v301_v32 = vmax.f32 %v269_v23, 0.0  ;;  %v235_v34 = vmul.f32 %v754_v0, %v196_v20 }
  0x23   : > { %v272_v33 = vadd.f32 %v764_v1, %v233_v24  ;;  %v302_v36 = vmax.f32 %v270_v27, 0.0  ;;  %v273_v38 = vadd.f32 %v764_v1, %v234_v29  ;;  %v236_v39 = vmul.f32 %v754_v0, %v197_v25 }
  0x24   : > { %v303_v37 = vmax.f32 %v271_v28, 0.0  ;;  %695 = vst [vmem:[%s796_s26 + $0x38] sm:$0xff] %v647_v31   ;;  %v652_v42 = vpack.c.bf16 %v301_v32, %v300_v26  ;;  %v274_v44 = vadd.f32 %v764_v1, %v235_v34  ;;  %v237_v45 = vmul.f32 %v754_v0, %v198_v30 }
  0x25   : > { %v304_v43 = vmax.f32 %v272_v33, 0.0  ;;  %v305_v48 = vmax.f32 %v273_v38, 0.0  ;;  %v275_v49 = vadd.f32 %v764_v1, %v236_v39  ;;  %v238_v50 = vmul.f32 %v754_v0, %v199_v35 }
  0x26   : > { %v657_v47 = vpack.c.bf16 %v303_v37, %v302_v36  ;;  %696 = vst [vmem:[%s796_s26 + $0x40] sm:$0xff] %v652_v42   ;;  %v306_v52 = vmax.f32 %v274_v44, 0.0  ;;  %v276_v53 = vadd.f32 %v764_v1, %v237_v45  ;;  %v239_v54 = vmul.f32 %v754_v0, %v200_v40 }
  0x27   : > { %v240_v55 = vmul.f32 %v754_v0, %v201_v41  ;;  %v662_v57 = vpack.c.bf16 %v305_v48, %v304_v43  ;;  %v307_v58 = vmax.f32 %v275_v49, 0.0  ;;  %v277_v59 = vadd.f32 %v764_v1, %v238_v50 }
  0x28   : > { %697 = vst [vmem:[%s796_s26 + $0x48] sm:$0xff] %v657_v47   ;;  %v241_v60 = vmul.f32 %v754_v0, %v202_v46  ;;  %v308_v62 = vmax.f32 %v276_v53, 0.0  ;;  %v278_v63 = vadd.f32 %v764_v1, %v239_v54  ;;  %v242_v3 = vmul.f32 %v754_v0, %v203_v51 }
  0x29   : > { %v279_v2 = vadd.f32 %v764_v1, %v240_v55  ;;  %698 = vst [vmem:[%s796_s26 + $0x50] sm:$0xff] %v662_v57   ;;  %v667_v4 = vpack.c.bf16 %v307_v58, %v306_v52  ;;  %v309_v5 = vmax.f32 %v277_v59, 0.0  ;;  %v243_v7 = vmul.f32 %v754_v0, %v204_v56 }
  0x2a   : > { %v280_v6 = vadd.f32 %v764_v1, %v241_v60  ;;  %v310_v8 = vmax.f32 %v278_v63, 0.0  ;;  %v281_v10 = vadd.f32 %v764_v1, %v242_v3  ;;  %v244_v11 = vmul.f32 %v754_v0, %v205_v61 }
  0x2b   : > { %v311_v9 = vmax.f32 %v279_v2, 0.0  ;;  %699 = vst [vmem:[%s796_s26 + $0x58] sm:$0xff] %v667_v4   ;;  %v672_v12 = vpack.c.bf16 %v309_v5, %v308_v62  ;;  %v282_v14 = vadd.f32 %v764_v1, %v243_v7 }
  0x2c   : > { %v312_v13 = vmax.f32 %v280_v6, 0.0  ;;  %v313_v16 = vmax.f32 %v281_v10, 0.0  ;;  %v283_v17 = vadd.f32 %v764_v1, %v244_v11 }
  0x2d   : > { %v677_v15 = vpack.c.bf16 %v311_v9, %v310_v8  ;;  %700 = vst [vmem:[%s796_s26 + $0x60] sm:$0xff] %v672_v12   ;;  %v314_v18 = vmax.f32 %v282_v14, 0.0 }
  0x2e   : > { %v682_v19 = vpack.c.bf16 %v313_v16, %v312_v13  ;;  %v315_v20 = vmax.f32 %v283_v17, 0.0 }
  0x2f   : > { %701 = vst [vmem:[%s796_s26 + $0x68] sm:$0xff] %v677_v15  }
  0x30   : > { %702 = vst [vmem:[%s796_s26 + $0x70] sm:$0xff] %v682_v19   ;;  %v687_v21 = vpack.c.bf16 %v315_v20, %v314_v18 }
  0x32   : > { %703 = vst [vmem:[%s796_s26 + $0x78] sm:$0xff] %v687_v21  }
  0x33 PF: > { %s13_s12 = sadd.s32 1, %s718_s12  }
  0x34   : > { %p10_p4 = scmp.ge.s32.totalorder %s13_s12, 4  }
  0x36   :  { %12 = sbr.rel (!%p10_p4) target bundleno = 1 (0x1), region = 62 }

// kernel: group_bottleneck_forward.5
= control target key start
LH: loop header
LB: loop body
LE: loop exit
PB: predicated region body
PF: predicated region fallthrough
CT: control target
= control target key end

     0   :  { %s951_s12 = smov 0   ;;  %s1134_s0 = inlined_call_operand.vmem [shape: bf16[512,128], index: 0, kind: input, shape index: {}]   ;;  %s1135_s1 = inlined_call_operand.vmem [shape: bf16[128,128], index: 1, kind: input, shape index: {}]   ;;  %s1136_s2 = inlined_call_operand.vmem [shape: f32[512,128], index: 2, kind: output, shape index: {0}]   ;;  %s1137_s3 = inlined_call_operand.vmem [shape: f32[2,2,128], index: 3, kind: output, shape index: {1}]  }
   0x1 LB: > { %s957_s13 = sadd.s32 4294967295, %s929_s12   ;;  %p771_p0 = scmp.ge.s32.totalorder %s929_s12, 1  ;;  %s929_s12 = sphi %s951_s12, %s14_s12  }
   0x2   : > { %p141_p1 = scmp.lt.s32.totalorder %s929_s12, 3 }
   0x4   : > { %p142_p2 = pnand %p771_p0, %p141_p1 }
   0x5   : > { %v899_v0 = vld [vmem:[%s1135_s1] sm:$0xff] (!%p142_p2)   ;;  %s772_s16 = sshll.u32 (!%p142_p2), %s957_s13, 5  ;;  %v900_v1 = vld [vmem:[%s1135_s1 + $0x8] sm:$0xff] (!%p142_p2)   ;;  %v901_v2 = vld [vmem:[%s1135_s1 + $0x10] sm:$0xff] (!%p142_p2)   ;;  %p181_p4 = scmp.lt.s32.totalorder (!%p142_p2), %s957_s13, 1  ;;  %vm677_vm0 = vcmask (!%p142_p2), 1040384  }
   0x6   : > { %145 = sbr.rel (%p142_p2) target bundleno = 331 (0x14b), region = 28  ;;  %p170_p3 = scmp.lt.s32.totalorder (!%p142_p2), %s772_s16, 63  ;;  %827 = vmatprep.subr.bf16.mxu0 (!%p142_p2), %v899_v0  ;;  %875 = vmatprep.subr.bf16.mxu1 (!%p142_p2), %v899_v0  ;;  %v902_v3 = vld [vmem:[%s1135_s1 + $0x18] sm:$0xff] (!%p142_p2)   ;;  %v903_v5 = vld [vmem:[%s1135_s1 + $0x20] sm:$0xff] (!%p142_p2)   ;;  %v904_v6 = vld [vmem:[%s1135_s1 + $0x28] sm:$0xff] (!%p142_p2)  }
   0x7   : > { %828 = vmatpush3.bf16.msra.mxu0 (!%p142_p2), %v899_v0  ;;  %883 = vmatpush3.bf16.msra.mxu1 (!%p142_p2), %v899_v0  ;;  %v905_v8 = vld [vmem:[%s1135_s1 + $0x30] sm:$0xff] (!%p142_p2)   ;;  %v906_v9 = vld [vmem:[%s1135_s1 + $0x38] sm:$0xff] (!%p142_p2)  }
   0x8   : > { %829 = vmatprep.subr.bf16.mxu0 (!%p142_p2), %v900_v1  ;;  %876 = vmatprep.subr.bf16.mxu1 (!%p142_p2), %v900_v1 }
   0xb   : > { %830 = vmatpush3.bf16.msra.mxu0 (!%p142_p2), %v900_v1  ;;  %884 = vmatpush3.bf16.msra.mxu1 (!%p142_p2), %v900_v1 }
   0xc   : > { %831 = vmatprep.subr.bf16.mxu0 (!%p142_p2), %v901_v2  ;;  %877 = vmatprep.subr.bf16.mxu1 (!%p142_p2), %v901_v2 }
   0xd   : > { %s1139_s16 = smov (!%p170_p3, %s772_s16), 63  ;;  %s1141_s13 = smov (!%p181_p4, %s957_s13), 1 }
   0xe   : > { %s773_s21 = sshll.u32 %s1139_s16, 2  ;;  %s775_s8 = sshll.u32 %s1139_s16, 3 }
   0xf   : > { %s977_s24 = scalar_lea.vmem %s1134_s0, %s773_s21  ;;  %832 = vmatpush3.bf16.msra.mxu0 %v901_v2  ;;  %885 = vmatpush3.bf16.msra.mxu1 %v901_v2  ;;  %s1014_s11 = scalar_lea.vmem %s1136_s2, %s775_s8 }
  0x10   : > { %v907_v4 = vld [vmem:[%s977_s24] sm:$0xff]   ;;  %833 = vmatprep.subr.bf16.mxu0 %v902_v3  ;;  %878 = vmatprep.subr.bf16.mxu1 %v902_v3  ;;  %v908_v10 = vld [vmem:[%s977_s24 + $0x8] sm:$0xff]   ;;  %v909_v12 = vld [vmem:[%s977_s24 + $0x10] sm:$0xff]   ;;  %s776_s14 = sshll.u32 %s1141_s13, 1 }
  0x11   : > { %843 = vmatprep.mubr.bf16.mxu0 %v907_v4  ;;  %v915_v7 = vld [vmem:[%s977_s24 + $0x40] sm:$0xff]   ;;  %v916_v11 = vld [vmem:[%s977_s24 + $0x48] sm:$0xff]   ;;  %v917_v13 = vld [vmem:[%s977_s24 + $0x50] sm:$0xff]   ;;  %s184_s17 = scalar_lea.vmem %s1137_s3, %s776_s14 }
  0x12   : > { %859 = vmatprep.mubr.bf16.mxu1 %v915_v7  ;;  %v910_v14 = vld [vmem:[%s977_s24 + $0x18] sm:$0xff]   ;;  %v911_v16 = vld [vmem:[%s977_s24 + $0x20] sm:$0xff]   ;;  %v912_v18 = vld [vmem:[%s977_s24 + $0x28] sm:$0xff]  }
  0x13   : > { %834 = vmatpush3.bf16.msra.mxu0 %v902_v3  ;;  %886 = vmatpush3.bf16.msra.mxu1 %v902_v3  ;;  %v918_v15 = vld [vmem:[%s977_s24 + $0x58] sm:$0xff]   ;;  %v919_v17 = vld [vmem:[%s977_s24 + $0x60] sm:$0xff]   ;;  %v920_v19 = vld [vmem:[%s977_s24 + $0x68] sm:$0xff]  }
  0x14   : > { %835 = vmatprep.subr.bf16.mxu0 %v903_v5  ;;  %879 = vmatprep.subr.bf16.mxu1 %v903_v5  ;;  %v913_v20 = vld [vmem:[%s977_s24 + $0x30] sm:$0xff]   ;;  %v914_v22 = vld [vmem:[%s977_s24 + $0x38] sm:$0xff]  }
  0x15   : > { %v921_v21 = vld [vmem:[%s977_s24 + $0x70] sm:$0xff]   ;;  %v922_v23 = vld [vmem:[%s977_s24 + $0x78] sm:$0xff]  }
  0x17   : > { %836 = vmatpush3.bf16.msra.mxu0 %v903_v5  ;;  %887 = vmatpush3.bf16.msra.mxu1 %v903_v5 }
  0x18   : > { %837 = vmatprep.subr.bf16.mxu0 %v904_v6  ;;  %880 = vmatprep.subr.bf16.mxu1 %v904_v6 }
  0x1b   : > { %838 = vmatpush3.bf16.msra.mxu0 %v904_v6  ;;  %888 = vmatpush3.bf16.msra.mxu1 %v904_v6 }
  0x1c   : > { %839 = vmatprep.subr.bf16.mxu0 %v905_v8  ;;  %881 = vmatprep.subr.bf16.mxu1 %v905_v8 }
  0x1f   : > { %840 = vmatpush3.bf16.msra.mxu0 %v905_v8  ;;  %889 = vmatpush3.bf16.msra.mxu1 %v905_v8 }
  0x20   : > { %841 = vmatprep.subr.bf16.mxu0 %v906_v9  ;;  %882 = vmatprep.subr.bf16.mxu1 %v906_v9 }
  0x23   : > { %842 = vmatpush3.bf16.msra.mxu0 %v906_v9  ;;  %890 = vmatpush3.bf16.msra.mxu1 %v906_v9 }
  0x26   : > { %844 = vmatmul.mubr.bf16.vlgmr.msra.gmra.mrb[0].mxu0 %v908_v10  ;;  %860 = vmatmul.mubr.bf16.vlgmr.msra.gmra.mrb[0].mxu1 %v916_v11 }
  0x27   : > { %847 = vmatprep.mubr.bf16.mxu0 %v909_v12  ;;  %863 = vmatprep.mubr.bf16.mxu1 %v917_v13 }
  0x2e   : > { %848 = vmatmul.mubr.bf16.gmra.mrb[4].mxu0 %v910_v14  ;;  %864 = vmatmul.mubr.bf16.gmra.mrb[4].mxu1 %v918_v15 }
  0x2f   : > { %851 = vmatprep.mubr.bf16.mxu0 %v911_v16  ;;  %867 = vmatprep.mubr.bf16.mxu1 %v919_v17 }
  0x36   : > { %852 = vmatmul.mubr.bf16.gmra.mrb[8].mxu0 %v912_v18  ;;  %868 = vmatmul.mubr.bf16.gmra.mrb[8].mxu1 %v920_v19 }
  0x37   : > { %855 = vmatprep.mubr.bf16.mxu0 %v913_v20  ;;  %871 = vmatprep.mubr.bf16.mxu1 %v921_v21 }
  0x3e   : > { %856 = vmatmul.mubr.bf16.gmra.mrb[12].mxu0 %v914_v22  ;;  %872 = vmatmul.mubr.bf16.gmra.mrb[12].mxu1 %v922_v23 }
  0xf9   : > { %v845_v24 = vpop.f32.mrb[0].mxu0  ;;  %v1016_v25 = vpop.f32.mrb[0].mxu1 }
  0xfa   : > { %541 = vst [vmem:[%s1014_s11 + $0x10] sm:$0xff] %v845_v24  ;;  %v412_v26 = vpop.f32.mrb[1].mxu0  ;;  %557 = vst [vmem:[%s1014_s11 + $0x90] sm:$0xff] %v1016_v25  ;;  %v1021_v27 = vpop.f32.mrb[1].mxu1  ;;  %v610_v35 = vmul.f32 %v845_v24, %v845_v24 }
  0xfb   : > { %539 = vst [vmem:[%s1014_s11] sm:$0xff] %v412_v26  ;;  %v846_v28 = vpop.f32.mrb[2].mxu0  ;;  %555 = vst [vmem:[%s1014_s11 + $0x80] sm:$0xff] %v1021_v27  ;;  %v1026_v29 = vpop.f32.mrb[2].mxu1  ;;  %v608_v32 = vmul.f32 %v412_v26, %v412_v26 }
  0xfc   : > { %542 = vst [vmem:[%s1014_s11 + $0x18] sm:$0xff] %v846_v28  ;;  %v415_v30 = vpop.f32.mrb[3].mxu0  ;;  %558 = vst [vmem:[%s1014_s11 + $0x98] sm:$0xff] %v1026_v29  ;;  %v1031_v31 = vpop.f32.mrb[3].mxu1  ;;  %v611_v38 = vmul.f32 %v846_v28, %v846_v28 }
  0xfd   : > { %540 = vst [vmem:[%s1014_s11 + $0x8] sm:$0xff] %v415_v30  ;;  %v571_v33 = vadd.f32 %v415_v30, %v412_v26  ;;  %v609_v34 = vmul.f32 %v415_v30, %v415_v30  ;;  %556 = vst [vmem:[%s1014_s11 + $0x88] sm:$0xff] %v1031_v31 }
  0xff   : > { %v572_v36 = vadd.f32 %v845_v24, %v571_v33  ;;  %v640_v37 = vadd.f32 %v609_v34, %v608_v32 }
 0x101   : > { %v641_v39 = vadd.f32 %v640_v37, %v610_v35  ;;  %v849_v40 = vpop.f32.mrb[4].mxu0  ;;  %v573_v41 = vadd.f32 %v846_v28, %v572_v36  ;;  %v1036_v42 = vpop.f32.mrb[4].mxu1 }
 0x102   : > { %545 = vst [vmem:[%s1014_s11 + $0x30] sm:$0xff] %v849_v40  ;;  %v428_v43 = vpop.f32.mrb[5].mxu0  ;;  %561 = vst [vmem:[%s1014_s11 + $0xb0] sm:$0xff] %v1036_v42  ;;  %v1041_v44 = vpop.f32.mrb[5].mxu1  ;;  %v614_v55 = vmul.f32 %v849_v40, %v849_v40 }
 0x103   : > { %543 = vst [vmem:[%s1014_s11 + $0x20] sm:$0xff] %v428_v43  ;;  %v574_v45 = vadd.f32 %v573_v41, %v428_v43  ;;  %v612_v46 = vmul.f32 %v428_v43, %v428_v43  ;;  %v642_v47 = vadd.f32 %v641_v39, %v611_v38  ;;  %v850_v48 = vpop.f32.mrb[6].mxu0  ;;  %559 = vst [vmem:[%s1014_s11 + $0xa0] sm:$0xff] %v1041_v44  ;;  %v1046_v49 = vpop.f32.mrb[6].mxu1 }
 0x104   : > { %546 = vst [vmem:[%s1014_s11 + $0x38] sm:$0xff] %v850_v48  ;;  %v431_v50 = vpop.f32.mrb[7].mxu0  ;;  %562 = vst [vmem:[%s1014_s11 + $0xb8] sm:$0xff] %v1046_v49  ;;  %v1051_v51 = vpop.f32.mrb[7].mxu1  ;;  %v615_v58 = vmul.f32 %v850_v48, %v850_v48  ;;  %v624_v41 = vmul.f32 %v1021_v27, %v1021_v27 }
 0x105   : > { %v643_v52 = vadd.f32 %v642_v47, %v612_v46  ;;  %544 = vst [vmem:[%s1014_s11 + $0x28] sm:$0xff] %v431_v50  ;;  %v575_v53 = vadd.f32 %v574_v45, %v431_v50  ;;  %v613_v54 = vmul.f32 %v431_v50, %v431_v50  ;;  %560 = vst [vmem:[%s1014_s11 + $0xa8] sm:$0xff] %v1051_v51 }
 0x106   : > { %v626_v50 = vmul.f32 %v1016_v25, %v1016_v25 }
 0x107   : > { %v576_v56 = vadd.f32 %v849_v40, %v575_v53  ;;  %v644_v57 = vadd.f32 %v643_v52, %v613_v54  ;;  %v627_v54 = vmul.f32 %v1026_v29, %v1026_v29 }
 0x109   : > { %v645_v59 = vadd.f32 %v644_v57, %v614_v55  ;;  %v853_v60 = vpop.f32.mrb[8].mxu0  ;;  %v577_v61 = vadd.f32 %v850_v48, %v576_v56  ;;  %v1056_v62 = vpop.f32.mrb[8].mxu1  ;;  %v625_v48 = vmul.f32 %v1031_v31, %v1031_v31 }
 0x10a   : > { %549 = vst [vmem:[%s1014_s11 + $0x50] sm:$0xff] %v853_v60  ;;  %v444_v63 = vpop.f32.mrb[9].mxu0  ;;  %565 = vst [vmem:[%s1014_s11 + $0xd0] sm:$0xff] %v1056_v62  ;;  %v1061_v0 = vpop.f32.mrb[9].mxu1  ;;  %v618_v11 = vmul.f32 %v853_v60, %v853_v60 }
 0x10b   : > { %547 = vst [vmem:[%s1014_s11 + $0x40] sm:$0xff] %v444_v63  ;;  %v578_v1 = vadd.f32 %v577_v61, %v444_v63  ;;  %v616_v2 = vmul.f32 %v444_v63, %v444_v63  ;;  %v646_v3 = vadd.f32 %v645_v59, %v615_v58  ;;  %v854_v4 = vpop.f32.mrb[10].mxu0  ;;  %563 = vst [vmem:[%s1014_s11 + $0xc0] sm:$0xff] %v1061_v0  ;;  %v1066_v5 = vpop.f32.mrb[10].mxu1 }
 0x10c   : > { %550 = vst [vmem:[%s1014_s11 + $0x58] sm:$0xff] %v854_v4  ;;  %v447_v6 = vpop.f32.mrb[11].mxu0  ;;  %566 = vst [vmem:[%s1014_s11 + $0xd8] sm:$0xff] %v1066_v5  ;;  %v1071_v7 = vpop.f32.mrb[11].mxu1  ;;  %v619_v14 = vmul.f32 %v854_v4, %v854_v4 }
 0x10d   : > { %v647_v8 = vadd.f32 %v646_v3, %v616_v2  ;;  %548 = vst [vmem:[%s1014_s11 + $0x48] sm:$0xff] %v447_v6  ;;  %v579_v9 = vadd.f32 %v578_v1, %v447_v6  ;;  %v617_v10 = vmul.f32 %v447_v6, %v447_v6  ;;  %564 = vst [vmem:[%s1014_s11 + $0xc8] sm:$0xff] %v1071_v7 }
 0x10f   : > { %v580_v12 = vadd.f32 %v853_v60, %v579_v9  ;;  %v648_v13 = vadd.f32 %v647_v8, %v617_v10  ;;  %v629_v60 = vmul.f32 %v1051_v51, %v1051_v51  ;;  %v633_v8 = vmul.f32 %v1071_v7, %v1071_v7 }
 0x111   : > { %v649_v15 = vadd.f32 %v648_v13, %v618_v11  ;;  %v857_v16 = vpop.f32.mrb[12].mxu0  ;;  %v581_v17 = vadd.f32 %v854_v4, %v580_v12  ;;  %v1076_v18 = vpop.f32.mrb[12].mxu1 }
 0x112   : > { %553 = vst [vmem:[%s1014_s11 + $0x70] sm:$0xff] %v857_v16  ;;  %v460_v19 = vpop.f32.mrb[13].mxu0  ;;  %569 = vst [vmem:[%s1014_s11 + $0xf0] sm:$0xff] %v1076_v18  ;;  %v524_v20 = vpop.f32.mrb[13].mxu1  ;;  %v622_v35 = vmul.f32 %v857_v16, %v857_v16 }
 0x113   : > { %551 = vst [vmem:[%s1014_s11 + $0x60] sm:$0xff] %v460_v19  ;;  %v582_v21 = vadd.f32 %v581_v17, %v460_v19  ;;  %v620_v22 = vmul.f32 %v460_v19, %v460_v19  ;;  %v650_v23 = vadd.f32 %v649_v15, %v619_v14  ;;  %v858_v24 = vpop.f32.mrb[14].mxu0  ;;  %567 = vst [vmem:[%s1014_s11 + $0xe0] sm:$0xff] %v524_v20  ;;  %v874_v26 = vpop.f32.mrb[14].mxu1 }
 0x114   : > { %554 = vst [vmem:[%s1014_s11 + $0x78] sm:$0xff] %v858_v24  ;;  %v463_v28 = vpop.f32.mrb[15].mxu0  ;;  %570 = vst [vmem:[%s1014_s11 + $0xf8] sm:$0xff] %v874_v26  ;;  %v527_v30 = vpop.f32.mrb[15].mxu1  ;;  %v623_v38 = vmul.f32 %v858_v24, %v858_v24  ;;  %v636_v12 = vmul.f32 %v524_v20, %v524_v20  ;;  %v638_v17 = vmul.f32 %v1076_v18, %v1076_v18 }
 0x115   : > { %v651_v32 = vadd.f32 %v650_v23, %v620_v22  ;;  %552 = vst [vmem:[%s1014_s11 + $0x68] sm:$0xff] %v463_v28  ;;  %v583_v33 = vadd.f32 %v582_v21, %v463_v28  ;;  %v621_v34 = vmul.f32 %v463_v28, %v463_v28  ;;  %568 = vst [vmem:[%s1014_s11 + $0xe8] sm:$0xff] %v527_v30 }
 0x116   : > { %v639_v21 = vmul.f32 %v874_v26, %v874_v26 }
 0x117   : > { %v584_v36 = vadd.f32 %v857_v16, %v583_v33  ;;  %v652_v37 = vadd.f32 %v651_v32, %v621_v34 }
 0x119   : > { %v653_v39 = vadd.f32 %v652_v37, %v622_v35  ;;  %v585_v40 = vadd.f32 %v858_v24, %v584_v36 }
 0x11b   : > { %v586_v43 = vadd.f32 %v585_v40, %v1021_v27  ;;  %v654_v45 = vadd.f32 %v653_v39, %v623_v38  ;;  %v628_v27 = vmul.f32 %v1041_v44, %v1041_v44 }
 0x11d   : > { %v655_v46 = vadd.f32 %v654_v45, %v624_v41  ;;  %v587_v47 = vadd.f32 %v586_v43, %v1031_v31 }
 0x11f   : > { %v588_v52 = vadd.f32 %v1016_v25, %v587_v47  ;;  %v656_v53 = vadd.f32 %v655_v46, %v625_v48  ;;  %v630_v25 = vmul.f32 %v1036_v42, %v1036_v42 }
 0x121   : > { %v657_v55 = vadd.f32 %v656_v53, %v626_v50  ;;  %v589_v56 = vadd.f32 %v1026_v29, %v588_v52  ;;  %v631_v29 = vmul.f32 %v1046_v49, %v1046_v49 }
 0x123   : > { %v590_v57 = vadd.f32 %v589_v56, %v1041_v44  ;;  %v658_v58 = vadd.f32 %v657_v55, %v627_v54  ;;  %v632_v44 = vmul.f32 %v1061_v0, %v1061_v0 }
 0x125   : > { %v659_v59 = vadd.f32 %v658_v58, %v628_v27  ;;  %v591_v31 = vadd.f32 %v590_v57, %v1051_v51 }
 0x127   : > { %v592_v61 = vadd.f32 %v1036_v42, %v591_v31  ;;  %v660_v63 = vadd.f32 %v659_v59, %v629_v60  ;;  %v634_v42 = vmul.f32 %v1056_v62, %v1056_v62 }
 0x129   : > { %v661_v1 = vadd.f32 %v660_v63, %v630_v25  ;;  %v593_v2 = vadd.f32 %v1046_v49, %v592_v61  ;;  %v635_v49 = vmul.f32 %v1066_v5, %v1066_v5 }
 0x12b   : > { %v594_v3 = vadd.f32 %v593_v2, %v1061_v0  ;;  %v662_v4 = vadd.f32 %v661_v1, %v631_v29 }
 0x12d   : > { %v663_v6 = vadd.f32 %v662_v4, %v632_v44  ;;  %v595_v51 = vadd.f32 %v594_v3, %v1071_v7  ;;  %v637_v7 = vmul.f32 %v527_v30, %v527_v30 }
 0x12f   : > { %v596_v9 = vadd.f32 %v1056_v62, %v595_v51  ;;  %v664_v10 = vadd.f32 %v663_v6, %v633_v8 }
 0x131   : > { %v665_v11 = vadd.f32 %v664_v10, %v634_v42  ;;  %v597_v0 = vadd.f32 %v1066_v5, %v596_v9 }
 0x133   : > { %v598_v13 = vadd.f32 %v597_v0, %v524_v20  ;;  %v666_v14 = vadd.f32 %v665_v11, %v635_v49 }
 0x135   : > { %v667_v15 = vadd.f32 %v666_v14, %v636_v12  ;;  %v599_v16 = vadd.f32 %v598_v13, %v527_v30 }
 0x137   : > { %v600_v62 = vadd.f32 %v1076_v18, %v599_v16  ;;  %v668_v19 = vadd.f32 %v667_v15, %v637_v7 }
 0x139   : > { %v601_v22 = vadd.f32 %v874_v26, %v600_v62  ;;  %v669_v23 = vadd.f32 %v668_v19, %v638_v17 }
 0x13b   : > { %v602_v24 = vrot.slane %v601_v22, 4  ;;  %v670_v28 = vadd.f32 %v669_v23, %v639_v21 }
 0x13d   : > { %v603_v5 = vadd.f32 %v602_v24, %v601_v22  ;;  %v671_v32 = vrot.slane %v670_v28, 4 }
 0x13f   : > { %v604_v20 = vrot.slane %v603_v5, 2  ;;  %v672_v33 = vadd.f32 %v671_v32, %v670_v28 }
 0x141   : > { %v605_v34 = vadd.f32 %v604_v20, %v603_v5  ;;  %v673_v35 = vrot.slane %v672_v33, 2 }
 0x143   : > { %v606_v30 = vrot.slane %v605_v34, 1  ;;  %v674_v36 = vadd.f32 %v673_v35, %v672_v33 }
 0x145   : > { %v675_v37 = vrot.slane %v674_v36, 1  ;;  %v607_v18 = vadd.f32 %v606_v30, %v605_v34 }
 0x147   : > { %v676_v26 = vadd.f32 %v675_v37, %v674_v36 }
 0x149   : > { %v678_v38 = vsel %vm677_vm0, %v607_v18, %v676_v26 }
 0x14a   : > { %679 = vst [vmem:[%s184_s17] sm:$0x3] %v678_v38 }
 0x14b PF: > { %s14_s12 = sadd.s32 1, %s929_s12  }
 0x14c   : > { %p11_p5 = scmp.ge.s32.totalorder %s14_s12, 4  }
 0x14e   :  { %13 = sbr.rel (!%p11_p5) target bundleno = 1 (0x1), region = 70 }

// kernel: group_bottleneck_forward.8
= control target key start
LH: loop header
LB: loop body
LE: loop exit
PB: predicated region body
PF: predicated region fallthrough
CT: control target
= control target key end

     0   :  { %s1015_s18 = smov 0   ;;  %s1311_s0 = inlined_call_operand.vmem [shape: f32[512,128], index: 0, kind: input, shape index: {}]   ;;  %s1312_s1 = inlined_call_operand.vmem [shape: f32[1,128], index: 1, kind: input, shape index: {}]   ;;  %s1313_s2 = inlined_call_operand.vmem [shape: f32[1,128], index: 2, kind: input, shape index: {}]   ;;  %s1314_s3 = inlined_call_operand.vmem [shape: bf16[128,128], index: 3, kind: input, shape index: {}]   ;;  %s1315_s4 = inlined_call_operand.vmem [shape: f32[512,128], index: 4, kind: output, shape index: {0}]   ;;  %s1316_s5 = inlined_call_operand.vmem [shape: f32[2,2,128], index: 5, kind: output, shape index: {1}]  }
   0x1 LB: > { %s1021_s19 = sadd.s32 4294967295, %s983_s18   ;;  %p855_p0 = scmp.ge.s32.totalorder %s983_s18, 1  ;;  %s983_s18 = sphi %s1015_s18, %s16_s18  }
   0x2   : > { %p191_p1 = scmp.lt.s32.totalorder %s983_s18, 3 }
   0x4   : > { %p192_p2 = pnand %p855_p0, %p191_p1 }
   0x5   : > { %v969_v0 = vld [vmem:[%s1314_s3] sm:$0xff] (!%p192_p2)   ;;  %s856_s22 = sshll.u32 (!%p192_p2), %s1021_s19, 5  ;;  %v970_v1 = vld [vmem:[%s1314_s3 + $0x8] sm:$0xff] (!%p192_p2)   ;;  %v971_v2 = vld [vmem:[%s1314_s3 + $0x10] sm:$0xff] (!%p192_p2)   ;;  %p235_p4 = scmp.lt.s32.totalorder (!%p192_p2), %s1021_s19, 1  ;;  %vm761_vm0 = vcmask (!%p192_p2), 1040384  }
   0x6   : > { %195 = sbr.rel (%p192_p2) target bundleno = 331 (0x14b), region = 36  ;;  %p224_p3 = scmp.lt.s32.totalorder (!%p192_p2), %s856_s22, 63  ;;  %897 = vmatprep.subr.bf16.mxu0 (!%p192_p2), %v969_v0  ;;  %945 = vmatprep.subr.bf16.mxu1 (!%p192_p2), %v969_v0  ;;  %v972_v3 = vld [vmem:[%s1314_s3 + $0x18] sm:$0xff] (!%p192_p2)   ;;  %v1053_v6 = vld [vmem:[%s1312_s1] ss:$0 sm:$0xff] (!%p192_p2)  ;;  %v974_v27 = vld [vmem:[%s1314_s3 + $0x28] sm:$0xff] (!%p192_p2)  }
   0x7   : > { %898 = vmatpush3.bf16.msra.mxu0 (!%p192_p2), %v969_v0  ;;  %953 = vmatpush3.bf16.msra.mxu1 (!%p192_p2), %v969_v0  ;;  %v1060_v9 = vld [vmem:[%s1313_s2] ss:$0 sm:$0xff] (!%p192_p2)  ;;  %v975_v35 = vld [vmem:[%s1314_s3 + $0x30] sm:$0xff] (!%p192_p2)   ;;  %v976_v52 = vld [vmem:[%s1314_s3 + $0x38] sm:$0xff] (!%p192_p2)  }
   0x8   : > { %899 = vmatprep.subr.bf16.mxu0 (!%p192_p2), %v970_v1  ;;  %946 = vmatprep.subr.bf16.mxu1 (!%p192_p2), %v970_v1  ;;  %v973_v17 = vld [vmem:[%s1314_s3 + $0x20] sm:$0xff] (!%p192_p2)  }
   0xb   : > { %900 = vmatpush3.bf16.msra.mxu0 (!%p192_p2), %v970_v1  ;;  %954 = vmatpush3.bf16.msra.mxu1 (!%p192_p2), %v970_v1 }
   0xc   : > { %901 = vmatprep.subr.bf16.mxu0 (!%p192_p2), %v971_v2  ;;  %947 = vmatprep.subr.bf16.mxu1 (!%p192_p2), %v971_v2 }
   0xd   : > { %s1318_s22 = smov (!%p224_p3, %s856_s22), 63  ;;  %s1320_s19 = smov (!%p235_p4, %s1021_s19), 1 }
   0xe   : > { %s857_s27 = sshll.u32 %s1318_s22, 3  ;;  %s860_s22 = sshll.u32 %s1320_s19, 1 }
   0xf   : > { %s1043_s30 = scalar_lea.vmem %s1311_s0, %s857_s27  ;;  %902 = vmatpush3.bf16.msra.mxu0 %v971_v2  ;;  %955 = vmatpush3.bf16.msra.mxu1 %v971_v2  ;;  %s1191_s25 = scalar_lea.vmem %s1315_s4, %s857_s27 }
  0x10   : > { %v240_v4 = vld [vmem:[%s1043_s30] sm:$0xff]  ;;  %v241_v5 = vld [vmem:[%s1043_s30 + $0x8] sm:$0xff]  ;;  %v242_v10 = vld [vmem:[%s1043_s30 + $0x10] sm:$0xff]  ;;  %903 = vmatprep.subr.bf16.mxu0 %v972_v3  ;;  %948 = vmatprep.subr.bf16.mxu1 %v972_v3  ;;  %s238_s28 = scalar_lea.vmem %s1316_s5, %s860_s22 }
  0x11   : > { %v279_v7 = vmul.f32 %v1053_v6, %v240_v4  ;;  %v280_v8 = vmul.f32 %v1053_v6, %v241_v5  ;;  %v243_v11 = vld [vmem:[%s1043_s30 + $0x18] sm:$0xff]  ;;  %v281_v12 = vmul.f32 %v1053_v6, %v242_v10  ;;  %v244_v16 = vld [vmem:[%s1043_s30 + $0x20] sm:$0xff]  ;;  %v245_v20 = vld [vmem:[%s1043_s30 + $0x28] sm:$0xff] }
  0x12   : > { %v282_v15 = vmul.f32 %v1053_v6, %v243_v11  ;;  %v283_v21 = vmul.f32 %v1053_v6, %v244_v16  ;;  %v246_v22 = vld [vmem:[%s1043_s30 + $0x30] sm:$0xff]  ;;  %v247_v26 = vld [vmem:[%s1043_s30 + $0x38] sm:$0xff]  ;;  %v284_v28 = vmul.f32 %v1053_v6, %v245_v20  ;;  %v256_v31 = vld [vmem:[%s1043_s30 + $0x80] sm:$0xff] }
  0x13   : > { %v318_v13 = vadd.f32 %v1060_v9, %v279_v7  ;;  %v319_v14 = vadd.f32 %v1060_v9, %v280_v8  ;;  %904 = vmatpush3.bf16.msra.mxu0 %v972_v3  ;;  %v320_v24 = vadd.f32 %v1060_v9, %v281_v12  ;;  %956 = vmatpush3.bf16.msra.mxu1 %v972_v3  ;;  %v248_v37 = vld [vmem:[%s1043_s30 + $0x40] sm:$0xff]  ;;  %v257_v38 = vld [vmem:[%s1043_s30 + $0x88] sm:$0xff]  ;;  %v258_v42 = vld [vmem:[%s1043_s30 + $0x90] sm:$0xff] }
  0x14   : > { %v321_v25 = vadd.f32 %v1060_v9, %v282_v15  ;;  %905 = vmatprep.subr.bf16.mxu0 %v973_v17  ;;  %949 = vmatprep.subr.bf16.mxu1 %v973_v17  ;;  %v285_v29 = vmul.f32 %v1053_v6, %v246_v22  ;;  %v286_v30 = vmul.f32 %v1053_v6, %v247_v26  ;;  %v249_v40 = vld [vmem:[%s1043_s30 + $0x48] sm:$0xff]  ;;  %v259_v44 = vld [vmem:[%s1043_s30 + $0x98] sm:$0xff]  ;;  %v260_v45 = vld [vmem:[%s1043_s30 + $0xa0] sm:$0xff] }
  0x15   : > { %v350_v18 = vmax.f32 %v318_v13, 0.0  ;;  %v351_v19 = vmax.f32 %v319_v14, 0.0  ;;  %v352_v32 = vmax.f32 %v320_v24, 0.0  ;;  %v1086_v34 = vadd.f32 %v1060_v9, %v283_v21  ;;  %v261_v50 = vld [vmem:[%s1043_s30 + $0xa8] sm:$0xff]  ;;  %v262_v51 = vld [vmem:[%s1043_s30 + $0xb0] sm:$0xff]  ;;  %v263_v61 = vld [vmem:[%s1043_s30 + $0xb8] sm:$0xff] }
  0x16   : > { %v353_v33 = vmax.f32 %v321_v25, 0.0  ;;  %v1092_v36 = vadd.f32 %v1060_v9, %v284_v28  ;;  %v1097_v39 = vadd.f32 %v1060_v9, %v285_v29  ;;  %v295_v41 = vmul.f32 %v1053_v6, %v256_v31  ;;  %v264_v2 = vld [vmem:[%s1043_s30 + $0xc0] sm:$0xff]  ;;  %v265_v8 = vld [vmem:[%s1043_s30 + $0xc8] sm:$0xff]  ;;  %v250_v14 = vld [vmem:[%s1043_s30 + $0x50] sm:$0xff] }
  0x17   : > { %v382_v23 = vpack.c.bf16 %v351_v19, %v350_v18  ;;  %906 = vmatpush3.bf16.msra.mxu0 %v973_v17  ;;  %957 = vmatpush3.bf16.msra.mxu1 %v973_v17  ;;  %v1103_v43 = vadd.f32 %v1060_v9, %v286_v30  ;;  %v354_v47 = vmax.f32 %v1086_v34, 0.0  ;;  %v287_v48 = vmul.f32 %v1053_v6, %v248_v37  ;;  %v251_v15 = vld [vmem:[%s1043_s30 + $0x58] sm:$0xff]  ;;  %v252_v20 = vld [vmem:[%s1043_s30 + $0x60] sm:$0xff]  ;;  %v253_v21 = vld [vmem:[%s1043_s30 + $0x68] sm:$0xff] }
  0x18   : > { %907 = vmatprep.subr.bf16.mxu0 %v974_v27  ;;  %950 = vmatprep.subr.bf16.mxu1 %v974_v27  ;;  %v1107_v46 = vpack.c.bf16 %v353_v33, %v352_v32  ;;  %v296_v49 = vmul.f32 %v1053_v6, %v257_v38  ;;  %v355_v53 = vmax.f32 %v1092_v36, 0.0  ;;  %v288_v54 = vmul.f32 %v1053_v6, %v249_v40  ;;  %v266_v30 = vld [vmem:[%s1043_s30 + $0xd0] sm:$0xff]  ;;  %v267_v31 = vld [vmem:[%s1043_s30 + $0xd8] sm:$0xff]  ;;  %v268_v36 = vld [vmem:[%s1043_s30 + $0xe0] sm:$0xff] }
  0x19   : > { %913 = vmatprep.mubr.bf16.mxu0 %v382_v23  ;;  %v334_v55 = vadd.f32 %v1060_v9, %v295_v41  ;;  %v297_v56 = vmul.f32 %v1053_v6, %v258_v42  ;;  %v356_v57 = vmax.f32 %v1097_v39, 0.0  ;;  %v298_v59 = vmul.f32 %v1053_v6, %v259_v44  ;;  %v269_v37 = vld [vmem:[%s1043_s30 + $0xe8] sm:$0xff] }
  0x1a   : > { %v335_v58 = vadd.f32 %v1060_v9, %v296_v49  ;;  %v299_v60 = vmul.f32 %v1053_v6, %v260_v45  ;;  %v300_v0 = vmul.f32 %v1053_v6, %v261_v50  ;;  %v301_v1 = vmul.f32 %v1053_v6, %v262_v51 }
  0x1b   : > { %908 = vmatpush3.bf16.msra.mxu0 %v974_v27  ;;  %958 = vmatpush3.bf16.msra.mxu1 %v974_v27  ;;  %v366_v62 = vmax.f32 %v334_v55, 0.0  ;;  %v336_v63 = vadd.f32 %v1060_v9, %v297_v56  ;;  %v1131_v3 = vadd.f32 %v1060_v9, %v287_v48  ;;  %v337_v5 = vadd.f32 %v1060_v9, %v298_v59  ;;  %v254_v56 = vld [vmem:[%s1043_s30 + $0x70] sm:$0xff] }
  0x1c   : > { %909 = vmatprep.subr.bf16.mxu0 %v975_v35  ;;  %951 = vmatprep.subr.bf16.mxu1 %v975_v35  ;;  %v367_v4 = vmax.f32 %v335_v58, 0.0  ;;  %v338_v7 = vadd.f32 %v1060_v9, %v299_v60  ;;  %v327_v10 = vadd.f32 %v1060_v9, %v288_v54  ;;  %v339_v12 = vadd.f32 %v1060_v9, %v300_v0  ;;  %v255_v58 = vld [vmem:[%s1043_s30 + $0x78] sm:$0xff]  ;;  %v270_v0 = vld [vmem:[%s1043_s30 + $0xf0] sm:$0xff] }
  0x1d   : > { %v368_v11 = vmax.f32 %v336_v63, 0.0  ;;  %v302_v13 = vmul.f32 %v1053_v6, %v263_v61  ;;  %v369_v17 = vmax.f32 %v337_v5, 0.0  ;;  %v303_v19 = vmul.f32 %v1053_v6, %v264_v2 }
  0x1e   : > { %v390_v16 = vpack.c.bf16 %v367_v4, %v366_v62  ;;  %v370_v18 = vmax.f32 %v338_v7, 0.0  ;;  %v371_v22 = vmax.f32 %v339_v12, 0.0  ;;  %v340_v23 = vadd.f32 %v1060_v9, %v301_v1  ;;  %v271_v1 = vld [vmem:[%s1043_s30 + $0xf8] sm:$0xff] }
  0x1f   : > { %910 = vmatpush3.bf16.msra.mxu0 %v975_v35  ;;  %959 = vmatpush3.bf16.msra.mxu1 %v975_v35  ;;  %v341_v24 = vadd.f32 %v1060_v9, %v302_v13  ;;  %v304_v25 = vmul.f32 %v1053_v6, %v265_v8  ;;  %v384_v26 = vpack.c.bf16 %v355_v53, %v354_v47  ;;  %v357_v27 = vmax.f32 %v1103_v43, 0.0 }
  0x20   : > { %911 = vmatprep.subr.bf16.mxu0 %v976_v52  ;;  %952 = vmatprep.subr.bf16.mxu1 %v976_v52  ;;  %v391_v28 = vpack.c.bf16 %v369_v17, %v368_v11  ;;  %v342_v29 = vadd.f32 %v1060_v9, %v303_v19  ;;  %v289_v32 = vmul.f32 %v1053_v6, %v250_v14  ;;  %v358_v38 = vmax.f32 %v1131_v3, 0.0 }
  0x21   : > { %v290_v33 = vmul.f32 %v1053_v6, %v251_v15  ;;  %929 = vmatprep.mubr.bf16.mxu1 %v390_v16  ;;  %v392_v34 = vpack.c.bf16 %v371_v22, %v370_v18  ;;  %v343_v35 = vadd.f32 %v1060_v9, %v304_v25  ;;  %v359_v40 = vmax.f32 %v327_v10, 0.0 }
  0x22   : > { %v291_v41 = vmul.f32 %v1053_v6, %v252_v20  ;;  %v292_v42 = vmul.f32 %v1053_v6, %v253_v21  ;;  %v372_v43 = vmax.f32 %v340_v23, 0.0  ;;  %v373_v44 = vmax.f32 %v341_v24, 0.0 }
  0x23   : > { %912 = vmatpush3.bf16.msra.mxu0 %v976_v52  ;;  %960 = vmatpush3.bf16.msra.mxu1 %v976_v52  ;;  %v305_v45 = vmul.f32 %v1053_v6, %v266_v30  ;;  %v306_v47 = vmul.f32 %v1053_v6, %v267_v31  ;;  %v374_v48 = vmax.f32 %v342_v29, 0.0  ;;  %v375_v49 = vmax.f32 %v343_v35, 0.0 }
  0x24   : > { %v307_v50 = vmul.f32 %v1053_v6, %v268_v36  ;;  %v308_v51 = vmul.f32 %v1053_v6, %v269_v37  ;;  %v328_v52 = vadd.f32 %v1060_v9, %v289_v32  ;;  %v329_v53 = vadd.f32 %v1060_v9, %v290_v33 }
  0x25   : > { %v330_v54 = vadd.f32 %v1060_v9, %v291_v41  ;;  %v331_v55 = vadd.f32 %v1060_v9, %v292_v42  ;;  %v393_v59 = vpack.c.bf16 %v373_v44, %v372_v43  ;;  %v344_v60 = vadd.f32 %v1060_v9, %v305_v45 }
  0x26   : > { %914 = vmatmul.mubr.bf16.vlgmr.msra.gmra.mrb[0].mxu0 %v1107_v46  ;;  %930 = vmatmul.mubr.bf16.vlgmr.msra.gmra.mrb[0].mxu1 %v391_v28  ;;  %v385_v46 = vpack.c.bf16 %v357_v27, %v356_v57  ;;  %v345_v61 = vadd.f32 %v1060_v9, %v306_v47  ;;  %v386_v62 = vpack.c.bf16 %v359_v40, %v358_v38  ;;  %v360_v2 = vmax.f32 %v328_v52, 0.0 }
  0x27   : > { %917 = vmatprep.mubr.bf16.mxu0 %v384_v26  ;;  %933 = vmatprep.mubr.bf16.mxu1 %v392_v34  ;;  %v394_v63 = vpack.c.bf16 %v375_v49, %v374_v48  ;;  %v346_v39 = vadd.f32 %v1060_v9, %v307_v50  ;;  %v347_v57 = vadd.f32 %v1060_v9, %v308_v51  ;;  %v361_v3 = vmax.f32 %v329_v53, 0.0 }
  0x28   : > { %v293_v4 = vmul.f32 %v1053_v6, %v254_v56  ;;  %v294_v5 = vmul.f32 %v1053_v6, %v255_v58  ;;  %v376_v7 = vmax.f32 %v344_v60, 0.0  ;;  %v377_v8 = vmax.f32 %v345_v61, 0.0 }
  0x29   : > { %v309_v10 = vmul.f32 %v1053_v6, %v270_v0  ;;  %v310_v11 = vmul.f32 %v1053_v6, %v271_v1  ;;  %v362_v12 = vmax.f32 %v330_v54, 0.0  ;;  %v363_v13 = vmax.f32 %v331_v55, 0.0 }
  0x2a   : > { %v378_v14 = vmax.f32 %v346_v39, 0.0  ;;  %v379_v15 = vmax.f32 %v347_v57, 0.0  ;;  %v387_v16 = vpack.c.bf16 %v361_v3, %v360_v2  ;;  %v332_v17 = vadd.f32 %v1060_v9, %v293_v4 }
  0x2b   : > { %v333_v18 = vadd.f32 %v1060_v9, %v294_v5  ;;  %v395_v19 = vpack.c.bf16 %v377_v8, %v376_v7  ;;  %v348_v20 = vadd.f32 %v1060_v9, %v309_v10  ;;  %v349_v21 = vadd.f32 %v1060_v9, %v310_v11 }
  0x2c   : > { %v388_v22 = vpack.c.bf16 %v363_v13, %v362_v12  ;;  %v396_v23 = vpack.c.bf16 %v379_v15, %v378_v14  ;;  %v364_v6 = vmax.f32 %v332_v17, 0.0 }
  0x2d   : > { %v365_v24 = vmax.f32 %v333_v18, 0.0  ;;  %v380_v25 = vmax.f32 %v348_v20, 0.0  ;;  %v381_v26 = vmax.f32 %v349_v21, 0.0 }
  0x2e   : > { %918 = vmatmul.mubr.bf16.gmra.mrb[4].mxu0 %v385_v46  ;;  %934 = vmatmul.mubr.bf16.gmra.mrb[4].mxu1 %v393_v59 }
  0x2f   : > { %921 = vmatprep.mubr.bf16.mxu0 %v386_v62  ;;  %937 = vmatprep.mubr.bf16.mxu1 %v394_v63  ;;  %v389_v27 = vpack.c.bf16 %v365_v24, %v364_v6  ;;  %v397_v28 = vpack.c.bf16 %v381_v26, %v380_v25 }
  0x36   : > { %922 = vmatmul.mubr.bf16.gmra.mrb[8].mxu0 %v387_v16  ;;  %938 = vmatmul.mubr.bf16.gmra.mrb[8].mxu1 %v395_v19 }
  0x37   : > { %925 = vmatprep.mubr.bf16.mxu0 %v388_v22  ;;  %941 = vmatprep.mubr.bf16.mxu1 %v396_v23 }
  0x3e   : > { %926 = vmatmul.mubr.bf16.gmra.mrb[12].mxu0 %v389_v27  ;;  %942 = vmatmul.mubr.bf16.gmra.mrb[12].mxu1 %v397_v28 }
  0xf9   : > { %v915_v9 = vpop.f32.mrb[0].mxu0  ;;  %v1193_v29 = vpop.f32.mrb[0].mxu1 }
  0xfa   : > { %625 = vst [vmem:[%s1191_s25 + $0x10] sm:$0xff] %v915_v9  ;;  %v496_v30 = vpop.f32.mrb[1].mxu0  ;;  %641 = vst [vmem:[%s1191_s25 + $0x90] sm:$0xff] %v1193_v29  ;;  %v1198_v31 = vpop.f32.mrb[1].mxu1  ;;  %v694_v40 = vmul.f32 %v915_v9, %v915_v9 }
  0xfb   : > { %623 = vst [vmem:[%s1191_s25] sm:$0xff] %v496_v30  ;;  %v916_v32 = vpop.f32.mrb[2].mxu0  ;;  %639 = vst [vmem:[%s1191_s25 + $0x80] sm:$0xff] %v1198_v31  ;;  %v1203_v33 = vpop.f32.mrb[2].mxu1  ;;  %v692_v36 = vmul.f32 %v496_v30, %v496_v30 }
  0xfc   : > { %626 = vst [vmem:[%s1191_s25 + $0x18] sm:$0xff] %v916_v32  ;;  %v499_v34 = vpop.f32.mrb[3].mxu0  ;;  %642 = vst [vmem:[%s1191_s25 + $0x98] sm:$0xff] %v1203_v33  ;;  %v1208_v35 = vpop.f32.mrb[3].mxu1  ;;  %v695_v43 = vmul.f32 %v916_v32, %v916_v32 }
  0xfd   : > { %624 = vst [vmem:[%s1191_s25 + $0x8] sm:$0xff] %v499_v34  ;;  %v655_v37 = vadd.f32 %v499_v34, %v496_v30  ;;  %v693_v38 = vmul.f32 %v499_v34, %v499_v34  ;;  %640 = vst [vmem:[%s1191_s25 + $0x88] sm:$0xff] %v1208_v35 }
  0xff   : > { %v656_v41 = vadd.f32 %v915_v9, %v655_v37  ;;  %v724_v42 = vadd.f32 %v693_v38, %v692_v36 }
 0x101   : > { %v725_v44 = vadd.f32 %v724_v42, %v694_v40  ;;  %v919_v45 = vpop.f32.mrb[4].mxu0  ;;  %v657_v47 = vadd.f32 %v916_v32, %v656_v41  ;;  %v1213_v48 = vpop.f32.mrb[4].mxu1 }
 0x102   : > { %629 = vst [vmem:[%s1191_s25 + $0x30] sm:$0xff] %v919_v45  ;;  %v512_v49 = vpop.f32.mrb[5].mxu0  ;;  %645 = vst [vmem:[%s1191_s25 + $0xb0] sm:$0xff] %v1213_v48  ;;  %v1218_v50 = vpop.f32.mrb[5].mxu1  ;;  %v698_v61 = vmul.f32 %v919_v45, %v919_v45 }
 0x103   : > { %627 = vst [vmem:[%s1191_s25 + $0x20] sm:$0xff] %v512_v49  ;;  %v658_v51 = vadd.f32 %v657_v47, %v512_v49  ;;  %v696_v46 = vmul.f32 %v512_v49, %v512_v49  ;;  %v726_v52 = vadd.f32 %v725_v44, %v695_v43  ;;  %v920_v53 = vpop.f32.mrb[6].mxu0  ;;  %643 = vst [vmem:[%s1191_s25 + $0xa0] sm:$0xff] %v1218_v50  ;;  %v1223_v54 = vpop.f32.mrb[6].mxu1 }
 0x104   : > { %630 = vst [vmem:[%s1191_s25 + $0x38] sm:$0xff] %v920_v53  ;;  %v515_v55 = vpop.f32.mrb[7].mxu0  ;;  %646 = vst [vmem:[%s1191_s25 + $0xb8] sm:$0xff] %v1223_v54  ;;  %v1228_v56 = vpop.f32.mrb[7].mxu1  ;;  %v699_v39 = vmul.f32 %v920_v53, %v920_v53  ;;  %v708_v47 = vmul.f32 %v1198_v31, %v1198_v31 }
 0x105   : > { %v727_v58 = vadd.f32 %v726_v52, %v696_v46  ;;  %628 = vst [vmem:[%s1191_s25 + $0x28] sm:$0xff] %v515_v55  ;;  %v659_v59 = vadd.f32 %v658_v51, %v515_v55  ;;  %v697_v60 = vmul.f32 %v515_v55, %v515_v55  ;;  %644 = vst [vmem:[%s1191_s25 + $0xa8] sm:$0xff] %v1228_v56 }
 0x106   : > { %v710_v55 = vmul.f32 %v1193_v29, %v1193_v29 }
 0x107   : > { %v660_v62 = vadd.f32 %v919_v45, %v659_v59  ;;  %v728_v63 = vadd.f32 %v727_v58, %v697_v60  ;;  %v711_v60 = vmul.f32 %v1203_v33, %v1203_v33 }
 0x109   : > { %v729_v57 = vadd.f32 %v728_v63, %v698_v61  ;;  %v923_v0 = vpop.f32.mrb[8].mxu0  ;;  %v661_v1 = vadd.f32 %v920_v53, %v660_v62  ;;  %v1233_v2 = vpop.f32.mrb[8].mxu1  ;;  %v709_v53 = vmul.f32 %v1208_v35, %v1208_v35 }
 0x10a   : > { %633 = vst [vmem:[%s1191_s25 + $0x50] sm:$0xff] %v923_v0  ;;  %v528_v3 = vpop.f32.mrb[9].mxu0  ;;  %649 = vst [vmem:[%s1191_s25 + $0xd0] sm:$0xff] %v1233_v2  ;;  %v1238_v4 = vpop.f32.mrb[9].mxu1  ;;  %v702_v17 = vmul.f32 %v923_v0, %v923_v0 }
 0x10b   : > { %631 = vst [vmem:[%s1191_s25 + $0x40] sm:$0xff] %v528_v3  ;;  %v662_v5 = vadd.f32 %v661_v1, %v528_v3  ;;  %v700_v7 = vmul.f32 %v528_v3, %v528_v3  ;;  %v730_v8 = vadd.f32 %v729_v57, %v699_v39  ;;  %v924_v10 = vpop.f32.mrb[10].mxu0  ;;  %647 = vst [vmem:[%s1191_s25 + $0xc0] sm:$0xff] %v1238_v4  ;;  %v1243_v11 = vpop.f32.mrb[10].mxu1 }
 0x10c   : > { %634 = vst [vmem:[%s1191_s25 + $0x58] sm:$0xff] %v924_v10  ;;  %v531_v12 = vpop.f32.mrb[11].mxu0  ;;  %650 = vst [vmem:[%s1191_s25 + $0xd8] sm:$0xff] %v1243_v11  ;;  %v1248_v13 = vpop.f32.mrb[11].mxu1  ;;  %v703_v20 = vmul.f32 %v924_v10, %v924_v10 }
 0x10d   : > { %v731_v14 = vadd.f32 %v730_v8, %v700_v7  ;;  %632 = vst [vmem:[%s1191_s25 + $0x48] sm:$0xff] %v531_v12  ;;  %v663_v15 = vadd.f32 %v662_v5, %v531_v12  ;;  %v701_v16 = vmul.f32 %v531_v12, %v531_v12  ;;  %648 = vst [vmem:[%s1191_s25 + $0xc8] sm:$0xff] %v1248_v13 }
 0x10f   : > { %v664_v18 = vadd.f32 %v923_v0, %v663_v15  ;;  %v732_v19 = vadd.f32 %v731_v14, %v701_v16  ;;  %v713_v0 = vmul.f32 %v1228_v56, %v1228_v56  ;;  %v717_v14 = vmul.f32 %v1248_v13, %v1248_v13 }
 0x111   : > { %v733_v21 = vadd.f32 %v732_v19, %v702_v17  ;;  %v927_v22 = vpop.f32.mrb[12].mxu0  ;;  %v665_v23 = vadd.f32 %v924_v10, %v664_v18  ;;  %v1253_v6 = vpop.f32.mrb[12].mxu1 }
 0x112   : > { %637 = vst [vmem:[%s1191_s25 + $0x70] sm:$0xff] %v927_v22  ;;  %v544_v24 = vpop.f32.mrb[13].mxu0  ;;  %653 = vst [vmem:[%s1191_s25 + $0xf0] sm:$0xff] %v1253_v6  ;;  %v608_v25 = vpop.f32.mrb[13].mxu1  ;;  %v706_v40 = vmul.f32 %v927_v22, %v927_v22 }
 0x113   : > { %635 = vst [vmem:[%s1191_s25 + $0x60] sm:$0xff] %v544_v24  ;;  %v666_v26 = vadd.f32 %v665_v23, %v544_v24  ;;  %v704_v27 = vmul.f32 %v544_v24, %v544_v24  ;;  %v734_v28 = vadd.f32 %v733_v21, %v703_v20  ;;  %v928_v9 = vpop.f32.mrb[14].mxu0  ;;  %651 = vst [vmem:[%s1191_s25 + $0xe0] sm:$0xff] %v608_v25  ;;  %v944_v30 = vpop.f32.mrb[14].mxu1 }
 0x114   : > { %638 = vst [vmem:[%s1191_s25 + $0x78] sm:$0xff] %v928_v9  ;;  %v547_v32 = vpop.f32.mrb[15].mxu0  ;;  %654 = vst [vmem:[%s1191_s25 + $0xf8] sm:$0xff] %v944_v30  ;;  %v611_v34 = vpop.f32.mrb[15].mxu1  ;;  %v707_v43 = vmul.f32 %v928_v9, %v928_v9  ;;  %v720_v18 = vmul.f32 %v608_v25, %v608_v25  ;;  %v722_v23 = vmul.f32 %v1253_v6, %v1253_v6 }
 0x115   : > { %v735_v36 = vadd.f32 %v734_v28, %v704_v27  ;;  %636 = vst [vmem:[%s1191_s25 + $0x68] sm:$0xff] %v547_v32  ;;  %v667_v37 = vadd.f32 %v666_v26, %v547_v32  ;;  %v705_v38 = vmul.f32 %v547_v32, %v547_v32  ;;  %652 = vst [vmem:[%s1191_s25 + $0xe8] sm:$0xff] %v611_v34 }
 0x116   : > { %v723_v26 = vmul.f32 %v944_v30, %v944_v30 }
 0x117   : > { %v668_v41 = vadd.f32 %v927_v22, %v667_v37  ;;  %v736_v42 = vadd.f32 %v735_v36, %v705_v38 }
 0x119   : > { %v737_v44 = vadd.f32 %v736_v42, %v706_v40  ;;  %v669_v45 = vadd.f32 %v928_v9, %v668_v41 }
 0x11b   : > { %v670_v49 = vadd.f32 %v669_v45, %v1198_v31  ;;  %v738_v51 = vadd.f32 %v737_v44, %v707_v43  ;;  %v712_v31 = vmul.f32 %v1218_v50, %v1218_v50 }
 0x11d   : > { %v739_v46 = vadd.f32 %v738_v51, %v708_v47  ;;  %v671_v52 = vadd.f32 %v670_v49, %v1208_v35 }
 0x11f   : > { %v672_v58 = vadd.f32 %v1193_v29, %v671_v52  ;;  %v740_v59 = vadd.f32 %v739_v46, %v709_v53  ;;  %v714_v29 = vmul.f32 %v1213_v48, %v1213_v48 }
 0x121   : > { %v741_v61 = vadd.f32 %v740_v59, %v710_v55  ;;  %v673_v62 = vadd.f32 %v1203_v33, %v672_v58  ;;  %v715_v33 = vmul.f32 %v1223_v54, %v1223_v54 }
 0x123   : > { %v674_v63 = vadd.f32 %v673_v62, %v1218_v50  ;;  %v742_v39 = vadd.f32 %v741_v61, %v711_v60  ;;  %v716_v50 = vmul.f32 %v1238_v4, %v1238_v4 }
 0x125   : > { %v743_v57 = vadd.f32 %v742_v39, %v712_v31  ;;  %v675_v35 = vadd.f32 %v674_v63, %v1228_v56 }
 0x127   : > { %v676_v1 = vadd.f32 %v1213_v48, %v675_v35  ;;  %v744_v3 = vadd.f32 %v743_v57, %v713_v0  ;;  %v718_v48 = vmul.f32 %v1233_v2, %v1233_v2 }
 0x129   : > { %v745_v5 = vadd.f32 %v744_v3, %v714_v29  ;;  %v677_v7 = vadd.f32 %v1223_v54, %v676_v1  ;;  %v719_v54 = vmul.f32 %v1243_v11, %v1243_v11 }
 0x12b   : > { %v678_v8 = vadd.f32 %v677_v7, %v1238_v4  ;;  %v746_v10 = vadd.f32 %v745_v5, %v715_v33 }
 0x12d   : > { %v747_v12 = vadd.f32 %v746_v10, %v716_v50  ;;  %v679_v56 = vadd.f32 %v678_v8, %v1248_v13  ;;  %v721_v13 = vmul.f32 %v611_v34, %v611_v34 }
 0x12f   : > { %v680_v15 = vadd.f32 %v1233_v2, %v679_v56  ;;  %v748_v16 = vadd.f32 %v747_v12, %v717_v14 }
 0x131   : > { %v749_v17 = vadd.f32 %v748_v16, %v718_v48  ;;  %v681_v4 = vadd.f32 %v1243_v11, %v680_v15 }
 0x133   : > { %v682_v19 = vadd.f32 %v681_v4, %v608_v25  ;;  %v750_v20 = vadd.f32 %v749_v17, %v719_v54 }
 0x135   : > { %v751_v21 = vadd.f32 %v750_v20, %v720_v18  ;;  %v683_v22 = vadd.f32 %v682_v19, %v611_v34 }
 0x137   : > { %v684_v2 = vadd.f32 %v1253_v6, %v683_v22  ;;  %v752_v24 = vadd.f32 %v751_v21, %v721_v13 }
 0x139   : > { %v685_v27 = vadd.f32 %v944_v30, %v684_v2  ;;  %v753_v28 = vadd.f32 %v752_v24, %v722_v23 }
 0x13b   : > { %v686_v9 = vrot.slane %v685_v27, 4  ;;  %v754_v32 = vadd.f32 %v753_v28, %v723_v26 }
 0x13d   : > { %v687_v11 = vadd.f32 %v686_v9, %v685_v27  ;;  %v755_v36 = vrot.slane %v754_v32, 4 }
 0x13f   : > { %v688_v25 = vrot.slane %v687_v11, 2  ;;  %v756_v37 = vadd.f32 %v755_v36, %v754_v32 }
 0x141   : > { %v689_v38 = vadd.f32 %v688_v25, %v687_v11  ;;  %v757_v40 = vrot.slane %v756_v37, 2 }
 0x143   : > { %v690_v34 = vrot.slane %v689_v38, 1  ;;  %v758_v41 = vadd.f32 %v757_v40, %v756_v37 }
 0x145   : > { %v759_v42 = vrot.slane %v758_v41, 1  ;;  %v691_v6 = vadd.f32 %v690_v34, %v689_v38 }
 0x147   : > { %v760_v30 = vadd.f32 %v759_v42, %v758_v41 }
 0x149   : > { %v762_v43 = vsel %vm761_vm0, %v691_v6, %v760_v30 }
 0x14a   : > { %763 = vst [vmem:[%s238_s28] sm:$0x3] %v762_v43 }
 0x14b PF: > { %s16_s18 = sadd.s32 1, %s983_s18  }
 0x14c   : > { %p13_p5 = scmp.ge.s32.totalorder %s16_s18, 4  }
 0x14e   :  { %15 = sbr.rel (!%p13_p5) target bundleno = 1 (0x1), region = 78 }

// kernel: group_bottleneck_forward.9
= control target key start
LH: loop header
LB: loop body
LE: loop exit
PB: predicated region body
PF: predicated region fallthrough
CT: control target
= control target key end

     0   :  { %s585_s15 = smov 0   ;;  %s786_s0 = inlined_call_operand.vmem [shape: f32[512,128], index: 0, kind: input, shape index: {}]   ;;  %s787_s1 = inlined_call_operand.vmem [shape: f32[1,128], index: 1, kind: input, shape index: {}]   ;;  %s788_s2 = inlined_call_operand.vmem [shape: f32[1,128], index: 2, kind: input, shape index: {}]   ;;  %s789_s3 = inlined_call_operand.vmem [shape: f32[512,128], index: 3, kind: input, shape index: {}]   ;;  %s790_s4 = inlined_call_operand.vmem [shape: f32[512,128], index: 4, kind: output, shape index: {}]  }
   0x1 LB: > { %s529_s16 = sadd.s32 4294967295, %s558_s15   ;;  %p533_p0 = scmp.ge.s32.totalorder %s558_s15, 1  ;;  %s558_s15 = sphi %s585_s15, %s14_s15  }
   0x2   : > { %p174_p1 = scmp.lt.s32.totalorder %s558_s15, 3 }
   0x4   : > { %p175_p2 = pnand %p533_p0, %p174_p1 }
   0x5   : > { %s534_s17 = sshll.u32 (!%p175_p2), %s529_s16, 5  ;;  %v598_v0 = vld [vmem:[%s787_s1] ss:$0 sm:$0xff] (!%p175_p2) }
   0x6   : > { %178 = sbr.rel (%p175_p2) target bundleno = 55 (0x37), region = 36  ;;  %p206_p3 = scmp.lt.s32.totalorder (!%p175_p2), %s534_s17, 63  ;;  %v616_v2 = vld [vmem:[%s788_s2] ss:$0 sm:$0xff] (!%p175_p2) }
   0xd   : > { %s792_s17 = smov (!%p206_p3, %s534_s17), 63 }
   0xe   : > { %s593_s18 = sshll.u32 %s792_s17, 3 }
   0xf   : > { %s604_s23 = scalar_lea.vmem %s786_s0, %s593_s18  ;;  %s610_s26 = scalar_lea.vmem %s789_s3, %s593_s18 }
  0x10   : > { %v223_v1 = vld [vmem:[%s604_s23] sm:$0xff]  ;;  %v224_v3 = vld [vmem:[%s604_s23 + $0x8] sm:$0xff]  ;;  %v225_v7 = vld [vmem:[%s604_s23 + $0x10] sm:$0xff]  ;;  %s646_s5 = scalar_lea.vmem %s790_s4, %s593_s18 }
  0x11   : > { %v262_v4 = vmul.f32 %v598_v0, %v223_v1  ;;  %v333_v5 = vld [vmem:[%s610_s26] sm:$0xff]  ;;  %v263_v6 = vmul.f32 %v598_v0, %v224_v3  ;;  %v334_v8 = vld [vmem:[%s610_s26 + $0x8] sm:$0xff]  ;;  %v264_v9 = vmul.f32 %v598_v0, %v225_v7  ;;  %v226_v10 = vld [vmem:[%s604_s23 + $0x18] sm:$0xff] }
  0x12   : > { %v227_v11 = vld [vmem:[%s604_s23 + $0x20] sm:$0xff]  ;;  %v335_v14 = vld [vmem:[%s610_s26 + $0x10] sm:$0xff]  ;;  %v265_v15 = vmul.f32 %v598_v0, %v226_v10  ;;  %v336_v16 = vld [vmem:[%s610_s26 + $0x18] sm:$0xff] }
  0x13   : > { %v301_v12 = vadd.f32 %v616_v2, %v262_v4  ;;  %v302_v13 = vadd.f32 %v616_v2, %v263_v6  ;;  %v266_v17 = vmul.f32 %v598_v0, %v227_v11  ;;  %v228_v18 = vld [vmem:[%s604_s23 + $0x28] sm:$0xff]  ;;  %v303_v19 = vadd.f32 %v616_v2, %v264_v9  ;;  %v337_v20 = vld [vmem:[%s610_s26 + $0x20] sm:$0xff]  ;;  %v229_v22 = vld [vmem:[%s604_s23 + $0x30] sm:$0xff] }
  0x14   : > { %v267_v21 = vmul.f32 %v598_v0, %v228_v18  ;;  %v230_v23 = vld [vmem:[%s604_s23 + $0x38] sm:$0xff]  ;;  %v304_v26 = vadd.f32 %v616_v2, %v265_v15  ;;  %v338_v28 = vld [vmem:[%s610_s26 + $0x28] sm:$0xff]  ;;  %v268_v31 = vmul.f32 %v598_v0, %v229_v22  ;;  %v231_v33 = vld [vmem:[%s604_s23 + $0x40] sm:$0xff] }
  0x15   : > { %v365_v24 = vadd.f32 %v333_v5, %v301_v12  ;;  %v366_v25 = vadd.f32 %v334_v8, %v302_v13  ;;  %v305_v27 = vadd.f32 %v616_v2, %v266_v17  ;;  %v367_v29 = vadd.f32 %v335_v14, %v303_v19  ;;  %v232_v34 = vld [vmem:[%s604_s23 + $0x48] sm:$0xff]  ;;  %v339_v39 = vld [vmem:[%s610_s26 + $0x30] sm:$0xff]  ;;  %v340_v40 = vld [vmem:[%s610_s26 + $0x38] sm:$0xff] }
  0x16   : > { %v306_v30 = vadd.f32 %v616_v2, %v267_v21  ;;  %v269_v32 = vmul.f32 %v598_v0, %v230_v23  ;;  %v368_v37 = vadd.f32 %v336_v16, %v304_v26  ;;  %v233_v41 = vld [vmem:[%s604_s23 + $0x50] sm:$0xff]  ;;  %v307_v44 = vadd.f32 %v616_v2, %v268_v31  ;;  %v234_v46 = vld [vmem:[%s604_s23 + $0x58] sm:$0xff]  ;;  %v235_v47 = vld [vmem:[%s604_s23 + $0x60] sm:$0xff] }
  0x17   : > { %v397_v35 = vmax.f32 %v365_v24, 0.0  ;;  %v398_v36 = vmax.f32 %v366_v25, 0.0  ;;  %v369_v38 = vadd.f32 %v337_v20, %v305_v27  ;;  %v399_v42 = vmax.f32 %v367_v29, 0.0  ;;  %v236_v52 = vld [vmem:[%s604_s23 + $0x68] sm:$0xff]  ;;  %v341_v56 = vld [vmem:[%s610_s26 + $0x40] sm:$0xff]  ;;  %v343_v61 = vld [vmem:[%s610_s26 + $0x50] sm:$0xff] }
  0x18   : > { %v370_v43 = vadd.f32 %v338_v28, %v306_v30  ;;  %v308_v45 = vadd.f32 %v616_v2, %v269_v32  ;;  %v400_v48 = vmax.f32 %v368_v37, 0.0  ;;  %v270_v50 = vmul.f32 %v598_v0, %v231_v33  ;;  %v342_v57 = vld [vmem:[%s610_s26 + $0x48] sm:$0xff]  ;;  %v237_v1 = vld [vmem:[%s604_s23 + $0x70] sm:$0xff]  ;;  %v238_v3 = vld [vmem:[%s604_s23 + $0x78] sm:$0xff] }
  0x19   : > { %429 = vst [vmem:[%s646_s5] sm:$0xff] %v397_v35  ;;  %430 = vst [vmem:[%s646_s5 + $0x8] sm:$0xff] %v398_v36  ;;  %v401_v49 = vmax.f32 %v369_v38, 0.0  ;;  %v271_v51 = vmul.f32 %v598_v0, %v232_v34  ;;  %v371_v54 = vadd.f32 %v339_v39, %v307_v44  ;;  %v272_v58 = vmul.f32 %v598_v0, %v233_v41  ;;  %v344_v7 = vld [vmem:[%s610_s26 + $0x58] sm:$0xff]  ;;  %v345_v8 = vld [vmem:[%s610_s26 + $0x60] sm:$0xff] }
  0x1a   : > { %431 = vst [vmem:[%s646_s5 + $0x10] sm:$0xff] %v399_v42  ;;  %v402_v53 = vmax.f32 %v370_v43, 0.0  ;;  %v372_v55 = vadd.f32 %v340_v40, %v308_v45  ;;  %432 = vst [vmem:[%s646_s5 + $0x18] sm:$0xff] %v400_v48  ;;  %v309_v59 = vadd.f32 %v616_v2, %v270_v50  ;;  %v273_v62 = vmul.f32 %v598_v0, %v234_v46  ;;  %v346_v14 = vld [vmem:[%s610_s26 + $0x68] sm:$0xff]  ;;  %v239_v19 = vld [vmem:[%s604_s23 + $0x80] sm:$0xff] }
  0x1b   : > { %433 = vst [vmem:[%s646_s5 + $0x20] sm:$0xff] %v401_v49  ;;  %v310_v60 = vadd.f32 %v616_v2, %v271_v51  ;;  %v274_v63 = vmul.f32 %v598_v0, %v235_v47  ;;  %v403_v4 = vmax.f32 %v371_v54, 0.0  ;;  %v311_v6 = vadd.f32 %v616_v2, %v272_v58  ;;  %v240_v20 = vld [vmem:[%s604_s23 + $0x88] sm:$0xff]  ;;  %v347_v25 = vld [vmem:[%s610_s26 + $0x70] sm:$0xff]  ;;  %v348_v26 = vld [vmem:[%s610_s26 + $0x78] sm:$0xff] }
  0x1c   : > { %434 = vst [vmem:[%s646_s5 + $0x28] sm:$0xff] %v402_v53  ;;  %v404_v5 = vmax.f32 %v372_v55, 0.0  ;;  %v275_v9 = vmul.f32 %v598_v0, %v236_v52  ;;  %v373_v10 = vadd.f32 %v341_v56, %v309_v59  ;;  %v312_v12 = vadd.f32 %v616_v2, %v273_v62  ;;  %v241_v27 = vld [vmem:[%s604_s23 + $0x90] sm:$0xff]  ;;  %v242_v32 = vld [vmem:[%s604_s23 + $0x98] sm:$0xff]  ;;  %v243_v33 = vld [vmem:[%s604_s23 + $0xa0] sm:$0xff] }
  0x1d   : > { %v374_v11 = vadd.f32 %v342_v57, %v310_v60  ;;  %v313_v13 = vadd.f32 %v616_v2, %v274_v63  ;;  %435 = vst [vmem:[%s646_s5 + $0x30] sm:$0xff] %v403_v4  ;;  %v375_v15 = vadd.f32 %v343_v61, %v311_v6  ;;  %v276_v17 = vmul.f32 %v598_v0, %v237_v1  ;;  %v244_v38 = vld [vmem:[%s604_s23 + $0xa8] sm:$0xff]  ;;  %v349_v42 = vld [vmem:[%s610_s26 + $0x80] sm:$0xff]  ;;  %v351_v47 = vld [vmem:[%s610_s26 + $0x90] sm:$0xff] }
  0x1e   : > { %436 = vst [vmem:[%s646_s5 + $0x38] sm:$0xff] %v404_v5  ;;  %v314_v16 = vadd.f32 %v616_v2, %v275_v9  ;;  %v277_v18 = vmul.f32 %v598_v0, %v238_v3  ;;  %v405_v21 = vmax.f32 %v373_v10, 0.0  ;;  %v376_v23 = vadd.f32 %v344_v7, %v312_v12  ;;  %v350_v43 = vld [vmem:[%s610_s26 + $0x88] sm:$0xff]  ;;  %v245_v50 = vld [vmem:[%s604_s23 + $0xb0] sm:$0xff]  ;;  %v246_v51 = vld [vmem:[%s604_s23 + $0xb8] sm:$0xff] }
  0x1f   : > { %v406_v22 = vmax.f32 %v374_v11, 0.0  ;;  %v377_v24 = vadd.f32 %v345_v8, %v313_v13  ;;  %v407_v28 = vmax.f32 %v375_v15, 0.0  ;;  %v315_v30 = vadd.f32 %v616_v2, %v276_v17  ;;  %v352_v55 = vld [vmem:[%s610_s26 + $0x98] sm:$0xff]  ;;  %v353_v56 = vld [vmem:[%s610_s26 + $0xa0] sm:$0xff]  ;;  %v354_v62 = vld [vmem:[%s610_s26 + $0xa8] sm:$0xff] }
  0x20   : > { %v378_v29 = vadd.f32 %v346_v14, %v314_v16  ;;  %v316_v31 = vadd.f32 %v616_v2, %v277_v18  ;;  %437 = vst [vmem:[%s646_s5 + $0x40] sm:$0xff] %v405_v21  ;;  %v408_v34 = vmax.f32 %v376_v23, 0.0  ;;  %v278_v36 = vmul.f32 %v598_v0, %v239_v19  ;;  %v247_v5 = vld [vmem:[%s604_s23 + $0xc0] sm:$0xff]  ;;  %v248_v6 = vld [vmem:[%s604_s23 + $0xc8] sm:$0xff]  ;;  %v355_v11 = vld [vmem:[%s610_s26 + $0xb0] sm:$0xff] }
  0x21   : > { %438 = vst [vmem:[%s646_s5 + $0x48] sm:$0xff] %v406_v22  ;;  %v409_v35 = vmax.f32 %v377_v24, 0.0  ;;  %v279_v37 = vmul.f32 %v598_v0, %v240_v20  ;;  %439 = vst [vmem:[%s646_s5 + $0x50] sm:$0xff] %v407_v28  ;;  %v379_v40 = vadd.f32 %v347_v25, %v315_v30  ;;  %v280_v44 = vmul.f32 %v598_v0, %v241_v27  ;;  %v356_v12 = vld [vmem:[%s610_s26 + $0xb8] sm:$0xff]  ;;  %v249_v13 = vld [vmem:[%s604_s23 + $0xd0] sm:$0xff] }
  0x22   : > { %v410_v39 = vmax.f32 %v378_v29, 0.0  ;;  %v380_v41 = vadd.f32 %v348_v26, %v316_v31  ;;  %440 = vst [vmem:[%s646_s5 + $0x58] sm:$0xff] %v408_v34  ;;  %v317_v45 = vadd.f32 %v616_v2, %v278_v36  ;;  %v281_v48 = vmul.f32 %v598_v0, %v242_v32  ;;  %v250_v18 = vld [vmem:[%s604_s23 + $0xd8] sm:$0xff]  ;;  %v251_v19 = vld [vmem:[%s604_s23 + $0xe0] sm:$0xff]  ;;  %v252_v24 = vld [vmem:[%s604_s23 + $0xe8] sm:$0xff] }
  0x23   : > { %441 = vst [vmem:[%s646_s5 + $0x60] sm:$0xff] %v409_v35  ;;  %v318_v46 = vadd.f32 %v616_v2, %v279_v37  ;;  %v282_v49 = vmul.f32 %v598_v0, %v243_v33  ;;  %v411_v52 = vmax.f32 %v379_v40, 0.0  ;;  %v319_v54 = vadd.f32 %v616_v2, %v280_v44  ;;  %v357_v28 = vld [vmem:[%s610_s26 + $0xc0] sm:$0xff]  ;;  %v358_v29 = vld [vmem:[%s610_s26 + $0xc8] sm:$0xff]  ;;  %v359_v33 = vld [vmem:[%s610_s26 + $0xd0] sm:$0xff] }
  0x24   : > { %442 = vst [vmem:[%s646_s5 + $0x68] sm:$0xff] %v410_v39  ;;  %v412_v53 = vmax.f32 %v380_v41, 0.0  ;;  %v283_v57 = vmul.f32 %v598_v0, %v244_v38  ;;  %v381_v58 = vadd.f32 %v349_v42, %v317_v45  ;;  %v320_v60 = vadd.f32 %v616_v2, %v281_v48  ;;  %v253_v36 = vld [vmem:[%s604_s23 + $0xf0] sm:$0xff]  ;;  %v254_v37 = vld [vmem:[%s604_s23 + $0xf8] sm:$0xff]  ;;  %v361_v42 = vld [vmem:[%s610_s26 + $0xe0] sm:$0xff] }
  0x25   : > { %v382_v59 = vadd.f32 %v350_v43, %v318_v46  ;;  %v321_v61 = vadd.f32 %v616_v2, %v282_v49  ;;  %443 = vst [vmem:[%s646_s5 + $0x70] sm:$0xff] %v411_v52  ;;  %v383_v63 = vadd.f32 %v351_v47, %v319_v54  ;;  %v284_v3 = vmul.f32 %v598_v0, %v245_v50  ;;  %v360_v41 = vld [vmem:[%s610_s26 + $0xd8] sm:$0xff]  ;;  %v362_v48 = vld [vmem:[%s610_s26 + $0xe8] sm:$0xff] }
  0x26   : > { %444 = vst [vmem:[%s646_s5 + $0x78] sm:$0xff] %v412_v53  ;;  %v322_v1 = vadd.f32 %v616_v2, %v283_v57  ;;  %v285_v4 = vmul.f32 %v598_v0, %v246_v51  ;;  %v413_v7 = vmax.f32 %v381_v58, 0.0  ;;  %v384_v9 = vadd.f32 %v352_v55, %v320_v60  ;;  %v363_v57 = vld [vmem:[%s610_s26 + $0xf0] sm:$0xff]  ;;  %v364_v58 = vld [vmem:[%s610_s26 + $0xf8] sm:$0xff] }
  0x27   : > { %v414_v8 = vmax.f32 %v382_v59, 0.0  ;;  %v385_v10 = vadd.f32 %v353_v56, %v321_v61  ;;  %v415_v14 = vmax.f32 %v383_v63, 0.0  ;;  %v323_v16 = vadd.f32 %v616_v2, %v284_v3 }
  0x28   : > { %v386_v15 = vadd.f32 %v354_v62, %v322_v1  ;;  %v324_v17 = vadd.f32 %v616_v2, %v285_v4  ;;  %445 = vst [vmem:[%s646_s5 + $0x80] sm:$0xff] %v413_v7  ;;  %v416_v20 = vmax.f32 %v384_v9, 0.0  ;;  %v286_v22 = vmul.f32 %v598_v0, %v247_v5 }
  0x29   : > { %446 = vst [vmem:[%s646_s5 + $0x88] sm:$0xff] %v414_v8  ;;  %v417_v21 = vmax.f32 %v385_v10, 0.0  ;;  %v287_v23 = vmul.f32 %v598_v0, %v248_v6  ;;  %447 = vst [vmem:[%s646_s5 + $0x90] sm:$0xff] %v415_v14  ;;  %v387_v26 = vadd.f32 %v355_v11, %v323_v16  ;;  %v288_v30 = vmul.f32 %v598_v0, %v249_v13 }
  0x2a   : > { %v418_v25 = vmax.f32 %v386_v15, 0.0  ;;  %v388_v27 = vadd.f32 %v356_v12, %v324_v17  ;;  %448 = vst [vmem:[%s646_s5 + $0x98] sm:$0xff] %v416_v20  ;;  %v325_v31 = vadd.f32 %v616_v2, %v286_v22  ;;  %v289_v34 = vmul.f32 %v598_v0, %v250_v18 }
  0x2b   : > { %449 = vst [vmem:[%s646_s5 + $0xa0] sm:$0xff] %v417_v21  ;;  %v326_v32 = vadd.f32 %v616_v2, %v287_v23  ;;  %v290_v35 = vmul.f32 %v598_v0, %v251_v19  ;;  %v419_v38 = vmax.f32 %v387_v26, 0.0  ;;  %v327_v40 = vadd.f32 %v616_v2, %v288_v30 }
  0x2c   : > { %450 = vst [vmem:[%s646_s5 + $0xa8] sm:$0xff] %v418_v25  ;;  %v420_v39 = vmax.f32 %v388_v27, 0.0  ;;  %v291_v43 = vmul.f32 %v598_v0, %v252_v24  ;;  %v389_v44 = vadd.f32 %v357_v28, %v325_v31  ;;  %v328_v46 = vadd.f32 %v616_v2, %v289_v34 }
  0x2d   : > { %v390_v45 = vadd.f32 %v358_v29, %v326_v32  ;;  %v329_v47 = vadd.f32 %v616_v2, %v290_v35  ;;  %451 = vst [vmem:[%s646_s5 + $0xb0] sm:$0xff] %v419_v38  ;;  %v391_v49 = vadd.f32 %v359_v33, %v327_v40  ;;  %v292_v51 = vmul.f32 %v598_v0, %v253_v36 }
  0x2e   : > { %452 = vst [vmem:[%s646_s5 + $0xb8] sm:$0xff] %v420_v39  ;;  %v330_v50 = vadd.f32 %v616_v2, %v291_v43  ;;  %v293_v52 = vmul.f32 %v598_v0, %v254_v37  ;;  %v421_v53 = vmax.f32 %v389_v44, 0.0  ;;  %v392_v55 = vadd.f32 %v360_v41, %v328_v46 }
  0x2f   : > { %v422_v54 = vmax.f32 %v390_v45, 0.0  ;;  %v393_v56 = vadd.f32 %v361_v42, %v329_v47  ;;  %v423_v59 = vmax.f32 %v391_v49, 0.0  ;;  %v331_v61 = vadd.f32 %v616_v2, %v292_v51 }
  0x30   : > { %v394_v60 = vadd.f32 %v362_v48, %v330_v50  ;;  %v332_v62 = vadd.f32 %v616_v2, %v293_v52  ;;  %453 = vst [vmem:[%s646_s5 + $0xc0] sm:$0xff] %v421_v53  ;;  %v424_v0 = vmax.f32 %v392_v55, 0.0 }
  0x31   : > { %454 = vst [vmem:[%s646_s5 + $0xc8] sm:$0xff] %v422_v54  ;;  %v425_v63 = vmax.f32 %v393_v56, 0.0  ;;  %455 = vst [vmem:[%s646_s5 + $0xd0] sm:$0xff] %v423_v59  ;;  %v395_v3 = vadd.f32 %v363_v57, %v331_v61 }
  0x32   : > { %v426_v1 = vmax.f32 %v394_v60, 0.0  ;;  %v396_v4 = vadd.f32 %v364_v58, %v332_v62  ;;  %456 = vst [vmem:[%s646_s5 + $0xd8] sm:$0xff] %v424_v0 }
  0x33   : > { %457 = vst [vmem:[%s646_s5 + $0xe0] sm:$0xff] %v425_v63  ;;  %v427_v5 = vmax.f32 %v395_v3, 0.0 }
  0x34   : > { %458 = vst [vmem:[%s646_s5 + $0xe8] sm:$0xff] %v426_v1  ;;  %v428_v6 = vmax.f32 %v396_v4, 0.0 }
  0x35   : > { %459 = vst [vmem:[%s646_s5 + $0xf0] sm:$0xff] %v427_v5 }
  0x36   : > { %460 = vst [vmem:[%s646_s5 + $0xf8] sm:$0xff] %v428_v6 }
  0x37 PF: > { %s14_s15 = sadd.s32 1, %s558_s15  }
  0x38   : > { %p11_p4 = scmp.ge.s32.totalorder %s14_s15, 4  }
  0x3a   :  { %13 = sbr.rel (!%p11_p4) target bundleno = 1 (0x1), region = 69 }

// kernel: group_bottleneck_forward.7
= control target key start
LH: loop header
LB: loop body
LE: loop exit
PB: predicated region body
PF: predicated region fallthrough
CT: control target
= control target key end

     0   :  { %s6963_s12 = smov 0   ;;  %s8799_s0 = inlined_call_operand.vmem [shape: bf16[2,18,18,128], index: 0, kind: input, shape index: {}]   ;;  %s8800_s1 = inlined_call_operand.vmem [shape: bf16[9,128,128], index: 1, kind: input, shape index: {}]   ;;  %s8801_s2 = inlined_call_operand.vmem [shape: f32[512,128], index: 2, kind: output, shape index: {0}]   ;;  %s8802_s3 = inlined_call_operand.vmem [shape: f32[2,2,128], index: 3, kind: output, shape index: {1}]  }
   0x1 LB: > { %s6969_s13 = sadd.s32 4294967295, %s6941_s12   ;;  %p5225_p0 = scmp.ge.s32.totalorder %s6941_s12, 1  ;;  %s6941_s12 = sphi %s6963_s12, %s14_s12  }
   0x2   : > { %p140_p1 = scmp.lt.s32.totalorder %s6941_s12, 3 }
   0x4   : > { %p141_p2 = pnand %p5225_p0, %p140_p1 }
   0x6   : > { %144 = sbr.rel (%p141_p2) target bundleno = 605 (0x25d), region = 28 }
   0xd   : > { %v6745_v0 = vld [vmem:[%s8800_s1 + $0x40] sm:$0xff]   ;;  %p168_p3 = scmp.lt.s32.totalorder %s6969_s13, 1  ;;  %v6747_v2 = vld [vmem:[%s8800_s1 + $0x48] sm:$0xff]   ;;  %v6749_v4 = vld [vmem:[%s8800_s1 + $0x50] sm:$0xff]   ;;  %vm248_vm0 = vsmask.f32 3328 }
   0xe   : > { %v6746_v1 = vld [vmem:[%s8800_s1 + $0x100] sm:$0xff]   ;;  %6032 = vmatprep.subr.bf16.mxu1 %v6745_v0  ;;  %v6748_v3 = vld [vmem:[%s8800_s1 + $0x108] sm:$0xff]   ;;  %v6750_v5 = vld [vmem:[%s8800_s1 + $0x110] sm:$0xff]   ;;  %vm249_vm1 = vsmask.f32 7440  ;;  %vm1278_vm3 = vcmask 1042432  }
   0xf   : > { %6224 = vmatprep.subr.bf16.mxu0 %v6746_v1  ;;  %6033 = vmatpush3.bf16.msra.mxu1 %v6745_v0  ;;  %s6993_s26 = scalar_select %p168_p3, %s6969_s13, 1  ;;  %v6751_v6 = vld [vmem:[%s8800_s1 + $0x58] sm:$0xff]   ;;  %v6753_v8 = vld [vmem:[%s8800_s1 + $0x60] sm:$0xff]   ;;  %v6755_v10 = vld [vmem:[%s8800_s1 + $0x68] sm:$0xff]   ;;  %vm1279_vm4 = vcmask 1046532   ;;  %vm5131_vm6 = vcmask 1040384  }
  0x10   : > { %6225 = vmatpush3.bf16.msra.mxu0 %v6746_v1  ;;  %6034 = vmatprep.subr.bf16.mxu1 %v6747_v2  ;;  %v6752_v7 = vld [vmem:[%s8800_s1 + $0x118] sm:$0xff]   ;;  %v6754_v9 = vld [vmem:[%s8800_s1 + $0x120] sm:$0xff]   ;;  %v6756_v11 = vld [vmem:[%s8800_s1 + $0x128] sm:$0xff]  }
  0x11   : > { %6226 = vmatprep.subr.bf16.mxu0 %v6748_v3  ;;  %s6736_s4 = smul.u32 216, %s6993_s26  ;;  %v6757_v25 = vld [vmem:[%s8800_s1 + $0x70] sm:$0xff]   ;;  %v6759_v36 = vld [vmem:[%s8800_s1 + $0x78] sm:$0xff]   ;;  %vm7043_vm2 = vmor %vm248_vm0, %vm249_vm1 }
  0x12   : > { %v6758_v30 = vld [vmem:[%s8800_s1 + $0x130] sm:$0xff]   ;;  %v6760_v51 = vld [vmem:[%s8800_s1 + $0x138] sm:$0xff]   ;;  %vm7289_vm5 = vmor %vm1278_vm3, %vm1279_vm4 }
  0x13   : > { %6035 = vmatpush3.bf16.msra.mxu1 %v6747_v2  ;;  %s7011_s11 = scalar_lea.vmem %s8799_s0, %s6736_s4 }
  0x14   : > { %6227 = vmatpush3.bf16.msra.mxu0 %v6748_v3  ;;  %6036 = vmatprep.subr.bf16.mxu1 %v6749_v4  ;;  %v184_v12 = vld [vmem:[%s7011_s11] sm:$0xf]  ;;  %v185_v13 = vld [vmem:[%s7011_s11 + $0x4] sm:$0xf]  ;;  %v232_v14 = vld [vmem:[%s7011_s11 + $0x8] sm:$0x1] }
  0x15   : > { %6228 = vmatprep.subr.bf16.mxu0 %v6750_v5  ;;  %v252_v15 = vshrl.u32 %v184_v12, 16  ;;  %v255_v16 = vshll.u32 %v184_v12, 16  ;;  %v261_v17 = vshll.u32 %v185_v13, 16  ;;  %v265_v18 = vshrl.u32 %v185_v13, 16  ;;  %v5422_v20 = vld [vmem:[%s7011_s11 + $0xc] sm:$0xf] }
  0x16   : > { %v271_v19 = vshll.u32 %v232_v14, 16  ;;  %v7024_v23 = vld [vmem:[%s7011_s11 + $0x10] sm:$0xf]  ;;  %v7027_v24 = vld [vmem:[%s7011_s11 + $0x14] sm:$0x1]  ;;  %v2151_v29 = vshrl.u32 %v5422_v20, 16 }
  0x17   : > { %6037 = vmatpush3.bf16.msra.mxu1 %v6749_v4  ;;  %v254_v21 = vrot.slane %v252_v15, 4  ;;  %v257_v22 = vrot.slane %v255_v16, 5  ;;  %v263_v26 = vrot.slane %v261_v17, 5  ;;  %v267_v27 = vrot.slane %v265_v18, 4  ;;  %v186_v35 = vld [vmem:[%s7011_s11 + $0xc] sm:$0xf] }
  0x18   : > { %6229 = vmatpush3.bf16.msra.mxu0 %v6750_v5  ;;  %6038 = vmatprep.subr.bf16.mxu1 %v6751_v6  ;;  %v273_v28 = vrot.slane %v271_v19, 5  ;;  %v2154_v32 = vshll.u32 %v5422_v20, 16  ;;  %v2160_v33 = vshll.u32 %v7024_v23, 16  ;;  %v2164_v34 = vshrl.u32 %v7024_v23, 16  ;;  %v187_v42 = vld [vmem:[%s7011_s11 + $0x10] sm:$0xf] }
  0x19   : > { %6230 = vmatprep.subr.bf16.mxu0 %v6752_v7  ;;  %v258_v31 = vor.u32 %v257_v22, %v254_v21  ;;  %v268_v38 = vor.u32 %v267_v27, %v263_v26  ;;  %v2153_v39 = vrot.slane %v2151_v29, 4  ;;  %v2170_v40 = vshll.u32 %v7027_v24, 16  ;;  %v233_v55 = vld [vmem:[%s7011_s11 + $0x14] sm:$0x1]  ;;  %v5425_v57 = vld [vmem:[%s7011_s11 + $0x18] sm:$0xf] }
  0x1a   : > { %v2925_v41 = vrot.slane %v7027_v24, 5  ;;  %v2156_v44 = vrot.slane %v2154_v32, 5  ;;  %v2162_v45 = vrot.slane %v2160_v33, 5  ;;  %v2166_v46 = vrot.slane %v2164_v34, 4  ;;  %v7060_v62 = vld [vmem:[%s7011_s11 + $0x1c] sm:$0xf] }
  0x1b   : > { %6039 = vmatpush3.bf16.msra.mxu1 %v6751_v6  ;;  %v259_v43 = vrot.slane %v258_v31, 4  ;;  %v269_v47 = vrot.slane %v268_v38, 4  ;;  %v2172_v48 = vrot.slane %v2170_v40, 5  ;;  %v276_v49 = vshrl.u32 %v186_v35, 16  ;;  %v6761_v3 = vld [vmem:[%s8800_s1] sm:$0xff]  }
  0x1c   : > { %6231 = vmatpush3.bf16.msra.mxu0 %v6752_v7  ;;  %6040 = vmatprep.subr.bf16.mxu1 %v6753_v8  ;;  %v279_v50 = vshll.u32 %v186_v35, 16  ;;  %v2157_v53 = vor.u32 %v2156_v44, %v2153_v39  ;;  %v2167_v54 = vor.u32 %v2166_v46, %v2162_v45  ;;  %v285_v56 = vshll.u32 %v187_v42, 16  ;;  %v7068_v4 = vld [vmem:[%s8800_s1 + $0x140] sm:$0xff]   ;;  %v188_v21 = vld [vmem:[%s7011_s11 + $0x18] sm:$0xf]  ;;  %v6764_v46 = vld [vmem:[%s8800_s1 + $0x8] sm:$0xff]  }
  0x1d   : > { %6232 = vmatprep.subr.bf16.mxu0 %v6754_v9  ;;  %v264_v52 = vsel %vm7043_vm2, %v259_v43, %v263_v26  ;;  %v274_v58 = vsel %vm7043_vm2, %v269_v47, %v273_v28  ;;  %v278_v59 = vrot.slane %v276_v49, 4  ;;  %v289_v61 = vshrl.u32 %v187_v42, 16  ;;  %v189_v28 = vld [vmem:[%s7011_s11 + $0x1c] sm:$0xf]  ;;  %v234_v33 = vld [vmem:[%s7011_s11 + $0x20] sm:$0x1] }
  0x1e   : > { %v281_v60 = vrot.slane %v279_v50, 5  ;;  %v5246_v63 = vcombine.low %v264_v52, %v274_v58  ;;  %v2158_v0 = vrot.slane %v2157_v53, 4  ;;  %v2168_v1 = vrot.slane %v2167_v54, 4  ;;  %v5428_v39 = vld [vmem:[%s7011_s11 + $0x24] sm:$0xf] }
  0x1f   : > { %6041 = vmatpush3.bf16.msra.mxu1 %v6753_v8  ;;  %v287_v2 = vrot.slane %v285_v56, 5  ;;  %v291_v6 = vrot.slane %v289_v61, 4  ;;  %v295_v7 = vshll.u32 %v233_v55, 16  ;;  %v7071_v8 = vld [vmem:[%s7011_s11 + $0x20] sm:$0x1]  ;;  %v2178_v12 = vshll.u32 %v5425_v57, 16 }
  0x20   : > { %6233 = vmatpush3.bf16.msra.mxu0 %v6754_v9  ;;  %6042 = vmatprep.subr.bf16.mxu1 %v6755_v10  ;;  %v282_v5 = vor.u32 %v281_v60, %v278_v59  ;;  %v2163_v9 = vsel %vm7043_vm2, %v2158_v0, %v2162_v45  ;;  %v2184_v19 = vshll.u32 %v7060_v62, 16  ;;  %v2188_v20 = vshrl.u32 %v7060_v62, 16  ;;  %v7096_v45 = vld [vmem:[%s7011_s11 + $0x28] sm:$0xf]  ;;  %v190_v52 = vld [vmem:[%s7011_s11 + $0x24] sm:$0xf] }
  0x21   : > { %6234 = vmatprep.subr.bf16.mxu0 %v6756_v11  ;;  %6048 = vmatprep.mubr.bf16.mxu1 %v5246_v63  ;;  %v292_v15 = vor.u32 %v291_v6, %v287_v2  ;;  %v297_v16 = vrot.slane %v295_v7, 5  ;;  %v2180_v18 = vrot.slane %v2178_v12, 5  ;;  %v2194_v26 = vshll.u32 %v7071_v8, 16  ;;  %v6763_v63 = vld [vmem:[%s8800_s1 + $0x148] sm:$0xff]  }
  0x22   : > { %v283_v14 = vrot.slane %v282_v5, 4  ;;  %v2929_v27 = vrot.slane %v7060_v62, 5  ;;  %v2190_v31 = vrot.slane %v2188_v20, 4  ;;  %v2932_v32 = vrot.slane %v7071_v8, 5  ;;  %v191_v5 = vld [vmem:[%s7011_s11 + $0x28] sm:$0xf] }
  0x23   : > { %6043 = vmatpush3.bf16.msra.mxu1 %v6755_v10  ;;  %v2173_v10 = vsel %vm7043_vm2, %v2168_v1, %v2172_v48  ;;  %v2196_v35 = vrot.slane %v2194_v26, 5  ;;  %v300_v38 = vshrl.u32 %v188_v21, 16  ;;  %v303_v44 = vshll.u32 %v188_v21, 16 }
  0x24   : > { %6235 = vmatpush3.bf16.msra.mxu0 %v6756_v11  ;;  %6044 = vmatprep.subr.bf16.mxu1 %v6757_v25  ;;  %v2175_v11 = vshrl.u32 %v5425_v57, 16  ;;  %v5486_v13 = vcombine.low %v2163_v9, %v2173_v10  ;;  %v288_v22 = vsel %vm7043_vm2, %v283_v14, %v287_v2  ;;  %v309_v48 = vshll.u32 %v189_v28, 16 }
  0x25   : > { %6236 = vmatprep.subr.bf16.mxu0 %v6758_v30  ;;  %v302_v47 = vrot.slane %v300_v38, 4  ;;  %v313_v49 = vshrl.u32 %v189_v28, 16  ;;  %v319_v50 = vshll.u32 %v234_v33, 16  ;;  %v305_v55 = vrot.slane %v303_v44, 5  ;;  %v7127_v33 = vld [vmem:[%s7011_s11 + $0x34] sm:$0xf] }
  0x26   : > { %v2177_v17 = vrot.slane %v2175_v11, 4  ;;  %6240 = vmatprep.mubr.bf16.mxu0 %v5486_v13  ;;  %v2199_v56 = vshrl.u32 %v5428_v39, 16  ;;  %v311_v57 = vrot.slane %v309_v48, 5  ;;  %v2202_v60 = vshll.u32 %v5428_v39, 16  ;;  %v235_v11 = vld [vmem:[%s7011_s11 + $0x2c] sm:$0x1] }
  0x27   : > { %6045 = vmatpush3.bf16.msra.mxu1 %v6757_v25  ;;  %v293_v25 = vrot.slane %v292_v15, 4  ;;  %v315_v58 = vrot.slane %v313_v49, 4  ;;  %v321_v59 = vrot.slane %v319_v50, 5  ;;  %v306_v0 = vor.u32 %v305_v55, %v302_v47  ;;  %v6766_v48 = vld [vmem:[%s8800_s1 + $0x158] sm:$0xff]  }
  0x28   : > { %6237 = vmatpush3.bf16.msra.mxu0 %v6758_v30  ;;  %6046 = vmatprep.subr.bf16.mxu1 %v6759_v36  ;;  %v2181_v29 = vor.u32 %v2180_v18, %v2177_v17  ;;  %v2186_v30 = vrot.slane %v2184_v19, 5  ;;  %v2201_v1 = vrot.slane %v2199_v56, 4  ;;  %v2208_v2 = vshll.u32 %v7096_v45, 16 }
  0x29   : > { %6238 = vmatprep.subr.bf16.mxu0 %v6760_v51  ;;  %v298_v34 = vsel %vm7043_vm2, %v293_v25, %v297_v16  ;;  %v316_v7 = vor.u32 %v315_v58, %v311_v57  ;;  %v2204_v9 = vrot.slane %v2202_v60, 5  ;;  %v2212_v10 = vshrl.u32 %v7096_v45, 16  ;;  %v5431_v16 = vld [vmem:[%s7011_s11 + $0x30] sm:$0xf]  ;;  %v6773_v60 = vld [vmem:[%s8800_s1 + $0x20] sm:$0xff]  }
  0x2a   : > { %v5247_v40 = vcombine.low %v288_v22, %v298_v34  ;;  %v2182_v42 = vrot.slane %v2181_v29, 4  ;;  %v2191_v43 = vor.u32 %v2190_v31, %v2186_v30  ;;  %v307_v12 = vrot.slane %v306_v0, 4  ;;  %v6770_v34 = vld [vmem:[%s8800_s1 + $0x18] sm:$0xff]  }
  0x2b   : > { %6047 = vmatpush3.bf16.msra.mxu1 %v6759_v36  ;;  %v7092_v36 = vrot.slane %v2929_v27, 4  ;;  %v2210_v13 = vrot.slane %v2208_v2, 5  ;;  %v324_v15 = vshrl.u32 %v190_v52, 16  ;;  %v317_v17 = vrot.slane %v316_v7, 4  ;;  %v236_v2 = vld [vmem:[%s7011_s11 + $0x38] sm:$0x1] }
  0x2c   : > { %6239 = vmatpush3.bf16.msra.mxu0 %v6760_v51  ;;  %6080 = vmatprep.subr.bf16.mxu1 %v6761_v3  ;;  %v7102_v51 = vld [vmem:[%s7011_s11 + $0x2c] sm:$0x1]  ;;  %v2187_v53 = vsel %vm7043_vm2, %v2182_v42, %v2186_v30  ;;  %v2192_v54 = vrot.slane %v2191_v43, 4  ;;  %v2205_v18 = vor.u32 %v2204_v9, %v2201_v1  ;;  %v2214_v19 = vrot.slane %v2212_v10, 4  ;;  %v5434_v9 = vld [vmem:[%s7011_s11 + $0x3c] sm:$0xf] }
  0x2d   : > { %6272 = vmatprep.subr.bf16.mxu0 %v7068_v4  ;;  %v2218_v14 = vshll.u32 %v7102_v51, 16  ;;  %v327_v20 = vshll.u32 %v190_v52, 16  ;;  %v312_v21 = vsel %vm7043_vm2, %v307_v12, %v311_v57  ;;  %v326_v25 = vrot.slane %v324_v15, 4 }
  0x2e   : > { %6049 = vmatmul.mubr.bf16.vlgmr.msra.gmra.mrb[0].mxu1 %v5247_v40  ;;  %v2197_v61 = vsel %vm7043_vm2, %v2192_v54, %v2196_v35  ;;  %v333_v26 = vshll.u32 %v191_v5, 16  ;;  %v322_v28 = vsel %vm7043_vm2, %v317_v17, %v321_v59  ;;  %v2206_v29 = vrot.slane %v2205_v18, 4  ;;  %v192_v54 = vld [vmem:[%s7011_s11 + $0x30] sm:$0xf]  ;;  %v193_v59 = vld [vmem:[%s7011_s11 + $0x34] sm:$0xf] }
  0x2f   : > { %6081 = vmatpush3.bf16.msra.mxu1 %v6761_v3  ;;  %v6767_v3 = vld [vmem:[%s8800_s1 + $0x10] sm:$0xff]   ;;  %v5487_v6 = vcombine.low %v2187_v53, %v2197_v61  ;;  %v2220_v22 = vrot.slane %v2218_v14, 5  ;;  %v2215_v30 = vor.u32 %v2214_v19, %v2210_v13  ;;  %v329_v31 = vrot.slane %v327_v20, 5  ;;  %v6775_v14 = vld [vmem:[%s8800_s1 + $0x28] sm:$0xff]   ;;  %v7161_v19 = vld [vmem:[%s7011_s11 + $0x40] sm:$0xf] }
  0x30   : > { %6082 = vmatprep.subr.bf16.mxu1 %v6764_v46  ;;  %v5248_v35 = vcombine.low %v312_v21, %v322_v28  ;;  %v335_v38 = vrot.slane %v333_v26, 5  ;;  %v337_v39 = vshrl.u32 %v191_v5, 16  ;;  %v343_v40 = vshll.u32 %v235_v11, 16  ;;  %v6768_v20 = vld [vmem:[%s8800_s1 + $0x160] sm:$0xff]  }
  0x31   : > { %6241 = vmatmul.mubr.bf16.vlgmr.msra.gmra.mrb[0].mxu0 %v5487_v6  ;;  %v2211_v42 = vsel %vm7043_vm2, %v2206_v29, %v2210_v13  ;;  %v2216_v43 = vrot.slane %v2215_v30, 4  ;;  %v330_v44 = vor.u32 %v329_v31, %v326_v25  ;;  %v2223_v47 = vshrl.u32 %v5431_v16, 16  ;;  %v7169_v28 = vld [vmem:[%s7011_s11 + $0x44] sm:$0x1] }
  0x32   : > { %6273 = vmatpush3.bf16.msra.mxu0 %v7068_v4  ;;  %v6765_v4 = vld [vmem:[%s8800_s1 + $0x150] sm:$0xff]   ;;  %6052 = vmatprep.mubr.bf16.mxu1 %v5248_v35  ;;  %v339_v49 = vrot.slane %v337_v39, 4  ;;  %v345_v50 = vrot.slane %v343_v40, 5  ;;  %v2226_v52 = vshll.u32 %v5431_v16, 16  ;;  %v2232_v53 = vshll.u32 %v7127_v33, 16 }
  0x33   : > { %6083 = vmatpush3.bf16.msra.mxu1 %v6764_v46  ;;  %6274 = vmatprep.subr.bf16.mxu0 %v6763_v63  ;;  %v7138_v46 = vld [vmem:[%s7011_s11 + $0x38] sm:$0x1]  ;;  %v2221_v55 = vsel %vm7043_vm2, %v2216_v43, %v2220_v22  ;;  %v331_v56 = vrot.slane %v330_v44, 4  ;;  %v2225_v57 = vrot.slane %v2223_v47, 4  ;;  %v2236_v58 = vshrl.u32 %v7127_v33, 16  ;;  %v6777_v35 = vld [vmem:[%s8800_s1 + $0x30] sm:$0xff]  }
  0x34   : > { %6084 = vmatprep.subr.bf16.mxu1 %v6767_v3  ;;  %v5488_v61 = vcombine.low %v2211_v42, %v2221_v55  ;;  %v2228_v0 = vrot.slane %v2226_v52, 5  ;;  %v2234_v1 = vrot.slane %v2232_v53, 5  ;;  %v2242_v6 = vshll.u32 %v7138_v46, 16  ;;  %v195_v55 = vld [vmem:[%s7011_s11 + $0x40] sm:$0xf] }
  0x35   : > { %v336_v5 = vsel %vm7043_vm2, %v331_v56, %v335_v38  ;;  %v348_v7 = vshrl.u32 %v192_v54, 16  ;;  %v351_v12 = vshll.u32 %v192_v54, 16  ;;  %v357_v13 = vshll.u32 %v193_v59, 16 }
  0x36   : > { %6275 = vmatpush3.bf16.msra.mxu0 %v6763_v63  ;;  %v340_v63 = vor.u32 %v339_v49, %v335_v38  ;;  %6244 = vmatprep.mubr.bf16.mxu0 %v5488_v61  ;;  %v2229_v11 = vor.u32 %v2228_v0, %v2225_v57  ;;  %v2244_v16 = vrot.slane %v2242_v6, 5  ;;  %v361_v18 = vshrl.u32 %v193_v59, 16 }
  0x37   : > { %6085 = vmatpush3.bf16.msra.mxu1 %v6767_v3  ;;  %6276 = vmatprep.subr.bf16.mxu0 %v6765_v4  ;;  %v2238_v3 = vrot.slane %v2236_v58, 4  ;;  %v350_v17 = vrot.slane %v348_v7, 4  ;;  %v353_v25 = vrot.slane %v351_v12, 5  ;;  %v359_v26 = vrot.slane %v357_v13, 5 }
  0x38   : > { %6086 = vmatprep.subr.bf16.mxu1 %v6770_v34  ;;  %v341_v10 = vrot.slane %v340_v63, 4  ;;  %v2230_v22 = vrot.slane %v2229_v11, 4  ;;  %v363_v31 = vrot.slane %v361_v18, 4  ;;  %v2247_v40 = vshrl.u32 %v5434_v9, 16  ;;  %v237_v63 = vld [vmem:[%s7011_s11 + $0x44] sm:$0x1] }
  0x39   : > { %v2239_v15 = vor.u32 %v2238_v3, %v2234_v1  ;;  %v354_v39 = vor.u32 %v353_v25, %v350_v17  ;;  %v2250_v42 = vshll.u32 %v5434_v9, 16  ;;  %v2256_v49 = vshll.u32 %v7161_v19, 16  ;;  %v5437_v9 = vld [vmem:[%s7011_s11 + $0x48] sm:$0xf] }
  0x3a   : > { %6277 = vmatpush3.bf16.msra.mxu0 %v6765_v4  ;;  %v346_v21 = vsel %vm7043_vm2, %v341_v10, %v345_v50  ;;  %v367_v4 = vshll.u32 %v236_v2, 16  ;;  %v2235_v38 = vsel %vm7043_vm2, %v2230_v22, %v2234_v1  ;;  %v364_v44 = vor.u32 %v363_v31, %v359_v26  ;;  %v6779_v2 = vld [vmem:[%s8800_s1 + $0x38] sm:$0xff]   ;;  %v7202_v22 = vld [vmem:[%s7011_s11 + $0x50] sm:$0x1] }
  0x3b   : > { %6087 = vmatpush3.bf16.msra.mxu1 %v6770_v34  ;;  %6278 = vmatprep.subr.bf16.mxu0 %v6766_v48  ;;  %v5249_v29 = vcombine.low %v336_v5, %v346_v21  ;;  %v2240_v30 = vrot.slane %v2239_v15, 4  ;;  %v194_v34 = vld [vmem:[%s7011_s11 + $0x3c] sm:$0xf]  ;;  %v355_v52 = vrot.slane %v354_v39, 4  ;;  %v2249_v53 = vrot.slane %v2247_v40, 4  ;;  %v6771_v15 = vld [vmem:[%s8800_s1 + $0x170] sm:$0xff]  }
  0x3c   : > { %6088 = vmatprep.subr.bf16.mxu1 %v6773_v60  ;;  %v369_v47 = vrot.slane %v367_v4, 5  ;;  %v2252_v54 = vrot.slane %v2250_v42, 5  ;;  %v365_v56 = vrot.slane %v364_v44, 4  ;;  %v2258_v57 = vrot.slane %v2256_v49, 5  ;;  %v6772_v31 = vld [vmem:[%s8800_s1 + $0x178] sm:$0xff]   ;;  %v7213_v4 = vld [vmem:[%s8800_s1 + $0x80] sm:$0xff]  }
  0x3d   : > { %6053 = vmatmul.mubr.bf16.gmra.mrb[4].mxu1 %v5249_v29  ;;  %v2245_v43 = vsel %vm7043_vm2, %v2240_v30, %v2244_v16  ;;  %v2260_v58 = vshrl.u32 %v7161_v19, 16  ;;  %v2266_v59 = vshll.u32 %v7169_v28, 16  ;;  %v372_v0 = vshrl.u32 %v194_v34, 16  ;;  %v196_v30 = vld [vmem:[%s7011_s11 + $0x48] sm:$0xf] }
  0x3e   : > { %6279 = vmatpush3.bf16.msra.mxu0 %v6766_v48  ;;  %v5489_v50 = vcombine.low %v2235_v38, %v2245_v43  ;;  %v6769_v48 = vld [vmem:[%s8800_s1 + $0x168] sm:$0xff]   ;;  %v2253_v61 = vor.u32 %v2252_v54, %v2249_v53  ;;  %v375_v1 = vshll.u32 %v194_v34, 16  ;;  %v370_v5 = vsel %vm7043_vm2, %v365_v56, %v369_v47  ;;  %v238_v54 = vld [vmem:[%s7011_s11 + $0x50] sm:$0x1] }
  0x3f   : > { %6089 = vmatpush3.bf16.msra.mxu1 %v6773_v60  ;;  %6280 = vmatprep.subr.bf16.mxu0 %v6768_v20  ;;  %v360_v60 = vsel %vm7043_vm2, %v355_v52, %v359_v26  ;;  %v2262_v3 = vrot.slane %v2260_v58, 4  ;;  %v2268_v6 = vrot.slane %v2266_v59, 5  ;;  %v381_v7 = vshll.u32 %v195_v55, 16  ;;  %v197_v53 = vld [vmem:[%s7011_s11 + $0x4c] sm:$0xf] }
  0x40   : > { %6090 = vmatprep.subr.bf16.mxu1 %v6775_v14  ;;  %6245 = vmatmul.mubr.bf16.gmra.mrb[4].mxu0 %v5489_v50  ;;  %v5250_v10 = vcombine.low %v360_v60, %v370_v5  ;;  %v2254_v11 = vrot.slane %v2253_v61, 4  ;;  %v374_v12 = vrot.slane %v372_v0, 4  ;;  %v377_v13 = vrot.slane %v375_v1, 5  ;;  %v5440_v58 = vld [vmem:[%s7011_s11 + $0x54] sm:$0xf] }
  0x41   : > { %v2263_v16 = vor.u32 %v2262_v3, %v2258_v57  ;;  %v383_v17 = vrot.slane %v381_v7, 5  ;;  %v385_v18 = vshrl.u32 %v195_v55, 16  ;;  %v391_v21 = vshll.u32 %v237_v63, 16  ;;  %v7227_v0 = vld [vmem:[%s7011_s11 + $0x58] sm:$0xf] }
  0x42   : > { %6281 = vmatpush3.bf16.msra.mxu0 %v6768_v20  ;;  %6056 = vmatprep.mubr.bf16.mxu1 %v5250_v10  ;;  %v2259_v20 = vsel %vm7043_vm2, %v2254_v11, %v2258_v57  ;;  %v378_v25 = vor.u32 %v377_v13, %v374_v12  ;;  %v2271_v26 = vshrl.u32 %v5437_v9, 16  ;;  %v2274_v29 = vshll.u32 %v5437_v9, 16 }
  0x43   : > { %6091 = vmatpush3.bf16.msra.mxu1 %v6775_v14  ;;  %v7196_v14 = vld [vmem:[%s7011_s11 + $0x4c] sm:$0xf]  ;;  %6282 = vmatprep.subr.bf16.mxu0 %v6769_v48  ;;  %v2264_v34 = vrot.slane %v2263_v16, 4  ;;  %v393_v38 = vrot.slane %v391_v21, 5  ;;  %v2290_v52 = vshll.u32 %v7202_v22, 16  ;;  %v396_v61 = vshrl.u32 %v196_v30, 16 }
  0x44   : > { %6092 = vmatprep.subr.bf16.mxu1 %v6777_v35  ;;  %v2280_v39 = vshll.u32 %v7196_v14, 16  ;;  %v379_v40 = vrot.slane %v378_v25, 4  ;;  %v2273_v42 = vrot.slane %v2271_v26, 4  ;;  %v2276_v43 = vrot.slane %v2274_v29, 5 }
  0x45   : > { %v2284_v44 = vshrl.u32 %v7196_v14, 16  ;;  %v2269_v47 = vsel %vm7043_vm2, %v2264_v34, %v2268_v6  ;;  %v2292_v60 = vrot.slane %v2290_v52, 5  ;;  %v399_v63 = vshll.u32 %v196_v30, 16  ;;  %v7232_v6 = vld [vmem:[%s8800_s1 + $0x180] sm:$0xff]  }
  0x46   : > { %6283 = vmatpush3.bf16.msra.mxu0 %v6769_v48  ;;  %v2282_v50 = vrot.slane %v2280_v39, 5  ;;  %v5490_v55 = vcombine.low %v2259_v20, %v2269_v47  ;;  %v384_v48 = vsel %vm7043_vm2, %v379_v40, %v383_v17  ;;  %v2277_v56 = vor.u32 %v2276_v43, %v2273_v42  ;;  %v7239_v20 = vld [vmem:[%s7011_s11 + $0x5c] sm:$0x1]  ;;  %v199_v43 = vld [vmem:[%s7011_s11 + $0x58] sm:$0xf] }
  0x47   : > { %6093 = vmatpush3.bf16.msra.mxu1 %v6777_v35  ;;  %v387_v35 = vrot.slane %v385_v18, 4  ;;  %6284 = vmatprep.subr.bf16.mxu0 %v6771_v15  ;;  %v2286_v57 = vrot.slane %v2284_v44, 4  ;;  %v409_v3 = vshrl.u32 %v197_v53, 16  ;;  %v398_v9 = vrot.slane %v396_v61, 4  ;;  %v5443_v52 = vld [vmem:[%s7011_s11 + $0x60] sm:$0xf] }
  0x48   : > { %6094 = vmatprep.subr.bf16.mxu1 %v6779_v2  ;;  %6248 = vmatprep.mubr.bf16.mxu0 %v5490_v55  ;;  %v2278_v1 = vrot.slane %v2277_v56, 4  ;;  %v401_v10 = vrot.slane %v399_v63, 5  ;;  %v415_v11 = vshll.u32 %v238_v54, 16  ;;  %v2295_v25 = vshrl.u32 %v5440_v58, 16 }
  0x49   : > { %v388_v49 = vor.u32 %v387_v35, %v383_v17  ;;  %v2287_v5 = vor.u32 %v2286_v57, %v2282_v50  ;;  %v411_v18 = vrot.slane %v409_v3, 4  ;;  %v2298_v29 = vshll.u32 %v5440_v58, 16  ;;  %v198_v35 = vld [vmem:[%s7011_s11 + $0x54] sm:$0xf] }
  0x4a   : > { %6285 = vmatpush3.bf16.msra.mxu0 %v6771_v15  ;;  %v2283_v13 = vsel %vm7043_vm2, %v2278_v1, %v2282_v50  ;;  %v402_v17 = vor.u32 %v401_v10, %v398_v9  ;;  %v417_v21 = vrot.slane %v415_v11, 5  ;;  %v2304_v30 = vshll.u32 %v7227_v0, 16  ;;  %v239_v50 = vld [vmem:[%s7011_s11 + $0x5c] sm:$0x1] }
  0x4b   : > { %6095 = vmatpush3.bf16.msra.mxu1 %v6779_v2  ;;  %v389_v59 = vrot.slane %v388_v49, 4  ;;  %v405_v2 = vshll.u32 %v197_v53, 16  ;;  %6286 = vmatprep.subr.bf16.mxu0 %v6772_v31  ;;  %v2288_v15 = vrot.slane %v2287_v5, 4  ;;  %v2308_v34 = vshrl.u32 %v7227_v0, 16 }
  0x4c   : > { %6128 = vmatprep.subr.bf16.mxu1 %v7213_v4  ;;  %v403_v39 = vrot.slane %v402_v17, 4  ;;  %v2297_v42 = vrot.slane %v2295_v25, 4  ;;  %v2306_v44 = vrot.slane %v2304_v30, 5  ;;  %v2314_v49 = vshll.u32 %v7239_v20, 16  ;;  %v7263_v17 = vld [vmem:[%s7011_s11 + $0x68] sm:$0x1] }
  0x4d   : > { %v394_v7 = vsel %vm7043_vm2, %v389_v59, %v393_v38  ;;  %v407_v16 = vrot.slane %v405_v2, 5  ;;  %v2293_v26 = vsel %vm7043_vm2, %v2288_v15, %v2292_v60  ;;  %v2310_v47 = vrot.slane %v2308_v34, 4  ;;  %v7254_v60 = vld [vmem:[%s7011_s11 + $0x64] sm:$0xf]  ;;  %v7267_v25 = vld [vmem:[%s7011_s11 + $0x60] sm:$0xf] }
  0x4e   : > { %v5251_v12 = vcombine.low %v384_v48, %v394_v7  ;;  %6287 = vmatpush3.bf16.msra.mxu0 %v6772_v31  ;;  %v5491_v38 = vcombine.low %v2283_v13, %v2293_v26  ;;  %v2300_v31 = vrot.slane %v2298_v29, 5  ;;  %v420_v55 = vshrl.u32 %v198_v35, 16 }
  0x4f   : > { %6320 = vmatprep.subr.bf16.mxu0 %v7232_v6  ;;  %v412_v40 = vor.u32 %v411_v18, %v407_v16  ;;  %v408_v53 = vsel %vm7043_vm2, %v403_v39, %v407_v16  ;;  %v423_v48 = vshll.u32 %v198_v35, 16  ;;  %v2311_v57 = vor.u32 %v2310_v47, %v2306_v44  ;;  %v7270_v35 = vld [vmem:[%s7011_s11 + $0x64] sm:$0xf] }
  0x50   : > { %6057 = vmatmul.mubr.bf16.gmra.mrb[8].mxu1 %v5251_v12  ;;  %6249 = vmatmul.mubr.bf16.gmra.mrb[8].mxu0 %v5491_v38  ;;  %v2301_v56 = vor.u32 %v2300_v31, %v2297_v42  ;;  %v2316_v58 = vrot.slane %v2314_v49, 5  ;;  %v429_v59 = vshll.u32 %v199_v43, 16  ;;  %v422_v63 = vrot.slane %v420_v55, 4 }
  0x51   : > { %v413_v54 = vrot.slane %v412_v40, 4  ;;  %v425_v1 = vrot.slane %v423_v48, 5  ;;  %v433_v5 = vshrl.u32 %v199_v43, 16  ;;  %v2312_v7 = vrot.slane %v2311_v57, 4  ;;  %v240_v43 = vld [vmem:[%s7011_s11 + $0x68] sm:$0x1] }
  0x52   : > { %v2302_v3 = vrot.slane %v2301_v56, 4  ;;  %v431_v9 = vrot.slane %v429_v59, 5  ;;  %v439_v12 = vshll.u32 %v239_v50, 16  ;;  %v2319_v13 = vshrl.u32 %v5443_v52, 16  ;;  %v5510_v50 = vld [vmem:[%s7011_s11 + $0xc] sm:$0xe] }
  0x53   : > { %v418_v61 = vsel %vm7043_vm2, %v413_v54, %v417_v21  ;;  %v426_v10 = vor.u32 %v425_v1, %v422_v63  ;;  %v435_v11 = vrot.slane %v433_v5, 4  ;;  %v2317_v16 = vsel %vm7043_vm2, %v2312_v7, %v2316_v58  ;;  %v7285_v5 = vld [vmem:[%s7011_s11 + $0x6c] sm:$0xf] }
  0x54   : > { %v5252_v2 = vcombine.low %v408_v53, %v418_v61  ;;  %v2307_v15 = vsel %vm7043_vm2, %v2302_v3, %v2306_v44  ;;  %v2322_v18 = vshll.u32 %v5443_v52, 16  ;;  %v2328_v21 = vshll.u32 %v7254_v60, 16 }
  0x55   : > { %v5492_v26 = vcombine.low %v2307_v15, %v2317_v16  ;;  %v427_v29 = vrot.slane %v426_v10, 4  ;;  %v436_v30 = vor.u32 %v435_v11, %v431_v9  ;;  %v441_v34 = vrot.slane %v439_v12, 5 }
  0x56   : > { %6060 = vmatprep.mubr.bf16.mxu1 %v5252_v2  ;;  %v2321_v38 = vrot.slane %v2319_v13, 4  ;;  %v2324_v39 = vrot.slane %v2322_v18, 5  ;;  %v2330_v40 = vrot.slane %v2328_v21, 5  ;;  %v2332_v42 = vshrl.u32 %v7254_v60, 16  ;;  %v7297_v21 = vld [vmem:[%s7011_s11 + $0x70] sm:$0xf] }
  0x57   : > { %6252 = vmatprep.mubr.bf16.mxu0 %v5492_v26  ;;  %v432_v31 = vsel %vm7043_vm2, %v427_v29, %v431_v9  ;;  %v437_v44 = vrot.slane %v436_v30, 4  ;;  %v2338_v47 = vshll.u32 %v7263_v17, 16  ;;  %v444_v49 = vshrl.u32 %v7267_v25, 16  ;;  %v6863_v9 = vld [vmem:[%s7011_s11 + $0xb4] sm:$0xff]  }
  0x58   : > { %v2325_v52 = vor.u32 %v2324_v39, %v2321_v38  ;;  %v2334_v53 = vrot.slane %v2332_v42, 4  ;;  %v447_v54 = vshll.u32 %v7267_v25, 16  ;;  %v453_v55 = vshll.u32 %v7270_v35, 16 }
  0x59   : > { %v442_v48 = vsel %vm7043_vm2, %v437_v44, %v441_v34  ;;  %v2340_v56 = vrot.slane %v2338_v47, 5  ;;  %v446_v57 = vrot.slane %v444_v49, 4  ;;  %v457_v58 = vshrl.u32 %v7270_v35, 16  ;;  %v7308_v47 = vld [vmem:[%s7011_s11 + $0x78] sm:$0xf] }
  0x5a   : > { %v5253_v59 = vcombine.low %v432_v31, %v442_v48  ;;  %v2326_v61 = vrot.slane %v2325_v52, 4  ;;  %v2335_v63 = vor.u32 %v2334_v53, %v2330_v40  ;;  %v449_v1 = vrot.slane %v447_v54, 5  ;;  %v7319_v54 = vld [vmem:[%s7011_s11 + $0x7c] sm:$0xf] }
  0x5b   : > { %v455_v2 = vrot.slane %v453_v55, 5  ;;  %v459_v3 = vrot.slane %v457_v58, 4  ;;  %v463_v7 = vshll.u32 %v240_v43, 16  ;;  %v5526_v10 = vrot.slane %v5510_v50, 9  ;;  %v242_v58 = vld [vmem:[%s7011_s11 + $0x80] sm:$0x1] }
  0x5c   : > { %6061 = vmatmul.mubr.bf16.gmra.mrb[12].mxu1 %v5253_v59  ;;  %v2331_v11 = vsel %vm7043_vm2, %v2326_v61, %v2330_v40  ;;  %v2336_v12 = vrot.slane %v2335_v63, 4  ;;  %v450_v13 = vor.u32 %v449_v1, %v446_v57  ;;  %v2922_v15 = vrot.slane %v7024_v23, 5  ;;  %v241_v40 = vld [vmem:[%s7011_s11 + $0x74] sm:$0x1]  ;;  %v5511_v23 = vld [vmem:[%s7011_s11 + $0x18] sm:$0xe] }
  0x5d   : > { %v460_v16 = vor.u32 %v459_v3, %v455_v2  ;;  %v465_v18 = vrot.slane %v463_v7, 5  ;;  %v468_v26 = vshrl.u32 %v7285_v5, 16  ;;  %v471_v29 = vshll.u32 %v7285_v5, 16 }
  0x5e   : > { %v2341_v30 = vsel %vm7043_vm2, %v2336_v12, %v2340_v56  ;;  %v451_v34 = vrot.slane %v450_v13, 4  ;;  %v2923_v38 = vsel %vm7289_vm5, %v5526_v10, %v2922_v15  ;;  %v2924_v39 = vrot.slane %v2922_v15, 4  ;;  %v5512_v13 = vld [vmem:[%s7011_s11 + $0x24] sm:$0xe] }
  0x5f   : > { %v5493_v42 = vcombine.low %v2331_v11, %v2341_v30  ;;  %v461_v43 = vrot.slane %v460_v16, 4  ;;  %v470_v31 = vrot.slane %v468_v26, 4  ;;  %v473_v44 = vrot.slane %v471_v29, 5  ;;  %v7341_v16 = vld [vmem:[%s7011_s11 + $0x84] sm:$0xf]  ;;  %v6776_v29 = vld [vmem:[%s8800_s1 + $0x188] sm:$0xff]  }
  0x60   : > { %v456_v49 = vsel %vm7043_vm2, %v451_v34, %v455_v2  ;;  %v2926_v50 = vsel %vm7289_vm5, %v2924_v39, %v2925_v41  ;;  %v477_v52 = vshll.u32 %v7297_v21, 16  ;;  %v481_v53 = vshrl.u32 %v7297_v21, 16 }
  0x61   : > { %6253 = vmatmul.mubr.bf16.gmra.mrb[12].mxu0 %v5493_v42  ;;  %v466_v55 = vsel %vm7043_vm2, %v461_v43, %v465_v18  ;;  %v5558_v48 = vcombine.low %v2923_v38, %v2926_v50  ;;  %v474_v56 = vor.u32 %v473_v44, %v470_v31  ;;  %v487_v57 = vshll.u32 %v241_v40, 16  ;;  %v7349_v40 = vld [vmem:[%s7011_s11 + $0x88] sm:$0xf]  ;;  %v243_v31 = vld [vmem:[%s7011_s11 + $0x8c] sm:$0x1] }
  0x62   : > { %v5254_v59 = vcombine.low %v456_v49, %v466_v55  ;;  %v479_v24 = vrot.slane %v477_v52, 5  ;;  %v483_v61 = vrot.slane %v481_v53, 4  ;;  %v5527_v63 = vrot.slane %v5511_v23, 9 }
  0x63   : > { %6288 = vmatprep.mubr.bf16.mxu0 %v5558_v48  ;;  %v475_v41 = vrot.slane %v474_v56, 4  ;;  %v489_v1 = vrot.slane %v487_v57, 5  ;;  %v2933_v2 = vsel %vm7289_vm5, %v7092_v36, %v2932_v32  ;;  %v492_v3 = vshrl.u32 %v7308_v47, 16 }
  0x64   : > { %6064 = vmatprep.mubr.bf16.mxu1 %v5254_v59  ;;  %v484_v7 = vor.u32 %v483_v61, %v479_v24  ;;  %v2930_v10 = vsel %vm7289_vm5, %v5527_v63, %v2929_v27  ;;  %v495_v11 = vshll.u32 %v7308_v47, 16  ;;  %v501_v12 = vshll.u32 %v7319_v54, 16 }
  0x65   : > { %v480_v8 = vsel %vm7043_vm2, %v475_v41, %v479_v24  ;;  %v5559_v15 = vcombine.low %v2930_v10, %v2933_v2  ;;  %v494_v32 = vrot.slane %v492_v3, 4  ;;  %v505_v36 = vshrl.u32 %v7319_v54, 16  ;;  %v7370_v2 = vld [vmem:[%s7011_s11 + $0x90] sm:$0xf]  ;;  %v7373_v3 = vld [vmem:[%s7011_s11 + $0x94] sm:$0xf] }
  0x66   : > { %v485_v62 = vrot.slane %v484_v7, 4  ;;  %v497_v18 = vrot.slane %v495_v11, 5  ;;  %v503_v26 = vrot.slane %v501_v12, 5  ;;  %v511_v27 = vshll.u32 %v242_v58, 16 }
  0x67   : > { %v507_v30 = vrot.slane %v505_v36, 4  ;;  %v5528_v34 = vrot.slane %v5512_v13, 9  ;;  %v2936_v38 = vrot.slane %v7096_v45, 5  ;;  %v2939_v39 = vrot.slane %v7102_v51, 5  ;;  %v5513_v45 = vld [vmem:[%s7011_s11 + $0x30] sm:$0xe] }
  0x68   : > { %v490_v23 = vsel %vm7043_vm2, %v485_v62, %v489_v1  ;;  %v498_v42 = vor.u32 %v497_v18, %v494_v32  ;;  %v513_v43 = vrot.slane %v511_v27, 5  ;;  %v516_v44 = vshrl.u32 %v7341_v16, 16  ;;  %v244_v62 = vld [vmem:[%s7011_s11 + $0x98] sm:$0x1] }
  0x69   : > { %v5255_v49 = vcombine.low %v480_v8, %v490_v23  ;;  %6289 = vmatmul.mubr.bf16.vlgmr.msra.gmra.mrb[0].mxu0 %v5559_v15  ;;  %v508_v50 = vor.u32 %v507_v30, %v503_v26  ;;  %v2937_v52 = vsel %vm7289_vm5, %v5528_v34, %v2936_v38  ;;  %v2938_v53 = vrot.slane %v2936_v38, 4  ;;  %v6780_v30 = vld [vmem:[%s8800_s1 + $0x198] sm:$0xff]  }
  0x6a   : > { %6321 = vmatpush3.bf16.msra.mxu0 %v7232_v6  ;;  %v499_v51 = vrot.slane %v498_v42, 4  ;;  %v518_v55 = vrot.slane %v516_v44, 4  ;;  %v519_v48 = vshll.u32 %v7341_v16, 16  ;;  %v525_v56 = vshll.u32 %v7349_v40, 16  ;;  %v6778_v6 = vld [vmem:[%s8800_s1 + $0x190] sm:$0xff]  }
  0x6b   : > { %6065 = vmatmul.mubr.bf16.gmra.mrb[16].mxu1 %v5255_v49  ;;  %v509_v57 = vrot.slane %v508_v50, 4  ;;  %v2940_v58 = vsel %vm7289_vm5, %v2938_v53, %v2939_v39  ;;  %v529_v59 = vshrl.u32 %v7349_v40, 16  ;;  %v535_v24 = vshll.u32 %v243_v31, 16  ;;  %6322 = vmatprep.subr.bf16.mxu0 %v6776_v29  ;;  %v5514_v38 = vld [vmem:[%s7011_s11 + $0x3c] sm:$0xe] }
  0x6c   : > { %v504_v61 = vsel %vm7043_vm2, %v499_v51, %v503_v26  ;;  %v5560_v63 = vcombine.low %v2937_v52, %v2940_v58  ;;  %v521_v41 = vrot.slane %v519_v48, 5  ;;  %v527_v1 = vrot.slane %v525_v56, 5  ;;  %v7391_v31 = vld [vmem:[%s7011_s11 + $0x9c] sm:$0xf]  ;;  %v7400_v48 = vld [vmem:[%s7011_s11 + $0xa0] sm:$0xf] }
  0x6d   : > { %v514_v7 = vsel %vm7043_vm2, %v509_v57, %v513_v43  ;;  %v531_v10 = vrot.slane %v529_v59, 4  ;;  %v537_v11 = vrot.slane %v535_v24, 5  ;;  %v5529_v12 = vrot.slane %v5513_v45, 9  ;;  %v6784_v56 = vld [vmem:[%s8800_s1 + $0x1a0] sm:$0xff]  }
  0x6e   : > { %v5256_v13 = vcombine.low %v504_v61, %v514_v7  ;;  %6292 = vmatprep.mubr.bf16.mxu0 %v5560_v63  ;;  %v522_v8 = vor.u32 %v521_v41, %v518_v55  ;;  %v2943_v15 = vrot.slane %v7127_v33, 5  ;;  %v2946_v32 = vrot.slane %v7138_v46, 5  ;;  %6323 = vmatpush3.bf16.msra.mxu0 %v6776_v29  ;;  %v245_v61 = vld [vmem:[%s7011_s11 + $0xa4] sm:$0x1] }
  0x6f   : > { %v532_v36 = vor.u32 %v531_v10, %v527_v1  ;;  %v540_v18 = vshrl.u32 %v7370_v2, 16  ;;  %v543_v26 = vshll.u32 %v7370_v2, 16  ;;  %v549_v27 = vshll.u32 %v7373_v3, 16  ;;  %6324 = vmatprep.subr.bf16.mxu0 %v6778_v6 }
  0x70   : > { %6068 = vmatprep.mubr.bf16.mxu1 %v5256_v13  ;;  %v523_v34 = vrot.slane %v522_v8, 4  ;;  %v2944_v33 = vsel %vm7289_vm5, %v5529_v12, %v2943_v15  ;;  %v2945_v46 = vrot.slane %v2943_v15, 4  ;;  %v553_v29 = vshrl.u32 %v7373_v3, 16  ;;  %v5515_v15 = vld [vmem:[%s7011_s11 + $0x48] sm:$0xe] }
  0x71   : > { %v533_v39 = vrot.slane %v532_v36, 4  ;;  %v542_v23 = vrot.slane %v540_v18, 4  ;;  %v545_v42 = vrot.slane %v543_v26, 5  ;;  %v551_v43 = vrot.slane %v549_v27, 5  ;;  %v7425_v27 = vld [vmem:[%s7011_s11 + $0xa8] sm:$0xf] }
  0x72   : > { %v528_v44 = vsel %vm7043_vm2, %v523_v34, %v527_v1  ;;  %v2947_v49 = vsel %vm7289_vm5, %v2945_v46, %v2946_v32  ;;  %v555_v50 = vrot.slane %v553_v29, 4  ;;  %v559_v52 = vshll.u32 %v244_v62, 16  ;;  %6325 = vmatpush3.bf16.msra.mxu0 %v6778_v6  ;;  %v6788_v32 = vld [vmem:[%s8800_s1 + $0x1a8] sm:$0xff]  }
  0x73   : > { %v538_v53 = vsel %vm7043_vm2, %v533_v39, %v537_v11  ;;  %v5561_v45 = vcombine.low %v2944_v33, %v2947_v49  ;;  %v546_v51 = vor.u32 %v545_v42, %v542_v23  ;;  %v5530_v55 = vrot.slane %v5514_v38, 9  ;;  %6326 = vmatprep.subr.bf16.mxu0 %v6780_v30  ;;  %v7428_v29 = vld [vmem:[%s7011_s11 + $0xac] sm:$0xf] }
  0x74   : > { %v5257_v57 = vcombine.low %v528_v44, %v538_v53  ;;  %v556_v58 = vor.u32 %v555_v50, %v551_v43  ;;  %v561_v59 = vrot.slane %v559_v52, 5  ;;  %v2950_v24 = vrot.slane %v7161_v19, 5  ;;  %v5516_v53 = vld [vmem:[%s7011_s11 + $0x54] sm:$0xe] }
  0x75   : > { %6293 = vmatmul.mubr.bf16.gmra.mrb[4].mxu0 %v5561_v45  ;;  %v547_v6 = vrot.slane %v546_v51, 4  ;;  %v2953_v63 = vrot.slane %v7169_v28, 5  ;;  %v564_v41 = vshrl.u32 %v7391_v31, 16  ;;  %v567_v1 = vshll.u32 %v7391_v31, 16  ;;  %v6792_v45 = vld [vmem:[%s8800_s1 + $0x1b0] sm:$0xff]  }
  0x76   : > { %6069 = vmatmul.mubr.bf16.gmra.mrb[20].mxu1 %v5257_v57  ;;  %v557_v7 = vrot.slane %v556_v58, 4  ;;  %v2951_v10 = vsel %vm7289_vm5, %v5530_v55, %v2950_v24  ;;  %v2952_v11 = vrot.slane %v2950_v24, 4  ;;  %v573_v12 = vshll.u32 %v7400_v48, 16  ;;  %6327 = vmatpush3.bf16.msra.mxu0 %v6780_v30 }
  0x77   : > { %v552_v19 = vsel %vm7043_vm2, %v547_v6, %v551_v43  ;;  %v566_v13 = vrot.slane %v564_v41, 4  ;;  %v569_v28 = vrot.slane %v567_v1, 5  ;;  %v577_v8 = vshrl.u32 %v7400_v48, 16  ;;  %6328 = vmatprep.subr.bf16.mxu0 %v6784_v56  ;;  %v246_v43 = vld [vmem:[%s7011_s11 + $0xb0] sm:$0x1] }
  0x78   : > { %v562_v36 = vsel %vm7043_vm2, %v557_v7, %v561_v59  ;;  %v2954_v62 = vsel %vm7289_vm5, %v2952_v11, %v2953_v63  ;;  %v575_v18 = vrot.slane %v573_v12, 5  ;;  %v583_v26 = vshll.u32 %v245_v61, 16  ;;  %v7448_v41 = vld [vmem:[%s7011_s11 + $0xb4] sm:$0xf]  ;;  %v7453_v12 = vld [vmem:[%s7011_s11 + $0xb8] sm:$0xf] }
  0x79   : > { %v5258_v30 = vcombine.low %v552_v19, %v562_v36  ;;  %v5562_v34 = vcombine.low %v2951_v10, %v2954_v62  ;;  %v570_v33 = vor.u32 %v569_v28, %v566_v13  ;;  %v579_v46 = vrot.slane %v577_v8, 4  ;;  %v247_v19 = vld [vmem:[%s7011_s11 + $0xbc] sm:$0x1] }
  0x7a   : > { %v585_v38 = vrot.slane %v583_v26, 5  ;;  %v5531_v39 = vrot.slane %v5515_v15, 9  ;;  %v2957_v23 = vrot.slane %v7196_v14, 5  ;;  %v2960_v42 = vrot.slane %v7202_v22, 5  ;;  %6329 = vmatpush3.bf16.msra.mxu0 %v6784_v56  ;;  %v6796_v13 = vld [vmem:[%s8800_s1 + $0x1b8] sm:$0xff]  }
  0x7b   : > { %6072 = vmatprep.mubr.bf16.mxu1 %v5258_v30  ;;  %6296 = vmatprep.mubr.bf16.mxu0 %v5562_v34  ;;  %v571_v44 = vrot.slane %v570_v33, 4  ;;  %v580_v49 = vor.u32 %v579_v46, %v575_v18  ;;  %v588_v50 = vshrl.u32 %v7425_v27, 16  ;;  %v591_v52 = vshll.u32 %v7425_v27, 16  ;;  %v5517_v30 = vld [vmem:[%s7011_s11 + $0x60] sm:$0xe] }
  0x7c   : > { %v2958_v14 = vsel %vm7289_vm5, %v5531_v39, %v2957_v23  ;;  %v2959_v22 = vrot.slane %v2957_v23, 4  ;;  %v597_v51 = vshll.u32 %v7428_v29, 16  ;;  %v601_v55 = vshrl.u32 %v7428_v29, 16  ;;  %6330 = vmatprep.subr.bf16.mxu0 %v6788_v32  ;;  %v5447_v39 = vld [vmem:[%s7011_s11 + $0x70] sm:$0xf] }
  0x7d   : > { %v576_v56 = vsel %vm7043_vm2, %v571_v44, %v575_v18  ;;  %v581_v57 = vrot.slane %v580_v49, 4  ;;  %v590_v58 = vrot.slane %v588_v50, 4  ;;  %v593_v59 = vrot.slane %v591_v52, 5  ;;  %v7475_v44 = vld [vmem:[%s8800_s1 + $0x1c0] sm:$0xff]  }
  0x7e   : > { %v2961_v24 = vsel %vm7289_vm5, %v2959_v22, %v2960_v42  ;;  %v599_v61 = vrot.slane %v597_v51, 5  ;;  %v603_v6 = vrot.slane %v601_v55, 4  ;;  %v607_v63 = vshll.u32 %v246_v43, 16  ;;  %6331 = vmatpush3.bf16.msra.mxu0 %v6788_v32  ;;  %v5518_v43 = vld [vmem:[%s7011_s11 + $0x6c] sm:$0xe] }
  0x7f   : > { %v586_v1 = vsel %vm7043_vm2, %v581_v57, %v585_v38  ;;  %v5563_v7 = vcombine.low %v2958_v14, %v2961_v24  ;;  %v594_v10 = vor.u32 %v593_v59, %v590_v58  ;;  %v5532_v11 = vrot.slane %v5516_v53, 9  ;;  %6332 = vmatprep.subr.bf16.mxu0 %v6792_v45  ;;  %v5448_v55 = vld [vmem:[%s7011_s11 + $0x74] sm:$0x1]  ;;  %v5519_v24 = vld [vmem:[%s7011_s11 + $0x78] sm:$0xe] }
  0x80   : > { %v5259_v28 = vcombine.low %v576_v56, %v586_v1  ;;  %v604_v8 = vor.u32 %v603_v6, %v599_v61  ;;  %v609_v15 = vrot.slane %v607_v63, 5  ;;  %v2964_v32 = vrot.slane %v7227_v0, 5 }
  0x81   : > { %6297 = vmatmul.mubr.bf16.gmra.mrb[8].mxu0 %v5563_v7  ;;  %v595_v36 = vrot.slane %v594_v10, 4  ;;  %v2967_v62 = vrot.slane %v7239_v20, 5  ;;  %v612_v18 = vshrl.u32 %v7448_v41, 16  ;;  %v615_v26 = vshll.u32 %v7448_v41, 16 }
  0x82   : > { %6073 = vmatmul.mubr.bf16.gmra.mrb[24].mxu1 %v5259_v28  ;;  %v605_v34 = vrot.slane %v604_v8, 4  ;;  %v2965_v33 = vsel %vm7289_vm5, %v5532_v11, %v2964_v32  ;;  %v2966_v46 = vrot.slane %v2964_v32, 4  ;;  %v621_v38 = vshll.u32 %v7453_v12, 16  ;;  %6333 = vmatpush3.bf16.msra.mxu0 %v6792_v45  ;;  %v7488_v11 = vld [vmem:[%s7011_s11 + $0x7c] sm:$0xf] }
  0x83   : > { %v600_v0 = vsel %vm7043_vm2, %v595_v36, %v599_v61  ;;  %v614_v20 = vrot.slane %v612_v18, 4  ;;  %v617_v23 = vrot.slane %v615_v26, 5  ;;  %v625_v42 = vshrl.u32 %v7453_v12, 16  ;;  %6334 = vmatprep.subr.bf16.mxu0 %v6796_v13  ;;  %v6865_v36 = vld [vmem:[%s7011_s11] sm:$0xf] }
  0x84   : > { %v610_v49 = vsel %vm7043_vm2, %v605_v34, %v609_v15  ;;  %v2968_v50 = vsel %vm7289_vm5, %v2966_v46, %v2967_v62  ;;  %v623_v52 = vrot.slane %v621_v38, 5  ;;  %v631_v53 = vshll.u32 %v247_v19, 16  ;;  %v5453_v15 = vld [vmem:[%s7011_s11 + $0x88] sm:$0xf]  ;;  %v7503_v62 = vld [vmem:[%s7011_s11 + $0x4] sm:$0xf] }
  0x85   : > { %v5260_v45 = vcombine.low %v600_v0, %v610_v49  ;;  %v5564_v14 = vcombine.low %v2965_v33, %v2968_v50  ;;  %v618_v22 = vor.u32 %v617_v23, %v614_v20  ;;  %v627_v51 = vrot.slane %v625_v42, 4  ;;  %v5454_v26 = vld [vmem:[%s7011_s11 + $0x8c] sm:$0x1]  ;;  %v5457_v23 = vld [vmem:[%s7011_s11 + $0x98] sm:$0x1] }
  0x86   : > { %v633_v56 = vrot.slane %v631_v53, 5  ;;  %v5533_v57 = vrot.slane %v5517_v30, 9  ;;  %v2971_v58 = vrot.slane %v7254_v60, 5  ;;  %v2974_v59 = vrot.slane %v7263_v17, 5  ;;  %6335 = vmatpush3.bf16.msra.mxu0 %v6796_v13  ;;  %v7491_v17 = vld [vmem:[%s7011_s11 + $0x80] sm:$0x1] }
  0x87   : > { %6076 = vmatprep.mubr.bf16.mxu1 %v5260_v45  ;;  %6300 = vmatprep.mubr.bf16.mxu0 %v5564_v14  ;;  %v619_v61 = vrot.slane %v618_v22, 4  ;;  %v628_v6 = vor.u32 %v627_v51, %v623_v52  ;;  %v5534_v63 = vrot.slane %v5518_v43, 9  ;;  %v2978_v1 = vrot.slane %v5447_v39, 5  ;;  %v5520_v30 = vld [vmem:[%s7011_s11 + $0x84] sm:$0xe] }
  0x88   : > { %v2972_v7 = vsel %vm7289_vm5, %v5533_v57, %v2971_v58  ;;  %v2973_v10 = vrot.slane %v2971_v58, 4  ;;  %v2981_v60 = vrot.slane %v5448_v55, 5  ;;  %6368 = vmatprep.subr.bf16.mxu0 %v7475_v44  ;;  %v5270_v18 = vcombine.low %v6865_v36, %v7503_v62  ;;  %v5456_v39 = vld [vmem:[%s7011_s11 + $0x94] sm:$0xf]  ;;  %v5521_v42 = vld [vmem:[%s7011_s11 + $0x90] sm:$0xe] }
  0x89   : > { %v624_v19 = vsel %vm7043_vm2, %v619_v61, %v623_v52  ;;  %v629_v13 = vrot.slane %v628_v6, 4  ;;  %v2979_v28 = vsel %vm7289_vm5, %v5534_v63, %v2978_v1  ;;  %v2980_v8 = vrot.slane %v2978_v1, 4  ;;  %v5522_v50 = vld [vmem:[%s7011_s11 + $0x9c] sm:$0xe]  ;;  %v5459_v14 = vld [vmem:[%s7011_s11 + $0xa0] sm:$0xf] }
  0x8a   : > { %v2975_v32 = vsel %vm7289_vm5, %v2973_v10, %v2974_v59  ;;  %v5535_v38 = vrot.slane %v5519_v24, 9  ;;  %v2985_v43 = vrot.slane %v7488_v11, 5  ;;  %v2988_v49 = vrot.slane %v7491_v17, 5  ;;  %v5460_v22 = vld [vmem:[%s7011_s11 + $0xa4] sm:$0x1] }
  0x8b   : > { %v634_v34 = vsel %vm7043_vm2, %v629_v13, %v633_v56  ;;  %v5565_v33 = vcombine.low %v2972_v7, %v2975_v32  ;;  %v2982_v46 = vsel %vm7289_vm5, %v2980_v8, %v2981_v60  ;;  %v5536_v52 = vrot.slane %v5520_v30, 9  ;;  %v5462_v59 = vld [vmem:[%s7011_s11 + $0xac] sm:$0xf]  ;;  %v7527_v61 = vld [vmem:[%s7011_s11 + $0x10] sm:$0xf] }
  0x8c   : > { %v5261_v0 = vcombine.low %v624_v19, %v634_v34  ;;  %v5566_v20 = vcombine.low %v2979_v28, %v2982_v46  ;;  %v2992_v53 = vrot.slane %v5453_v15, 5  ;;  %v2995_v45 = vrot.slane %v5454_v26, 5  ;;  %v6867_v24 = vld [vmem:[%s7011_s11 + $0xc] sm:$0xf]  ;;  %v6869_v8 = vld [vmem:[%s7011_s11 + $0x18] sm:$0xf] }
  0x8d   : > { %6301 = vmatmul.mubr.bf16.gmra.mrb[12].mxu0 %v5565_v33  ;;  %v2986_v51 = vsel %vm7289_vm5, %v5535_v38, %v2985_v43  ;;  %v2987_v55 = vrot.slane %v2985_v43, 4  ;;  %v2999_v58 = vrot.slane %v5456_v39, 5  ;;  %v5271_v6 = vcombine.low %v6867_v24, %v7527_v61  ;;  %v6787_v19 = vld [vmem:[%s8800_s1 + $0x88] sm:$0xff]   ;;  %v7539_v15 = vld [vmem:[%s7011_s11 + $0x1c] sm:$0xf] }
  0x8e   : > { %6077 = vmatmul.mubr.bf16.gmra.mrb[28].mxu1 %v5261_v0  ;;  %6304 = vmatprep.mubr.bf16.mxu0 %v5566_v20  ;;  %v2993_v56 = vsel %vm7289_vm5, %v5536_v52, %v2992_v53  ;;  %v2994_v57 = vrot.slane %v2992_v53, 4  ;;  %v5537_v1 = vrot.slane %v5521_v42, 9  ;;  %v3002_v7 = vrot.slane %v5457_v23, 5  ;;  %v5463_v30 = vld [vmem:[%s7011_s11 + $0xb0] sm:$0x1] }
  0x8f   : > { %6096 = vmatprep.mubr.bf16.mxu1 %v5270_v18  ;;  %v2989_v63 = vsel %vm7289_vm5, %v2987_v55, %v2988_v49  ;;  %v3001_v13 = vrot.slane %v2999_v58, 4  ;;  %v5538_v28 = vrot.slane %v5522_v50, 9  ;;  %v5272_v32 = vcombine.low %v6869_v8, %v7539_v15  ;;  %v5523_v34 = vld [vmem:[%s7011_s11 + $0xa8] sm:$0xe]  ;;  %v5465_v33 = vld [vmem:[%s7011_s11 + $0xb8] sm:$0xf] }
  0x90   : > { %v5567_v10 = vcombine.low %v2986_v51, %v2989_v63  ;;  %v2996_v60 = vsel %vm7289_vm5, %v2994_v57, %v2995_v45  ;;  %v3006_v18 = vrot.slane %v5459_v14, 5  ;;  %v3009_v26 = vrot.slane %v5460_v22, 5  ;;  %v5466_v20 = vld [vmem:[%s7011_s11 + $0xbc] sm:$0x1]  ;;  %v5524_v23 = vld [vmem:[%s7011_s11 + $0xb4] sm:$0xe] }
  0x91   : > { %v5568_v36 = vcombine.low %v2993_v56, %v2996_v60  ;;  %v3013_v38 = vrot.slane %v5462_v59, 5  ;;  %v3000_v39 = vsel %vm7289_vm5, %v5537_v1, %v2999_v58  ;;  %v3003_v0 = vsel %vm7289_vm5, %v3001_v13, %v3002_v7  ;;  %v6791_v50 = vld [vmem:[%s8800_s1 + $0x90] sm:$0xff]   ;;  %v5468_v53 = vld [vmem:[%s7011_s11 + $0xc4] sm:$0xf]  ;;  %v7562_v51 = vld [vmem:[%s7011_s11 + $0x28] sm:$0xf] }
  0x92   : > { %v3008_v46 = vrot.slane %v3006_v18, 4  ;;  %v3007_v42 = vsel %vm7289_vm5, %v5538_v28, %v3006_v18  ;;  %v3020_v49 = vrot.slane %v5465_v33, 5  ;;  %v5539_v52 = vrot.slane %v5523_v34, 9  ;;  %v6871_v22 = vld [vmem:[%s7011_s11 + $0x24] sm:$0xf]  ;;  %v6795_v1 = vld [vmem:[%s8800_s1 + $0x98] sm:$0xff]  }
  0x93   : > { %v5569_v45 = vcombine.low %v3000_v39, %v3003_v0  ;;  %v3015_v14 = vrot.slane %v3013_v38, 4  ;;  %v5273_v55 = vcombine.low %v6871_v22, %v7562_v51  ;;  %v6873_v57 = vld [vmem:[%s7011_s11 + $0x30] sm:$0xf]  ;;  %v7567_v58 = vld [vmem:[%s7011_s11 + $0x34] sm:$0xf]  ;;  %v5540_v24 = vrot.slane %v5524_v23, 9 }
  0x94   : > { %v3010_v43 = vsel %vm7289_vm5, %v3008_v46, %v3009_v26  ;;  %v5274_v59 = vcombine.low %v6873_v57, %v7567_v58  ;;  %v3023_v63 = vrot.slane %v5466_v20, 5  ;;  %v5525_v7 = vld [vmem:[%s7011_s11 + $0xc0] sm:$0xe]  ;;  %v3014_v60 = vsel %vm7289_vm5, %v5539_v52, %v3013_v38  ;;  %v5469_v8 = vld [vmem:[%s7011_s11 + $0xc8] sm:$0x1]  ;;  %v6798_v22 = vld [vmem:[%s7011_s11 + $0x18] sm:$0xff]  }
  0x95   : > { %6305 = vmatmul.mubr.bf16.gmra.mrb[16].mxu0 %v5567_v10  ;;  %v5570_v56 = vcombine.low %v3007_v42, %v3010_v43  ;;  %v3027_v10 = vrot.slane %v5468_v53, 5  ;;  %v3021_v13 = vsel %vm7289_vm5, %v5540_v24, %v3020_v49  ;;  %v5541_v18 = vrot.slane %v5525_v7, 9  ;;  %v6875_v26 = vld [vmem:[%s7011_s11 + $0x3c] sm:$0xf]  ;;  %v6877_v39 = vld [vmem:[%s7011_s11 + $0x48] sm:$0xf] }
  0x96   : > { %6097 = vmatmul.mubr.bf16.vlgmr.msra.gmra.mrb[0].mxu1 %v5271_v6  ;;  %6308 = vmatprep.mubr.bf16.mxu0 %v5568_v36  ;;  %v3022_v6 = vrot.slane %v3020_v49, 4  ;;  %v3030_v38 = vrot.slane %v5469_v8, 5  ;;  %v7593_v0 = vld [vmem:[%s7011_s11 + $0x4c] sm:$0xf]  ;;  %v6812_v49 = vld [vmem:[%s8800_s1 + $0xb0] sm:$0xff]   ;;  %v2380_v52 = vshrl.u32 %v7488_v11, 16 }
  0x97   : > { %6129 = vmatpush3.bf16.msra.mxu1 %v7213_v4  ;;  %6100 = vmatprep.mubr.bf16.mxu1 %v5272_v32  ;;  %v3016_v4 = vrot.slane %v5463_v30, 5  ;;  %v6800_v32 = vld [vmem:[%s8800_s1 + $0xa0] sm:$0xff]   ;;  %v3029_v46 = vrot.slane %v3027_v10, 4  ;;  %v5276_v20 = vcombine.low %v6877_v39, %v7593_v0  ;;  %v6806_v23 = vld [vmem:[%s8800_s1 + $0xa8] sm:$0xff]   ;;  %v3028_v42 = vsel %vm7289_vm5, %v5541_v18, %v3027_v10  ;;  %v6804_v18 = vld [vmem:[%s7011_s11 + $0x30] sm:$0xff]  }
  0x98   : > { %6130 = vmatprep.subr.bf16.mxu1 %v6787_v19  ;;  %v3024_v28 = vsel %vm7289_vm5, %v3022_v6, %v3023_v63  ;;  %v7588_v30 = vld [vmem:[%s7011_s11 + $0x40] sm:$0xf]  ;;  %v7621_v57 = vrot.slane %v2380_v52, 4  ;;  %v6801_v6 = vld [vmem:[%s7011_s11 + $0x24] sm:$0xff]   ;;  %v1290_v7 = vrot.slane %v7527_v61, 5  ;;  %v2386_v8 = vshll.u32 %v7491_v17, 16 }
  0x99   : > { %v5275_v34 = vcombine.low %v6875_v26, %v7588_v30  ;;  %v5572_v33 = vcombine.low %v3021_v13, %v3024_v28  ;;  %v3031_v43 = vsel %vm7289_vm5, %v3029_v46, %v3030_v38  ;;  %v1230_v63 = vld [vmem:[%s7011_s11] sm:$0xe]  ;;  %v1231_v10 = vld [vmem:[%s7011_s11 + $0xc] sm:$0xe]  ;;  %v1297_v13 = vrot.slane %v7539_v15, 5 }
  0x9a   : > { %v5573_v53 = vcombine.low %v3028_v42, %v3031_v43  ;;  %v1233_v61 = vld [vmem:[%s7011_s11 + $0x24] sm:$0xe]  ;;  %v5281_v15 = vcombine.low %v7341_v16, %v7349_v40  ;;  %v5282_v26 = vcombine.low %v7370_v2, %v7373_v3  ;;  %v5294_v17 = vrot.slane %v1230_v63, 9  ;;  %v6883_v38 = vld [vmem:[%s7011_s11 + $0x20] sm:$0x1]  ;;  %v6813_v2 = vld [vmem:[%s7011_s11 + $0x54] sm:$0xff]  }
  0x9b   : > { %6131 = vmatpush3.bf16.msra.mxu1 %v6787_v19  ;;  %v3017_v19 = vsel %vm7289_vm5, %v3015_v14, %v3016_v4  ;;  %v7610_v14 = vld [vmem:[%s7011_s11 + $0x58] sm:$0xf]  ;;  %v1299_v46 = vrot.slane %v1297_v13, 4  ;;  %v1300_v39 = vrot.slane %v6883_v38, 5  ;;  %v6884_v43 = vld [vmem:[%s7011_s11 + $0x2c] sm:$0x1] }
  0x9c   : > { %6132 = vmatprep.subr.bf16.mxu1 %v6791_v50  ;;  %v5571_v36 = vcombine.low %v3014_v60, %v3017_v19  ;;  %v7636_v60 = vld [vmem:[%s8800_s1 + $0xc0] sm:$0xff]   ;;  %v1232_v19 = vld [vmem:[%s7011_s11 + $0x18] sm:$0xe]  ;;  %v6887_v38 = vld [vmem:[%s7011_s11 + $0x50] sm:$0x1]  ;;  %v1332_v16 = vrot.slane %v7610_v14, 5 }
  0x9d   : > { %6309 = vmatmul.mubr.bf16.gmra.mrb[20].mxu0 %v5569_v45  ;;  %v6879_v45 = vld [vmem:[%s7011_s11 + $0x54] sm:$0xf]  ;;  %v7759_v40 = vld [vmem:[%s7011_s11 + $0x64] sm:$0xf] }
  0x9e   : > { %6101 = vmatmul.mubr.bf16.gmra.mrb[4].mxu1 %v5273_v55  ;;  %6312 = vmatprep.mubr.bf16.mxu0 %v5570_v56  ;;  %v5277_v4 = vcombine.low %v6879_v45, %v7610_v14  ;;  %v5278_v55 = vcombine.low %v7267_v25, %v7270_v35  ;;  %v6818_v56 = vld [vmem:[%s8800_s1 + $0xb8] sm:$0xff]   ;;  %v6882_v25 = vld [vmem:[%s7011_s11 + $0x14] sm:$0x1]  ;;  %v6816_v3 = vld [vmem:[%s7011_s11 + $0x60] sm:$0xff]  }
  0x9f   : > { %6104 = vmatprep.mubr.bf16.mxu1 %v5274_v59  ;;  %6133 = vmatpush3.bf16.msra.mxu1 %v6791_v50  ;;  %v2376_v50 = vshll.u32 %v7488_v11, 16  ;;  %v7624_v59 = vld [vmem:[%s7011_s11 + $0x8] sm:$0x1]  ;;  %v1293_v35 = vrot.slane %v6882_v25, 5 }
  0xa0   : > { %6134 = vmatprep.subr.bf16.mxu1 %v6795_v1  ;;  %v1286_v24 = vrot.slane %v7624_v59, 5 }
  0xa1   : > { %v7619_v11 = vrot.slane %v2376_v50, 5 }
  0xa3   : > { %6135 = vmatpush3.bf16.msra.mxu1 %v6795_v1  ;;  %v1283_v1 = vrot.slane %v7503_v62, 5  ;;  %v5279_v62 = vcombine.low %v7285_v5, %v7297_v21  ;;  %v5295_v21 = vrot.slane %v1231_v10, 9  ;;  %v5654_v10 = vld [vmem:[%s7011_s11 + $0x18] sm:$0xf] }
  0xa4   : > { %6136 = vmatprep.subr.bf16.mxu1 %v6800_v32 }
  0xa5   : > { %6313 = vmatmul.mubr.bf16.gmra.mrb[24].mxu0 %v5571_v36  ;;  %v5280_v36 = vcombine.low %v7308_v47, %v7319_v54  ;;  %v1285_v5 = vrot.slane %v1283_v1, 4  ;;  %v6808_v47 = vld [vmem:[%s8800_s1 + $0x1c8] sm:$0xff]   ;;  %v5296_v54 = vrot.slane %v1232_v19, 9  ;;  %v7679_v59 = vsel %vm7289_vm5, %v5294_v17, %v1283_v1  ;;  %v5655_v19 = vld [vmem:[%s7011_s11 + $0x1c] sm:$0xf] }
  0xa6   : > { %6105 = vmatmul.mubr.bf16.gmra.mrb[8].mxu1 %v5275_v34  ;;  %6316 = vmatprep.mubr.bf16.mxu0 %v5572_v33  ;;  %v1311_v34 = vrot.slane %v7567_v58, 5  ;;  %v1292_v33 = vrot.slane %v1290_v7, 4  ;;  %v5297_v58 = vrot.slane %v1233_v61, 9  ;;  %v1325_v1 = vrot.slane %v7593_v0, 5  ;;  %v6810_v0 = vld [vmem:[%s7011_s11 + $0x48] sm:$0xff]  }
  0xa7   : > { %6108 = vmatprep.mubr.bf16.mxu1 %v5276_v20  ;;  %6137 = vmatpush3.bf16.msra.mxu1 %v6800_v32  ;;  %v1304_v32 = vrot.slane %v7562_v51, 5  ;;  %v1234_v51 = vld [vmem:[%s7011_s11 + $0x30] sm:$0xe]  ;;  %v5283_v20 = vcombine.low %v7391_v31, %v7400_v48  ;;  %v7687_v25 = vsel %vm7289_vm5, %v1285_v5, %v1286_v24  ;;  %v7695_v63 = vsel %vm7289_vm5, %v5296_v54, %v1297_v13  ;;  %v1236_v13 = vld [vmem:[%s7011_s11 + $0x48] sm:$0xe] }
  0xa8   : > { %6138 = vmatprep.subr.bf16.mxu1 %v6806_v23  ;;  %v5298_v50 = vrot.slane %v1234_v51, 9  ;;  %v1313_v52 = vrot.slane %v1311_v34, 4  ;;  %v3790_v5 = vshrl.u32 %v5654_v10, 16  ;;  %v3803_v51 = vshrl.u32 %v5655_v19, 16  ;;  %v6819_v48 = vld [vmem:[%s7011_s11 + $0x6c] sm:$0xff]  }
  0xa9   : > { %v1306_v42 = vrot.slane %v1304_v32, 4  ;;  %v7707_v24 = vsel %vm7289_vm5, %v5297_v58, %v1304_v32  ;;  %v6886_v32 = vld [vmem:[%s7011_s11 + $0x44] sm:$0x1]  ;;  %v5300_v54 = vrot.slane %v1236_v13, 9  ;;  %v5658_v13 = vld [vmem:[%s7011_s11 + $0x28] sm:$0xf] }
  0xaa   : > { %v7717_v61 = vsel %vm7289_vm5, %v5298_v50, %v1311_v34  ;;  %v1321_v17 = vrot.slane %v6886_v32, 5  ;;  %v5656_v50 = vld [vmem:[%s7011_s11 + $0x20] sm:$0x1]  ;;  %v1238_v32 = vld [vmem:[%s7011_s11 + $0x60] sm:$0xe] }
  0xab   : > { %6139 = vmatpush3.bf16.msra.mxu1 %v6806_v23  ;;  %v5284_v23 = vcombine.low %v7425_v27, %v7428_v29 }
  0xac   : > { %6140 = vmatprep.subr.bf16.mxu1 %v6812_v49 }
  0xad   : > { %6317 = vmatmul.mubr.bf16.gmra.mrb[28].mxu0 %v5573_v53  ;;  %v6885_v53 = vld [vmem:[%s7011_s11 + $0x38] sm:$0x1] }
  0xae   : > { %6109 = vmatmul.mubr.bf16.gmra.mrb[12].mxu1 %v5277_v4  ;;  %6336 = vmatprep.mubr.bf16.mxu0 %v6798_v22  ;;  %v1314_v45 = vrot.slane %v6885_v53, 5  ;;  %v1235_v4 = vld [vmem:[%s7011_s11 + $0x3c] sm:$0xe]  ;;  %v1318_v22 = vrot.slane %v7588_v30, 5  ;;  %v7683_v30 = vsel %vm7289_vm5, %v5295_v21, %v1290_v7  ;;  %v3793_v21 = vshll.u32 %v5654_v10, 16  ;;  %v6824_v53 = vld [vmem:[%s8800_s1 + $0x1e0] sm:$0xff]  }
  0xaf   : > { %6112 = vmatprep.mubr.bf16.mxu1 %v5278_v55  ;;  %6141 = vmatpush3.bf16.msra.mxu1 %v6812_v49  ;;  %v1307_v49 = vrot.slane %v6884_v43, 5  ;;  %v7670_v55 = vrot.slane %v2386_v8, 5  ;;  %v6807_v7 = vld [vmem:[%s7011_s11 + $0x3c] sm:$0xff]   ;;  %v7703_v8 = vsel %vm7289_vm5, %v1299_v46, %v1300_v39  ;;  %v1327_v46 = vrot.slane %v1325_v1, 4  ;;  %v5660_v43 = vld [vmem:[%s7011_s11 + $0x30] sm:$0xf] }
  0xb0   : > { %6142 = vmatprep.subr.bf16.mxu1 %v6818_v56  ;;  %v1328_v39 = vrot.slane %v6887_v38, 5  ;;  %v3792_v10 = vrot.slane %v3790_v5, 4 }
  0xb1   : > { %8821 = vst [vmem:[#allocation2_spill] sm:$0xff] %v7670_v55 }
  0xb3   : > { %6143 = vmatpush3.bf16.msra.mxu1 %v6818_v56  ;;  %v6814_v56 = vld [vmem:[%s8800_s1 + $0x1d0] sm:$0xff]  }
  0xb4   : > { %6176 = vmatprep.subr.bf16.mxu1 %v7636_v60 }
  0xb5   : > { %6337 = vmatmul.mubr.bf16.vlgmr.msra.gmra.mrb[0].mxu0 %v6801_v6  ;;  %v7691_v6 = vsel %vm7289_vm5, %v1292_v33, %v1293_v35  ;;  %v7711_v35 = vsel %vm7289_vm5, %v1306_v42, %v1307_v49  ;;  %v3799_v33 = vshll.u32 %v5655_v19, 16  ;;  %v3795_v19 = vrot.slane %v3793_v21, 5  ;;  %v1239_v21 = vld [vmem:[%s7011_s11 + $0x6c] sm:$0xe] }
  0xb6   : > { %6113 = vmatmul.mubr.bf16.gmra.mrb[16].mxu1 %v5279_v62  ;;  %6369 = vmatpush3.bf16.msra.mxu0 %v7475_v44  ;;  %v5299_v62 = vrot.slane %v1235_v4, 9  ;;  %v5303_v58 = vrot.slane %v1239_v21, 9 }
  0xb7   : > { %6116 = vmatprep.mubr.bf16.mxu1 %v5280_v36  ;;  %6340 = vmatprep.mubr.bf16.mxu0 %v6804_v18  ;;  %v7721_v36 = vsel %vm7289_vm5, %v1313_v52, %v1314_v45  ;;  %v1320_v18 = vrot.slane %v1318_v22, 4  ;;  %v5657_v52 = vld [vmem:[%s7011_s11 + $0x24] sm:$0xf]  ;;  %v3827_v45 = vshrl.u32 %v5658_v13, 16 }
  0xb8   : > { %6370 = vmatprep.subr.bf16.mxu0 %v6808_v47  ;;  %v7738_v49 = vsel %vm7289_vm5, %v5299_v62, %v1318_v22  ;;  %v7755_v22 = vld [vmem:[%s7011_s11 + $0x54] sm:$0xe]  ;;  %v3805_v62 = vrot.slane %v3803_v51, 4  ;;  %v3814_v38 = vshrl.u32 %v5657_v52, 16  ;;  %v3817_v28 = vshll.u32 %v5657_v52, 16 }
  0xb9   : > { %v7752_v4 = vsel %vm7289_vm5, %v1320_v18, %v1321_v17  ;;  %v3809_v17 = vshll.u32 %v5656_v50, 16  ;;  %v5301_v5 = vrot.slane %v7755_v22, 9  ;;  %v6828_v50 = vld [vmem:[%s8800_s1 + $0x1e8] sm:$0xff]   ;;  %v1334_v52 = vrot.slane %v1332_v16, 4 }
  0xba   : > { %6371 = vmatpush3.bf16.msra.mxu0 %v6808_v47  ;;  %v6820_v47 = vld [vmem:[%s8800_s1 + $0x1d8] sm:$0xff]   ;;  %v3796_v22 = vor.u32 %v3795_v19, %v3792_v10  ;;  %v3816_v34 = vrot.slane %v3814_v38, 4  ;;  %v3819_v44 = vrot.slane %v3817_v28, 5  ;;  %v6892_v10 = vld [vmem:[%s7011_s11 + $0x74] sm:$0x1]  ;;  %v3829_v28 = vrot.slane %v3827_v45, 4 }
  0xbb   : > { %6372 = vmatprep.subr.bf16.mxu0 %v6814_v56  ;;  %v7793_v42 = vrot.slane %v3809_v17, 5  ;;  %v1349_v19 = vrot.slane %v6892_v10, 5  ;;  %v3838_v38 = vshrl.u32 %v5660_v43, 16  ;;  %v7818_v27 = vsel %vm7289_vm5, %v5301_v5, %v1332_v16 }
  0xbc   : > { %v3797_v21 = vrot.slane %v3796_v22, 4 }
  0xbd   : > { %6341 = vmatmul.mubr.bf16.gmra.mrb[4].mxu0 %v6807_v7  ;;  %v7765_v7 = vrot.slane %v3799_v33, 5  ;;  %v6890_v33 = vld [vmem:[%s7011_s11 + $0x70] sm:$0xf] }
  0xbe   : > { %6117 = vmatmul.mubr.bf16.gmra.mrb[20].mxu1 %v5281_v15  ;;  %6344 = vmatprep.mubr.bf16.mxu0 %v6810_v0  ;;  %v1339_v15 = vrot.slane %v7759_v40, 5  ;;  %v6889_v0 = vld [vmem:[%s7011_s11 + $0x5c] sm:$0x1]  ;;  %v1346_v51 = vrot.slane %v6890_v33, 5 }
  0xbf   : > { %6120 = vmatprep.mubr.bf16.mxu1 %v5282_v26  ;;  %6373 = vmatpush3.bf16.msra.mxu0 %v6814_v56  ;;  %v1335_v18 = vrot.slane %v6889_v0, 5  ;;  %v7774_v26 = vsel %vm7289_vm5, %v5300_v54, %v1325_v1  ;;  %v7778_v56 = vsel %vm7289_vm5, %v1327_v46, %v1328_v39  ;;  %v6891_v1 = vld [vmem:[%s7011_s11 + $0x68] sm:$0x1]  ;;  %v3823_v0 = vshll.u32 %v5658_v13, 16  ;;  %v6836_v40 = vld [vmem:[%s8800_s1 + $0x1f8] sm:$0xff]  }
  0xc0   : > { %6374 = vmatprep.subr.bf16.mxu0 %v6820_v47  ;;  %v1342_v54 = vrot.slane %v6891_v1, 5  ;;  %v5302_v46 = vrot.slane %v1238_v32, 9  ;;  %v1341_v39 = vrot.slane %v1339_v15, 4  ;;  %v3806_v33 = vor.u32 %v3805_v62, %v7765_v7  ;;  %v5661_v1 = vld [vmem:[%s7011_s11 + $0x34] sm:$0xf] }
  0xc1   : > { %v1348_v32 = vrot.slane %v1346_v51, 4  ;;  %v5659_v62 = vld [vmem:[%s7011_s11 + $0x2c] sm:$0x1]  ;;  %v7805_v17 = vrot.slane %v3823_v0, 5  ;;  %v3847_v13 = vshll.u32 %v5661_v1, 16  ;;  %v3851_v31 = vshrl.u32 %v5661_v1, 16 }
  0xc2   : > { %v3807_v10 = vrot.slane %v3806_v33, 4  ;;  %v7822_v29 = vsel %vm7289_vm5, %v1334_v52, %v1335_v18  ;;  %v7829_v45 = vsel %vm7289_vm5, %v5302_v46, %v1339_v15  ;;  %v7833_v14 = vsel %vm7289_vm5, %v1341_v39, %v1342_v54  ;;  %v1240_v18 = vld [vmem:[%s7011_s11 + $0x78] sm:$0xe] }
  0xc3   : > { %6375 = vmatpush3.bf16.msra.mxu0 %v6820_v47  ;;  %v7837_v16 = vsel %vm7289_vm5, %v5303_v58, %v1346_v51  ;;  %v7847_v15 = vsel %vm7289_vm5, %v1348_v32, %v1349_v19  ;;  %v3830_v5 = vor.u32 %v3829_v28, %v7805_v17  ;;  %v3840_v52 = vrot.slane %v3838_v38, 4  ;;  %v5663_v58 = vld [vmem:[%s7011_s11 + $0x3c] sm:$0xf]  ;;  %v5664_v51 = vld [vmem:[%s7011_s11 + $0x40] sm:$0xf] }
  0xc4   : > { %6376 = vmatprep.subr.bf16.mxu0 %v6824_v53  ;;  %v3802_v0 = vsel %vm7043_vm2, %v3797_v21, %v7765_v7  ;;  %v3812_v46 = vsel %vm7043_vm2, %v3807_v10, %v7793_v42  ;;  %v7858_v39 = vrot.slane %v3847_v13, 5  ;;  %v3853_v22 = vrot.slane %v3851_v31, 4  ;;  %v6894_v19 = vld [vmem:[%s7011_s11 + $0x80] sm:$0x1]  ;;  %v8017_v47 = vld [vmem:[%s7011_s11 + $0x68] sm:$0x1] }
  0xc5   : > { %6345 = vmatmul.mubr.bf16.gmra.mrb[8].mxu0 %v6813_v2  ;;  %v3841_v2 = vshll.u32 %v5660_v43, 16  ;;  %v3833_v43 = vshll.u32 %v5659_v62, 16  ;;  %v5304_v32 = vrot.slane %v1240_v18, 9  ;;  %v1241_v62 = vld [vmem:[%s7011_s11 + $0x84] sm:$0xe]  ;;  %v3862_v28 = vshrl.u32 %v5663_v58, 16 }
  0xc6   : > { %6121 = vmatmul.mubr.bf16.gmra.mrb[24].mxu1 %v5283_v20  ;;  %6348 = vmatprep.mubr.bf16.mxu0 %v6816_v3  ;;  %v6832_v20 = vld [vmem:[%s8800_s1 + $0x1f0] sm:$0xff]   ;;  %v6893_v3 = vld [vmem:[%s7011_s11 + $0x7c] sm:$0xf]  ;;  %v3865_v7 = vshll.u32 %v5663_v58, 16  ;;  %v3871_v38 = vshll.u32 %v5664_v51, 16  ;;  %v8822_v42 = vcombine.low %v7448_v41, %v7453_v12  ;;  %v7869_v13 = vrot.slane %v3830_v5, 4 }
  0xc7   : > { %6124 = vmatprep.mubr.bf16.mxu1 %v5284_v23  ;;  %6377 = vmatpush3.bf16.msra.mxu0 %v6824_v53  ;;  %v3820_v23 = vor.u32 %v3819_v44, %v3816_v34  ;;  %v6821_v53 = vld [vmem:[%s7011_s11 + $0x78] sm:$0xff]   ;;  %v1353_v44 = vrot.slane %v6893_v3, 5  ;;  %v3843_v54 = vrot.slane %v3841_v2, 5  ;;  %v7862_v1 = vrot.slane %v3833_v43, 5  ;;  %v7874_v21 = vld [vmem:[%s8800_s1 + $0x200] sm:$0xff]   ;;  %8830 = vst [vmem:[#allocation5_spill] sm:$0xff] %v8017_v47 }
  0xc8   : > { %6378 = vmatprep.subr.bf16.mxu0 %v6828_v50  ;;  %v5662_v34 = vld [vmem:[%s7011_s11 + $0x38] sm:$0x1]  ;;  %v3875_v2 = vshrl.u32 %v5664_v51, 16  ;;  %v6823_v43 = vld [vmem:[%s7011_s11 + $0x84] sm:$0xff]   ;;  %v3854_v12 = vor.u32 %v3853_v22, %v7858_v39  ;;  %v3867_v58 = vrot.slane %v3865_v7, 5  ;;  %v7896_v51 = vrot.slane %v3871_v38, 5 }
  0xc9   : > { %v7860_v33 = vrot.slane %v3820_v23, 4  ;;  %v1355_v10 = vrot.slane %v1353_v44, 4  ;;  %v3844_v31 = vor.u32 %v3843_v54, %v3840_v52  ;;  %v8823_v23 = vcombine.low %v7679_v59, %v7687_v25  ;;  %v6895_v18 = vld [vmem:[%s7011_s11 + $0x88] sm:$0xf]  ;;  %v5665_v5 = vld [vmem:[%s7011_s11 + $0x44] sm:$0x1] }
  0xca   : > { %v1360_v3 = vrot.slane %v6895_v18, 5  ;;  %v7887_v59 = vcombine.low %v3802_v0, %v3812_v46  ;;  %v5666_v52 = vld [vmem:[%s7011_s11 + $0x48] sm:$0xf]  ;;  %v3864_v54 = vrot.slane %v3862_v28, 4  ;;  %v3877_v22 = vrot.slane %v3875_v2, 4 }
  0xcb   : > { %6379 = vmatpush3.bf16.msra.mxu0 %v6828_v50  ;;  %v1356_v50 = vrot.slane %v6894_v19, 5  ;;  %v6825_v19 = vld [vmem:[%s7011_s11 + $0x90] sm:$0xff]   ;;  %v3826_v0 = vsel %vm7043_vm2, %v7860_v33, %v7805_v17  ;;  %v3845_v46 = vrot.slane %v3844_v31, 4  ;;  %v3836_v28 = vsel %vm7043_vm2, %v7869_v13, %v7862_v1  ;;  %v7918_v33 = vld [vmem:[%s7011_s11 + $0x58] sm:$0xf]  ;;  %v6826_v31 = vld [vmem:[%s8800_s1 + $0xc8] sm:$0xff]  }
  0xcc   : > { %6380 = vmatprep.subr.bf16.mxu0 %v6832_v20  ;;  %v3855_v38 = vrot.slane %v3854_v12, 4  ;;  %v1362_v2 = vrot.slane %v1360_v3, 4  ;;  %v5669_v17 = vld [vmem:[%s7011_s11 + $0x54] sm:$0xf]  ;;  %v3881_v1 = vshll.u32 %v5665_v5, 16  ;;  %v3886_v13 = vshrl.u32 %v5666_v52, 16 }
  0xcd   : > { %6349 = vmatmul.mubr.bf16.gmra.mrb[12].mxu0 %v6819_v48  ;;  %v3857_v48 = vshll.u32 %v5662_v34, 16  ;;  %v7914_v7 = vsel %vm7289_vm5, %v1355_v10, %v1356_v50  ;;  %v3889_v50 = vshll.u32 %v5666_v52, 16  ;;  %v3868_v10 = vor.u32 %v3867_v58, %v3864_v54  ;;  %v6827_v54 = vld [vmem:[%s7011_s11 + $0x9c] sm:$0xff]   ;;  %v6901_v41 = vld [vmem:[%s7011_s11 + $0xac] sm:$0xf] }
  0xce   : > { %6125 = vmatmul.mubr.bf16.gmra.mrb[28].mxu1 %v8822_v42  ;;  %6352 = vmatprep.mubr.bf16.mxu0 %v6821_v53  ;;  %v5305_v53 = vrot.slane %v1241_v62, 9  ;;  %v6896_v42 = vld [vmem:[%s7011_s11 + $0x8c] sm:$0x1]  ;;  %v3919_v5 = vshll.u32 %v7918_v33, 16  ;;  %v8825_v52 = vcombine.low %v7695_v63, %v7703_v8  ;;  %v7954_v63 = vld [vmem:[%s7011_s11 + $0x50] sm:$0x1] }
  0xcf   : > { %6144 = vmatprep.mubr.bf16.mxu1 %v8823_v23  ;;  %6381 = vmatpush3.bf16.msra.mxu0 %v6832_v20  ;;  %v7893_v20 = vsel %vm7289_vm5, %v5304_v32, %v1353_v44  ;;  %v3859_v62 = vrot.slane %v3857_v48, 5  ;;  %v1363_v23 = vrot.slane %v6896_v42, 5  ;;  %v1242_v44 = vld [vmem:[%s7011_s11 + $0x90] sm:$0xe]  ;;  %v7906_v32 = vld [vmem:[%s7011_s11 + $0x4c] sm:$0xf]  ;;  %v3878_v48 = vor.u32 %v3877_v22, %v7896_v51 }
  0xd0   : > { %6382 = vmatprep.subr.bf16.mxu0 %v6836_v40  ;;  %v3895_v12 = vshll.u32 %v7906_v32, 16  ;;  %v3899_v18 = vshrl.u32 %v7906_v32, 16  ;;  %v8824_v42 = vcombine.low %v7683_v30, %v7691_v6  ;;  %v6830_v30 = vld [vmem:[%s8800_s1 + $0xd0] sm:$0xff]   ;;  %v3850_v6 = vsel %vm7043_vm2, %v3845_v46, %v7858_v39  ;;  %v6829_v8 = vld [vmem:[%s7011_s11 + $0xa8] sm:$0xff]   ;;  %v7961_v39 = vld [vmem:[%s7011_s11 + $0x5c] sm:$0x1] }
  0xd1   : > { %v3860_v58 = vsel %vm7043_vm2, %v3855_v38, %v3859_v62  ;;  %v5306_v22 = vrot.slane %v1242_v44, 9  ;;  %v3891_v25 = vrot.slane %v3889_v50, 5  ;;  %8826 = vst [vmem:[#allocation3_spill] sm:$0xff] %v7961_v39  ;;  %v3869_v46 = vrot.slane %v3868_v10, 4 }
  0xd2   : > { %v3879_v62 = vrot.slane %v3878_v48, 4  ;;  %v7963_v38 = vrot.slane %v3895_v12, 5  ;;  %v7965_v34 = vrot.slane %v3919_v5, 5  ;;  %v7970_v50 = vcombine.low %v3826_v0, %v3836_v28  ;;  %v5672_v28 = vld [vmem:[%s7011_s11 + $0x60] sm:$0xf] }
  0xd3   : > { %6383 = vmatpush3.bf16.msra.mxu0 %v6836_v40  ;;  %v7926_v40 = vsel %vm7289_vm5, %v5305_v53, %v1360_v3  ;;  %v3910_v53 = vshrl.u32 %v5669_v17, 16  ;;  %v3913_v3 = vshll.u32 %v5669_v17, 16  ;;  %v6897_v17 = vld [vmem:[%s7011_s11 + $0x94] sm:$0xf]  ;;  %v7974_v48 = vcombine.low %v3850_v6, %v3860_v58 }
  0xd4   : > { %6416 = vmatprep.subr.bf16.mxu0 %v7874_v21  ;;  %v3905_v0 = vshll.u32 %v7954_v63, 16  ;;  %v3874_v6 = vsel %vm7043_vm2, %v3869_v46, %v7896_v51  ;;  %v8829_v46 = vcombine.low %v7717_v61, %v7721_v36 }
  0xd5   : > { %6353 = vmatmul.mubr.bf16.gmra.mrb[16].mxu0 %v6823_v43  ;;  %v3923_v43 = vshrl.u32 %v7918_v33, 16  ;;  %v3912_v44 = vrot.slane %v3910_v53, 4  ;;  %v6898_v53 = vld [vmem:[%s7011_s11 + $0x98] sm:$0x1] }
  0xd6   : > { %6145 = vmatmul.mubr.bf16.vlgmr.msra.gmra.mrb[0].mxu1 %v8824_v42  ;;  %6356 = vmatprep.mubr.bf16.mxu0 %v6825_v19  ;;  %v7957_v19 = vrot.slane %v3881_v1, 5  ;;  %v1367_v42 = vrot.slane %v6897_v17, 5  ;;  %v6899_v17 = vld [vmem:[%s7011_s11 + $0xa0] sm:$0xf]  ;;  %v3907_v36 = vrot.slane %v3905_v0, 5 }
  0xd7   : > { %6177 = vmatpush3.bf16.msra.mxu1 %v7636_v60  ;;  %6148 = vmatprep.mubr.bf16.mxu1 %v8825_v52  ;;  %v7951_v60 = vsel %vm7289_vm5, %v1362_v2, %v1363_v23  ;;  %v3888_v52 = vrot.slane %v3886_v13, 4  ;;  %v3901_v23 = vrot.slane %v3899_v18, 4  ;;  %v3915_v2 = vrot.slane %v3913_v3, 5  ;;  %v6834_v13 = vld [vmem:[%s8800_s1 + $0xd8] sm:$0xff]  }
  0xd8   : > { %6178 = vmatprep.subr.bf16.mxu1 %v6826_v31  ;;  %v3925_v1 = vrot.slane %v3923_v43, 4  ;;  %v1243_v18 = vld [vmem:[%s7011_s11 + $0x9c] sm:$0xe]  ;;  %v1370_v3 = vrot.slane %v6898_v53, 5  ;;  %v7987_v43 = vld [vmem:[%s7011_s11 + $0x64] sm:$0xf] }
  0xd9   : > { %v3892_v5 = vor.u32 %v3891_v25, %v3888_v52  ;;  %8827 = vst [vmem:[#allocation4_spill] sm:$0xff] %v7987_v43  ;;  %v3902_v58 = vor.u32 %v3901_v23, %v7963_v38  ;;  %v1374_v12 = vrot.slane %v6899_v17, 5  ;;  %v8828_v25 = vcombine.low %v7707_v24, %v7711_v35  ;;  %v6831_v23 = vld [vmem:[%s7011_s11 + $0xb4] sm:$0xff]   ;;  %v6837_v24 = vld [vmem:[%s8800_s1 + $0xe0] sm:$0xff]   ;;  %v5675_v17 = vld [vmem:[%s7011_s11 + $0x6c] sm:$0xf] }
  0xda   : > { %v1369_v52 = vrot.slane %v1367_v42, 4  ;;  %v3916_v53 = vor.u32 %v3915_v2, %v3912_v44  ;;  %v3926_v51 = vor.u32 %v3925_v1, %v7965_v34  ;;  %v3934_v35 = vshrl.u32 %v5672_v28, 16  ;;  %v6900_v2 = vld [vmem:[%s7011_s11 + $0xa4] sm:$0x1] }
  0xdb   : > { %6179 = vmatpush3.bf16.msra.mxu1 %v6826_v31  ;;  %v7981_v31 = vsel %vm7289_vm5, %v5306_v22, %v1367_v42  ;;  %v3929_v22 = vshll.u32 %v7961_v39, 16  ;;  %v3947_v42 = vshrl.u32 %v7987_v43, 16  ;;  %v3893_v61 = vrot.slane %v3892_v5, 4  ;;  %v8156_v39 = vld [vmem:[%s7011_s11 + $0x98] sm:$0x1] }
  0xdc   : > { %6180 = vmatprep.subr.bf16.mxu1 %v6830_v30  ;;  %v5307_v44 = vrot.slane %v1243_v18, 9  ;;  %v1377_v1 = vrot.slane %v6900_v2, 5  ;;  %v3917_v5 = vrot.slane %v3916_v53, 4  ;;  %v3927_v18 = vrot.slane %v3926_v51, 4  ;;  %8843 = vst [vmem:[#allocation14_spill] sm:$0xff] %v8156_v39 }
  0xdd   : > { %6357 = vmatmul.mubr.bf16.gmra.mrb[20].mxu0 %v6827_v54  ;;  %v3884_v54 = vsel %vm7043_vm2, %v3879_v62, %v7957_v19  ;;  %v3943_v19 = vshll.u32 %v7987_v43, 16  ;;  %v6833_v62 = vld [vmem:[%s7011_s11 + $0xc0] sm:$0xff]   ;;  %v3931_v10 = vrot.slane %v3929_v22, 5  ;;  %v8023_v43 = vsel %vm7289_vm5, %v1369_v52, %v1370_v3 }
  0xde   : > { %6149 = vmatmul.mubr.bf16.gmra.mrb[4].mxu1 %v8828_v25  ;;  %6360 = vmatprep.mubr.bf16.mxu0 %v6829_v8  ;;  %v3937_v8 = vshll.u32 %v5672_v28, 16  ;;  %v3903_v25 = vrot.slane %v3902_v58, 4  ;;  %v1381_v28 = vrot.slane %v6901_v41, 5  ;;  %v8019_v55 = vcombine.low %v3874_v6, %v3884_v54  ;;  %v6839_v41 = vld [vmem:[%s8800_s1 + $0xe8] sm:$0xff]  }
  0xdf   : > { %6152 = vmatprep.mubr.bf16.mxu1 %v8829_v46  ;;  %6181 = vmatpush3.bf16.msra.mxu1 %v6830_v30  ;;  %v1244_v30 = vld [vmem:[%s7011_s11 + $0xa8] sm:$0xe]  ;;  %v1376_v46 = vrot.slane %v1374_v12, 4  ;;  %v3936_v0 = vrot.slane %v3934_v35, 4  ;;  %v8025_v58 = vrot.slane %v3943_v19, 5  ;;  %v3949_v22 = vrot.slane %v3947_v42, 4 }
  0xe0   : > { %6182 = vmatprep.subr.bf16.mxu1 %v6834_v13  ;;  %v3939_v2 = vrot.slane %v3937_v8, 5  ;;  %v3898_v3 = vsel %vm7043_vm2, %v3893_v61, %v7963_v38  ;;  %v8035_v6 = vsel %vm7289_vm5, %v5307_v44, %v1374_v12  ;;  %v3958_v54 = vshrl.u32 %v5675_v17, 16  ;;  %v6902_v38 = vld [vmem:[%s7011_s11 + $0xb0] sm:$0x1]  ;;  %v1245_v19 = vld [vmem:[%s7011_s11 + $0xb4] sm:$0xe] }
  0xe1   : > { %v3961_v52 = vshll.u32 %v5675_v17, 16  ;;  %v3908_v53 = vsel %vm7043_vm2, %v3903_v25, %v3907_v36  ;;  %v8044_v51 = vsel %vm7289_vm5, %v1376_v46, %v1377_v1  ;;  %v5308_v35 = vrot.slane %v1244_v30, 9  ;;  %v8066_v30 = vld [vmem:[%s7011_s11 + $0x74] sm:$0x1]  ;;  %v6903_v25 = vld [vmem:[%s7011_s11 + $0xb8] sm:$0xf] }
  0xe2   : > { %v1384_v8 = vrot.slane %v6902_v38, 5  ;;  %v8832_v12 = vcombine.low %v7738_v49, %v7752_v4  ;;  %v3922_v42 = vsel %vm7043_vm2, %v3917_v5, %v7965_v34  ;;  %v3932_v61 = vsel %vm7043_vm2, %v3927_v18, %v3931_v10  ;;  %v6835_v4 = vld [vmem:[%s7011_s11 + $0xcc] sm:$0xff]   ;;  %8834 = vst [vmem:[#allocation7_spill] sm:$0xff] %v8066_v30  ;;  %v5681_v38 = vld [vmem:[%s7011_s11 + $0x84] sm:$0xf] }
  0xe3   : > { %6183 = vmatpush3.bf16.msra.mxu1 %v6834_v13  ;;  %v8038_v13 = vld [vmem:[%s7011_s11 + $0x70] sm:$0xf]  ;;  %v1383_v36 = vrot.slane %v1381_v28, 4  ;;  %v3953_v44 = vshll.u32 %v8017_v47, 16  ;;  %v8833_v49 = vcombine.low %v7774_v26, %v7778_v56  ;;  %v3950_v1 = vor.u32 %v3949_v22, %v8025_v58  ;;  %v8083_v22 = vld [vmem:[%s7011_s11 + $0x7c] sm:$0xf] }
  0xe4   : > { %6184 = vmatprep.subr.bf16.mxu1 %v6837_v24  ;;  %8831 = vst [vmem:[#allocation6_spill] sm:$0xff] %v8038_v13  ;;  %v3967_v34 = vshll.u32 %v8038_v13, 16  ;;  %v3971_v10 = vshrl.u32 %v8038_v13, 16  ;;  %v5309_v17 = vrot.slane %v1245_v19, 9  ;;  %v1388_v46 = vrot.slane %v6903_v25, 5  ;;  %8835 = vst [vmem:[#allocation8_spill] sm:$0xff] %v8083_v22 }
  0xe5   : > { %6361 = vmatmul.mubr.bf16.gmra.mrb[24].mxu0 %v6831_v23  ;;  %v6841_v23 = vld [vmem:[%s8800_s1 + $0xf0] sm:$0xff]   ;;  %v3960_v26 = vrot.slane %v3958_v54, 4  ;;  %v3963_v56 = vrot.slane %v3961_v52, 5  ;;  %v8074_v18 = vcombine.low %v3898_v3, %v3908_v53  ;;  %v8086_v19 = vcombine.low %v3922_v42, %v3932_v61  ;;  %v6904_v3 = vld [vmem:[%s7011_s11 + $0xbc] sm:$0x1] }
  0xe6   : > { %6153 = vmatmul.mubr.bf16.gmra.mrb[8].mxu1 %v8832_v12  ;;  %6364 = vmatprep.mubr.bf16.mxu0 %v6833_v62  ;;  %v3940_v62 = vor.u32 %v3939_v2, %v3936_v0  ;;  %v8080_v2 = vsel %vm7289_vm5, %v5308_v35, %v1381_v28  ;;  %v8090_v54 = vsel %vm7289_vm5, %v1383_v36, %v1384_v8  ;;  %v8092_v52 = vrot.slane %v3953_v44, 5  ;;  %v6843_v12 = vld [vmem:[%s8800_s1 + $0xf8] sm:$0xff]   ;;  %v8099_v28 = vld [vmem:[%s7011_s11 + $0x88] sm:$0xf] }
  0xe7   : > { %6156 = vmatprep.mubr.bf16.mxu1 %v8833_v49  ;;  %6185 = vmatpush3.bf16.msra.mxu1 %v6837_v24  ;;  %v5678_v24 = vld [vmem:[%s7011_s11 + $0x78] sm:$0xf]  ;;  %v1391_v53 = vrot.slane %v6904_v3, 5  ;;  %8836 = vst [vmem:[#allocation9_spill] sm:$0xff] %v8099_v28  ;;  %v8103_v42 = vrot.slane %v3950_v1, 4  ;;  %v8105_v61 = vrot.slane %v3967_v34, 5  ;;  %v8109_v36 = vsel %vm7289_vm5, %v5309_v17, %v1388_v46 }
  0xe8   : > { %6186 = vmatprep.subr.bf16.mxu1 %v6839_v41  ;;  %v8101_v35 = vrot.slane %v3940_v62, 4  ;;  %v3973_v8 = vrot.slane %v3971_v10, 4  ;;  %v1390_v44 = vrot.slane %v1388_v46, 4  ;;  %v3964_v49 = vor.u32 %v3963_v56, %v3960_v26  ;;  %v5684_v3 = vld [vmem:[%s7011_s11 + $0x90] sm:$0xf] }
  0xe9   : > { %v3977_v25 = vshll.u32 %v8066_v30, 16  ;;  %v3985_v0 = vshll.u32 %v5678_v24, 16  ;;  %v3991_v62 = vshll.u32 %v8083_v22, 16  ;;  %v3995_v1 = vshrl.u32 %v8083_v22, 16  ;;  %v8116_v34 = vld [vmem:[%s7011_s11 + $0x94] sm:$0xf] }
  0xea   : > { %8837 = vst [vmem:[#allocation10_spill] sm:$0xff] %v8116_v34  ;;  %v8838_v10 = vcombine.low %v7818_v27, %v7822_v29  ;;  %v4006_v17 = vshrl.u32 %v5681_v38, 16  ;;  %v4009_v46 = vshll.u32 %v5681_v38, 16  ;;  %v4019_v26 = vshrl.u32 %v8099_v28, 16  ;;  %v5687_v38 = vld [vmem:[%s7011_s11 + $0x9c] sm:$0xf] }
  0xeb   : > { %6187 = vmatpush3.bf16.msra.mxu1 %v6839_v41  ;;  %v3982_v41 = vshrl.u32 %v5678_v24, 16  ;;  %v8839_v56 = vcombine.low %v7829_v45, %v7833_v14  ;;  %v3974_v29 = vor.u32 %v3973_v8, %v8105_v61  ;;  %v4033_v24 = vshll.u32 %v5684_v3, 16  ;;  %v8138_v45 = vld [vmem:[%s7011_s11 + $0x80] sm:$0x1] }
  0xec   : > { %6188 = vmatprep.subr.bf16.mxu1 %v6841_v23  ;;  %v8135_v5 = vrot.slane %v3977_v25, 5  ;;  %8840 = vst [vmem:[#allocation11_spill] sm:$0xff] %v8138_v45  ;;  %v4039_v14 = vshll.u32 %v8116_v34, 16  ;;  %v3987_v27 = vrot.slane %v3985_v0, 5  ;;  %v3997_v8 = vrot.slane %v3995_v1, 4 }
  0xed   : > { %6365 = vmatmul.mubr.bf16.gmra.mrb[28].mxu0 %v6835_v4  ;;  %v4015_v4 = vshll.u32 %v8099_v28, 16  ;;  %v8142_v28 = vrot.slane %v3991_v62, 5  ;;  %v8148_v22 = vld [vmem:[%s7011_s11 + $0xa0] sm:$0xf]  ;;  %v4008_v25 = vrot.slane %v4006_v17, 4  ;;  %v4011_v30 = vrot.slane %v4009_v46, 5 }
  0xee   : > { %6157 = vmatmul.mubr.bf16.gmra.mrb[12].mxu1 %v8838_v10  ;;  %6384 = vmatprep.mubr.bf16.mxu0 %v7887_v59  ;;  %v4030_v59 = vshrl.u32 %v5684_v3, 16  ;;  %v8133_v10 = vrot.slane %v3964_v49, 4  ;;  %v8145_v3 = vld [vmem:[%s7011_s11 + $0x8c] sm:$0x1]  ;;  %8842 = vst [vmem:[#allocation13_spill] sm:$0xff] %v8148_v22  ;;  %v4021_v47 = vrot.slane %v4019_v26, 4  ;;  %v8165_v62 = vsel %vm7289_vm5, %v1390_v44, %v1391_v53 }
  0xef   : > { %6160 = vmatprep.mubr.bf16.mxu1 %v8839_v56  ;;  %6189 = vmatpush3.bf16.msra.mxu1 %v6841_v23  ;;  %v4043_v23 = vshrl.u32 %v8116_v34, 16  ;;  %v3984_v56 = vrot.slane %v3982_v41, 4  ;;  %8841 = vst [vmem:[#allocation12_spill] sm:$0xff] %v8145_v3  ;;  %v6840_v49 = vld [vmem:[%s8800_s1 + $0x208] sm:$0xff]   ;;  %v8153_v13 = vrot.slane %v4015_v4, 5  ;;  %v4035_v34 = vrot.slane %v4033_v24, 5 }
  0xf0   : > { %6190 = vmatprep.subr.bf16.mxu1 %v6843_v12  ;;  %v5690_v41 = vld [vmem:[%s7011_s11 + $0xa8] sm:$0xf]  ;;  %v4032_v1 = vrot.slane %v4030_v59, 4  ;;  %v8170_v17 = vld [vmem:[%s8800_s1 + $0x100] sm:$0xff]   ;;  %v8173_v46 = vrot.slane %v4039_v14, 5  ;;  %v4054_v26 = vshrl.u32 %v5687_v38, 16  ;;  %v8845_v24 = vcombine.low %v7837_v16, %v7847_v15 }
  0xf1   : > { %8844 = vst [vmem:[#allocation15_spill] sm:$0xff] %v8170_v17  ;;  %v4045_v4 = vrot.slane %v4043_v23, 4  ;;  %v4057_v0 = vshll.u32 %v5687_v38, 16  ;;  %v8176_v53 = vrot.slane %v3974_v29, 4  ;;  %v4063_v44 = vshll.u32 %v8148_v22, 16  ;;  %v6842_v16 = vld [vmem:[%s8800_s1 + $0x210] sm:$0xff]  }
  0xf2   : > { %v4067_v59 = vshrl.u32 %v8148_v22, 16  ;;  %v3988_v14 = vor.u32 %v3987_v27, %v3984_v56  ;;  %v3998_v38 = vor.u32 %v3997_v8, %v8142_v28  ;;  %v4012_v23 = vor.u32 %v4011_v30, %v4008_v25  ;;  %v8188_v29 = vld [vmem:[%s7011_s11 + $0xac] sm:$0xf]  ;;  %v8201_v25 = vld [vmem:[%s7011_s11 + $0xa4] sm:$0x1] }
  0xf3   : > { %6191 = vmatpush3.bf16.msra.mxu1 %v6843_v12  ;;  %v4001_v12 = vshll.u32 %v8138_v45, 16  ;;  %8846 = vst [vmem:[#allocation16_spill] sm:$0xff] %v8188_v29  ;;  %v4022_v15 = vor.u32 %v4021_v47, %v8153_v13  ;;  %v4078_v27 = vshrl.u32 %v5690_v41, 16  ;;  %v4081_v30 = vshll.u32 %v5690_v41, 16 }
  0xf4   : > { %6464 = vmatprep.subr.bf16.mxu1 %v8170_v17  ;;  %v8847_v17 = vcombine.low %v7893_v20, %v7914_v7  ;;  %v4036_v56 = vor.u32 %v4035_v34, %v4032_v1  ;;  %v4046_v8 = vor.u32 %v4045_v4, %v8173_v46  ;;  %v4056_v20 = vrot.slane %v4054_v26, 4 }
  0xf5   : > { %6385 = vmatmul.mubr.bf16.vlgmr.msra.gmra.mrb[0].mxu0 %v7970_v50  ;;  %v4025_v50 = vshll.u32 %v8145_v3, 16  ;;  %v4059_v7 = vrot.slane %v4057_v0, 5  ;;  %v4091_v22 = vshrl.u32 %v8188_v29, 16  ;;  %v3989_v47 = vrot.slane %v3988_v14, 4  ;;  %v6844_v0 = vld [vmem:[%s8800_s1 + $0x218] sm:$0xff]  }
  0xf6   : > { %6161 = vmatmul.mubr.bf16.gmra.mrb[16].mxu1 %v8845_v24  ;;  %6417 = vmatpush3.bf16.msra.mxu0 %v7874_v21  ;;  %v4049_v21 = vshll.u32 %v8156_v39, 16  ;;  %v4087_v24 = vshll.u32 %v8188_v29, 16  ;;  %v3999_v39 = vrot.slane %v3998_v38, 4  ;;  %v4003_v3 = vrot.slane %v4001_v12, 5 }
  0xf7   : > { %6164 = vmatprep.mubr.bf16.mxu1 %v8847_v17  ;;  %6388 = vmatprep.mubr.bf16.mxu0 %v7974_v48  ;;  %v8203_v17 = vrot.slane %v4063_v44, 5  ;;  %v4069_v48 = vrot.slane %v4067_v59, 4  ;;  %v4027_v41 = vrot.slane %v4025_v50, 5  ;;  %v4013_v34 = vrot.slane %v4012_v23, 4 }
  0xf8   : > { %6418 = vmatprep.subr.bf16.mxu0 %v6840_v49  ;;  %v4023_v1 = vrot.slane %v4022_v15, 4  ;;  %v4080_v4 = vrot.slane %v4078_v27, 4  ;;  %v4083_v45 = vrot.slane %v4081_v30, 5  ;;  %v4037_v26 = vrot.slane %v4036_v56, 4  ;;  %v8269_v27 = vld [vmem:[%s7011_s11 + $0xbc] sm:$0x1] }
  0xf9   : > { %v4051_v44 = vrot.slane %v4049_v21, 5  ;;  %v4060_v59 = vor.u32 %v4059_v7, %v4056_v20  ;;  %v4073_v29 = vshll.u32 %v8201_v25, 16  ;;  %v4070_v12 = vor.u32 %v4069_v48, %v8203_v17  ;;  %v8236_v21 = vld [vmem:[%s7011_s11 + $0xb0] sm:$0x1] }
  0xfa   : > { %6419 = vmatpush3.bf16.msra.mxu0 %v6840_v49  ;;  %v4047_v49 = vrot.slane %v4046_v8, 4  ;;  %v8213_v14 = vrot.slane %v4087_v24, 5  ;;  %v4093_v38 = vrot.slane %v4091_v22, 4  ;;  %v8848_v23 = vor.u32 %v7621_v57, %v7619_v11 }
  0xfb   : > { %6420 = vmatprep.subr.bf16.mxu0 %v6842_v16  ;;  %v8849_v15 = vcombine.low %v7926_v40, %v7951_v60  ;;  %v3980_v22 = vsel %vm7043_vm2, %v8176_v53, %v8135_v5  ;;  %v3994_v57 = vsel %vm7043_vm2, %v3989_v47, %v8142_v28  ;;  %v8850_v40 = vcombine.low %v7981_v31, %v8023_v43  ;;  %v6847_v31 = vld [vmem:[%s8800_s1 + $0x220] sm:$0xff]  }
  0xfc   : > { %v8218_v50 = vrot.slane %v8848_v23, 4  ;;  %v4004_v60 = vsel %vm7043_vm2, %v3999_v39, %v4003_v3  ;;  %v4084_v5 = vor.u32 %v4083_v45, %v4080_v4  ;;  %v4028_v28 = vsel %vm7043_vm2, %v4023_v1, %v4027_v41  ;;  %v5746_v41 = vld [vmem:[%s7011_s11 + $0x48] sm:$0xe] }
  0xfd   : > { %6389 = vmatmul.mubr.bf16.gmra.mrb[4].mxu0 %v8019_v55  ;;  %v3970_v55 = vsel %vm7043_vm2, %v8133_v10, %v8105_v61  ;;  %v5693_v61 = vld [vmem:[%s7011_s11 + $0xb4] sm:$0xf]  ;;  %v8248_v10 = vld [vmem:[%s7011_s11 + $0xb8] sm:$0xf]  ;;  %v4042_v39 = vsel %vm7043_vm2, %v4037_v26, %v8173_v46  ;;  %v8258_v43 = vrot.slane %v4060_v59, 4  ;;  %v8260_v3 = vrot.slane %v4073_v29, 5 }
  0xfe   : > { %6165 = vmatmul.mubr.bf16.gmra.mrb[20].mxu1 %v8849_v15  ;;  %6392 = vmatprep.mubr.bf16.mxu0 %v8074_v18  ;;  %v4018_v18 = vsel %vm7043_vm2, %v4013_v34, %v8153_v13  ;;  %v4052_v13 = vsel %vm7043_vm2, %v4047_v49, %v4051_v44  ;;  %v8264_v45 = vrot.slane %v4070_v12, 4  ;;  %v4094_v53 = vor.u32 %v4093_v38, %v8213_v14  ;;  %v5747_v26 = vld [vmem:[%s7011_s11 + $0x54] sm:$0xe] }
  0xff   : > { %6168 = vmatprep.mubr.bf16.mxu1 %v8850_v40  ;;  %6421 = vmatpush3.bf16.msra.mxu0 %v6842_v16  ;;  %v4097_v16 = vshll.u32 %v8236_v21, 16  ;;  %v8851_v46 = vsel %vm7043_vm2, %v8103_v42, %v8092_v52  ;;  %v8852_v29 = vsel %vm7043_vm2, %v8101_v35, %v8025_v58  ;;  %v4102_v56 = vshrl.u32 %v5693_v61, 16 }
 0x100   : > { %6422 = vmatprep.subr.bf16.mxu0 %v6844_v0  ;;  %v5724_v30 = vcombine.low %v8852_v29, %v8851_v46  ;;  %v4105_v8 = vshll.u32 %v5693_v61, 16  ;;  %v4111_v20 = vshll.u32 %v8248_v10, 16  ;;  %v5340_v7 = vcombine.low %v8080_v2, %v8090_v54  ;;  %v6850_v2 = vld [vmem:[%s8800_s1 + $0x228] sm:$0xff]   ;;  %v5696_v54 = vld [vmem:[%s7011_s11 + $0xc0] sm:$0xf]  ;;  %v8856_v29 = vld [vmem:[#allocation5_spill] sm:$0xff] }
 0x101   : > { %v5341_v48 = vcombine.low %v8109_v36, %v8165_v62  ;;  %v5725_v24 = vcombine.low %v3970_v55, %v3980_v22  ;;  %v8286_v52 = vrot.slane %v4084_v5, 4  ;;  %v5726_v42 = vcombine.low %v3994_v57, %v4004_v60 }
 0x102   : > { %v8288_v58 = vcombine.low %v4018_v18, %v4028_v28  ;;  %v8290_v35 = vcombine.low %v4042_v39, %v4052_v13  ;;  %v4066_v47 = vsel %vm7043_vm2, %v8258_v43, %v8203_v17  ;;  %v4076_v34 = vsel %vm7043_vm2, %v8264_v45, %v8260_v3  ;;  %v5749_v28 = vld [vmem:[%s7011_s11 + $0x6c] sm:$0xe] }
 0x103   : > { %6423 = vmatpush3.bf16.msra.mxu0 %v6844_v0  ;;  %v8306_v1 = vrot.slane %v4094_v53, 4  ;;  %v8308_v4 = vrot.slane %v4097_v16, 5  ;;  %v4115_v0 = vshrl.u32 %v8248_v10, 16  ;;  %v8853_v44 = vcombine.low %v8035_v6, %v8044_v51  ;;  %v6853_v6 = vld [vmem:[%s8800_s1 + $0x230] sm:$0xff]   ;;  %v8330_v51 = vld [vmem:[%s7011_s11 + $0xc4] sm:$0xf] }
 0x104   : > { %6424 = vmatprep.subr.bf16.mxu0 %v6847_v31  ;;  %v8315_v59 = vrot.slane %v4102_v56, 4  ;;  %v8319_v49 = vrot.slane %v4111_v20, 5  ;;  %v4121_v12 = vshll.u32 %v8269_v27, 16  ;;  %v4090_v38 = vsel %vm7043_vm2, %v8286_v52, %v8213_v14  ;;  %v5748_v14 = vld [vmem:[%s7011_s11 + $0x60] sm:$0xe]  ;;  %v8854_v39 = vld [vmem:[#allocation3_spill] sm:$0xff] }
 0x105   : > { %6393 = vmatmul.mubr.bf16.gmra.mrb[8].mxu0 %v8086_v19  ;;  %v8317_v19 = vrot.slane %v4105_v8, 5  ;;  %v4126_v23 = vshrl.u32 %v5696_v54, 16  ;;  %v5762_v15 = vrot.slane %v5746_v41, 9  ;;  %v4589_v55 = vrot.slane %v7906_v32, 5  ;;  %v6845_v13 = vld [vmem:[%s7011_s11 + $0xc] sm:$0xff]   ;;  %v6856_v56 = vld [vmem:[%s8800_s1 + $0x238] sm:$0xff]  }
 0x106   : > { %6169 = vmatmul.mubr.bf16.gmra.mrb[24].mxu1 %v8853_v44  ;;  %6396 = vmatprep.mubr.bf16.mxu0 %v5724_v30  ;;  %v4129_v22 = vshll.u32 %v5696_v54, 16  ;;  %v4592_v57 = vrot.slane %v7954_v63, 5  ;;  %v5763_v40 = vrot.slane %v5747_v26, 9  ;;  %v4596_v60 = vrot.slane %v7918_v33, 5  ;;  %v8855_v16 = vld [vmem:[#allocation4_spill] sm:$0xff]  ;;  %v8857_v52 = vld [vmem:[#allocation6_spill] sm:$0xff] }
 0x107   : > { %6172 = vmatprep.mubr.bf16.mxu1 %v5340_v7  ;;  %6425 = vmatpush3.bf16.msra.mxu0 %v6847_v31  ;;  %v4100_v18 = vsel %vm7043_vm2, %v8306_v1, %v8308_v4  ;;  %v8340_v5 = vrot.slane %v4115_v0, 4  ;;  %v8344_v61 = vsel %vm7289_vm5, %v5762_v15, %v4589_v55  ;;  %v4591_v32 = vrot.slane %v4589_v55, 4  ;;  %v8858_v4 = vld [vmem:[#allocation7_spill] sm:$0xff] }
 0x108   : > { %6426 = vmatprep.subr.bf16.mxu0 %v6850_v2  ;;  %v4135_v31 = vshll.u32 %v8330_v51, 16  ;;  %v8350_v63 = vsel %vm7289_vm5, %v5763_v40, %v4596_v60  ;;  %v4598_v33 = vrot.slane %v4596_v60, 4  ;;  %v4599_v3 = vrot.slane %v8854_v39, 5  ;;  %v8381_v26 = vld [vmem:[%s7011_s11 + $0xc8] sm:$0x1]  ;;  %v6846_v40 = vld [vmem:[%s7011_s11 + $0x18] sm:$0xff]  }
 0x109   : > { %v8356_v45 = vsel %vm7289_vm5, %v4591_v32, %v4592_v57  ;;  %v5764_v53 = vrot.slane %v5748_v14, 9  ;;  %v4603_v46 = vrot.slane %v8855_v16, 5  ;;  %v4606_v30 = vrot.slane %v8856_v29, 5  ;;  %v6848_v39 = vld [vmem:[%s7011_s11 + $0x24] sm:$0xff]  }
 0x10a   : > { %v5794_v8 = vcombine.low %v8344_v61, %v8356_v45  ;;  %v8367_v20 = vsel %vm7289_vm5, %v4598_v33, %v4599_v3  ;;  %v5765_v7 = vrot.slane %v5749_v28, 9  ;;  %v4613_v0 = vrot.slane %v8858_v4, 5  ;;  %v8860_v28 = vld [vmem:[#allocation11_spill] sm:$0xff]  ;;  %v5455_v61 = vld [vmem:[%s7011_s11 + $0x90] sm:$0xf] }
 0x10b   : > { %6427 = vmatpush3.bf16.msra.mxu0 %v6850_v2  ;;  %v4610_v2 = vrot.slane %v8857_v52, 5  ;;  %v5795_v54 = vcombine.low %v8350_v63, %v8367_v20  ;;  %v8374_v41 = vsel %vm7289_vm5, %v5764_v53, %v4603_v46  ;;  %v4605_v1 = vrot.slane %v4603_v46, 4  ;;  %v8861_v53 = vld [vmem:[#allocation2_spill] sm:$0xff]  ;;  %v6862_v45 = vld [vmem:[%s7011_s11 + $0xa8] sm:$0xff]  }
 0x10c   : > { %6428 = vmatprep.subr.bf16.mxu0 %v6853_v6  ;;  %v8383_v44 = vrot.slane %v4126_v23, 4  ;;  %v8396_v36 = vcombine.low %v4066_v47, %v4076_v34  ;;  %v4108_v62 = vor.u32 %v8317_v19, %v8315_v59  ;;  %v5750_v23 = vld [vmem:[%s7011_s11 + $0x78] sm:$0xe]  ;;  %v8408_v57 = vrot.slane %v4121_v12, 5  ;;  %v5699_v12 = vld [vmem:[%s7011_s11 + $0xcc] sm:$0xf] }
 0x10d   : > { %6397 = vmatmul.mubr.bf16.gmra.mrb[12].mxu0 %v5725_v24  ;;  %v8385_v24 = vrot.slane %v4129_v22, 5  ;;  %v8389_v15 = vsel %vm7289_vm5, %v5765_v7, %v4610_v2  ;;  %v4612_v55 = vrot.slane %v4610_v2, 4  ;;  %v8406_v22 = vcombine.low %v4090_v38, %v4100_v18  ;;  %v5449_v47 = vld [vmem:[%s7011_s11 + $0x78] sm:$0xf]  ;;  %v8859_v18 = vld [vmem:[#allocation8_spill] sm:$0xff] }
 0x10e   : > { %6173 = vmatmul.mubr.bf16.gmra.mrb[28].mxu1 %v5341_v48  ;;  %6400 = vmatprep.mubr.bf16.mxu0 %v5726_v42  ;;  %v4139_v48 = vshrl.u32 %v8330_v51, 16  ;;  %v8403_v42 = vsel %vm7289_vm5, %v4605_v1, %v4606_v30  ;;  %v4118_v34 = vor.u32 %v8340_v5, %v8319_v49  ;;  %v8419_v59 = vrot.slane %v4135_v31, 5  ;;  %v8433_v31 = vld [vmem:[%s7011_s11 + $0xd0] sm:$0xf]  ;;  %v8862_v1 = vld [vmem:[#allocation9_spill] sm:$0xff] }
 0x10f   : > { %6192 = vmatprep.mubr.bf16.mxu1 %v6845_v13  ;;  %6429 = vmatpush3.bf16.msra.mxu0 %v6853_v6  ;;  %v5796_v17 = vcombine.low %v8374_v41, %v8403_v42  ;;  %v8414_v43 = vsel %vm7289_vm5, %v4612_v55, %v4613_v0  ;;  %v4145_v19 = vshll.u32 %v8381_v26, 16  ;;  %v5751_v6 = vld [vmem:[%s7011_s11 + $0x84] sm:$0xe]  ;;  %v4132_v60 = vor.u32 %v8385_v24, %v8383_v44  ;;  %v8863_v24 = vld [vmem:[#allocation12_spill] sm:$0xff]  ;;  %v6926_v63 = vld [vmem:[%s7011_s11 + $0x8c] sm:$0x1] }
 0x110   : > { %6430 = vmatprep.subr.bf16.mxu0 %v6856_v56  ;;  %v5797_v38 = vcombine.low %v8389_v15, %v8414_v43  ;;  %v5766_v14 = vrot.slane %v5750_v23, 9  ;;  %v4617_v32 = vrot.slane %v8859_v18, 5  ;;  %v4620_v33 = vrot.slane %v8860_v28, 5 }
 0x111   : > { %v4141_v5 = vrot.slane %v4139_v48, 4  ;;  %v2367_v3 = vshrl.u32 %v5449_v47, 16  ;;  %v2370_v13 = vshll.u32 %v5449_v47, 16  ;;  %v2389_v16 = vsel %vm7043_vm2, %v8218_v50, %v8861_v53 }
 0x112   : > { %v4150_v46 = vshrl.u32 %v5699_v12, 16  ;;  %v8441_v29 = vsel %vm7289_vm5, %v5766_v14, %v4617_v32  ;;  %v4619_v30 = vrot.slane %v4617_v32, 4  ;;  %v5767_v7 = vrot.slane %v5751_v6, 9  ;;  %v6906_v6 = vld [vmem:[%s8800_s1 + $0x108] sm:$0xff]  }
 0x113   : > { %6431 = vmatpush3.bf16.msra.mxu0 %v6856_v56  ;;  %v4153_v52 = vshll.u32 %v5699_v12, 16  ;;  %v2369_v2 = vrot.slane %v2367_v3, 4  ;;  %v2372_v56 = vrot.slane %v2370_v13, 5  ;;  %v4624_v4 = vrot.slane %v8862_v1, 5  ;;  %v5752_v12 = vld [vmem:[%s7011_s11 + $0x90] sm:$0xe] }
 0x114   : > { %v4159_v50 = vshll.u32 %v8433_v31, 16  ;;  %v4163_v0 = vshrl.u32 %v8433_v31, 16  ;;  %v8450_v44 = vsel %vm7289_vm5, %v4619_v30, %v4620_v33  ;;  %v4627_v55 = vrot.slane %v8863_v24, 5  ;;  %v6849_v3 = vld [vmem:[%s7011_s11 + $0x30] sm:$0xff]  }
 0x115   : > { %6401 = vmatmul.mubr.bf16.gmra.mrb[16].mxu0 %v8288_v58  ;;  %v8864_v58 = vld [vmem:[#allocation15_spill] sm:$0xff]  ;;  %v4142_v48 = vor.u32 %v4141_v5, %v8419_v59  ;;  %v2373_v23 = vor.u32 %v2372_v56, %v2369_v2  ;;  %v4626_v47 = vrot.slane %v4624_v4, 4  ;;  %v4119_v14 = vrot.slane %v4118_v34, 4  ;;  %v8471_v13 = vld [vmem:[%s7011_s11 + $0xd4] sm:$0x1]  ;;  %v8865_v2 = vld [vmem:[#allocation10_spill] sm:$0xff] }
 0x116   : > { %6193 = vmatmul.mubr.bf16.vlgmr.msra.gmra.mrb[0].mxu1 %v6846_v40  ;;  %6404 = vmatprep.mubr.bf16.mxu0 %v8290_v35  ;;  %v5798_v35 = vcombine.low %v8441_v29, %v8450_v44  ;;  %v4109_v40 = vrot.slane %v4108_v62, 4  ;;  %v4147_v18 = vrot.slane %v4145_v19, 5  ;;  %v8463_v32 = vsel %vm7289_vm5, %v5767_v7, %v4624_v4  ;;  %v6851_v19 = vld [vmem:[%s7011_s11 + $0x3c] sm:$0xff]   ;;  %v6907_v1 = vld [vmem:[%s8800_s1 + $0x110] sm:$0xff]  }
 0x117   : > { %6472 = vmatpush3.bf16.msra.mxu1 %v8864_v58  ;;  %6196 = vmatprep.mubr.bf16.mxu1 %v6848_v39  ;;  %v4152_v28 = vrot.slane %v4150_v46, 4  ;;  %v4155_v33 = vrot.slane %v4153_v52, 5  ;;  %v2374_v39 = vrot.slane %v2373_v23, 4  ;;  %v8467_v5 = vsel %vm7289_vm5, %v4626_v47, %v4627_v55  ;;  %v6908_v47 = vld [vmem:[%s7011_s11 + $0x1c] sm:$0xf] }
 0x118   : > { %6465 = vmatprep.subr.bf16.mxu1 %v6906_v6  ;;  %v8473_v53 = vrot.slane %v4159_v50, 5  ;;  %v4165_v30 = vrot.slane %v4163_v0, 4  ;;  %v5799_v62 = vcombine.low %v8463_v32, %v8467_v5  ;;  %v5768_v34 = vrot.slane %v5752_v12, 9 }
 0x119   : > { %v4133_v7 = vrot.slane %v4132_v60, 4  ;;  %v4143_v46 = vrot.slane %v4142_v48, 4  ;;  %v2379_v52 = vsel %vm7043_vm2, %v2374_v39, %v7619_v11  ;;  %v4631_v56 = vrot.slane %v8865_v2, 5  ;;  %v8866_v11 = vld [vmem:[#allocation14_spill] sm:$0xff]  ;;  %v6852_v39 = vld [vmem:[%s7011_s11 + $0x48] sm:$0xff]  }
 0x11a   : > { %v4114_v4 = vsel %vm7043_vm2, %v4109_v40, %v8319_v49  ;;  %v4124_v60 = vsel %vm7043_vm2, %v4119_v14, %v8408_v57  ;;  %v8491_v50 = vcombine.low %v2379_v52, %v2389_v16  ;;  %v4634_v0 = vrot.slane %v8866_v11, 5  ;;  %v5742_v57 = vld [vmem:[%s7011_s11 + $0x18] sm:$0xe]  ;;  %v5753_v16 = vld [vmem:[%s7011_s11 + $0x9c] sm:$0xe] }
 0x11b   : > { %6473 = vmatpush3.bf16.msra.mxu1 %v6906_v6  ;;  %v4156_v24 = vor.u32 %v4155_v33, %v4152_v28  ;;  %v4169_v55 = vshll.u32 %v8471_v13, 16  ;;  %v8498_v58 = vsel %vm7289_vm5, %v5768_v34, %v4631_v56  ;;  %v4633_v48 = vrot.slane %v4631_v56, 4  ;;  %v6909_v40 = vld [vmem:[%s8800_s1 + $0x118] sm:$0xff]   ;;  %v6910_v2 = vld [vmem:[%s7011_s11 + $0x20] sm:$0x1] }
 0x11c   : > { %6466 = vmatprep.subr.bf16.mxu1 %v6907_v1  ;;  %v4166_v49 = vor.u32 %v4165_v30, %v8473_v53  ;;  %v4148_v23 = vsel %vm7043_vm2, %v4143_v46, %v4147_v18  ;;  %v4561_v12 = vrot.slane %v6908_v47, 5  ;;  %v5731_v6 = vcombine.low %v4114_v4, %v4124_v60  ;;  %v8867_v34 = vld [vmem:[#allocation13_spill] sm:$0xff]  ;;  %v5754_v11 = vld [vmem:[%s7011_s11 + $0xa8] sm:$0xe] }
 0x11d   : > { %6405 = vmatmul.mubr.bf16.gmra.mrb[20].mxu0 %v8396_v36  ;;  %v4138_v36 = vsel %vm7043_vm2, %v4133_v7, %v8419_v59  ;;  %v4157_v14 = vrot.slane %v4156_v24, 4  ;;  %v4171_v28 = vrot.slane %v4169_v55, 5  ;;  %v5758_v18 = vrot.slane %v5742_v57, 9  ;;  %v6854_v46 = vld [vmem:[%s7011_s11 + $0x54] sm:$0xff]   ;;  %v5743_v55 = vld [vmem:[%s7011_s11 + $0x24] sm:$0xe] }
 0x11e   : > { %6197 = vmatmul.mubr.bf16.gmra.mrb[4].mxu1 %v6849_v3  ;;  %6408 = vmatprep.mubr.bf16.mxu0 %v8406_v22  ;;  %v8512_v22 = vsel %vm7289_vm5, %v4633_v48, %v4634_v0  ;;  %v5769_v33 = vrot.slane %v5753_v16, 9  ;;  %v5732_v3 = vcombine.low %v4138_v36, %v4148_v23  ;;  %v4167_v30 = vrot.slane %v4166_v49, 4  ;;  %v6912_v48 = vld [vmem:[%s7011_s11 + $0x28] sm:$0xf]  ;;  %v6913_v36 = vld [vmem:[%s7011_s11 + $0x34] sm:$0xf] }
 0x11f   : > { %6200 = vmatprep.mubr.bf16.mxu1 %v6851_v19  ;;  %6474 = vmatpush3.bf16.msra.mxu1 %v6907_v1  ;;  %v5800_v59 = vcombine.low %v8498_v58, %v8512_v22  ;;  %v4638_v19 = vrot.slane %v8867_v34, 5  ;;  %v4641_v7 = vrot.slane %v8201_v25, 5  ;;  %v4563_v52 = vrot.slane %v4561_v12, 4  ;;  %v6911_v1 = vld [vmem:[%s8800_s1 + $0x120] sm:$0xff]  }
 0x120   : > { %6467 = vmatprep.subr.bf16.mxu1 %v6909_v40  ;;  %v4564_v56 = vrot.slane %v6910_v2, 5  ;;  %v4562_v25 = vsel %vm7289_vm5, %v5758_v18, %v4561_v12  ;;  %v4162_v0 = vsel %vm7043_vm2, %v4157_v14, %v8473_v53  ;;  %v4172_v24 = vsel %vm7043_vm2, %v4167_v30, %v4171_v28  ;;  %v5744_v12 = vld [vmem:[%s7011_s11 + $0x30] sm:$0xe]  ;;  %v6855_v30 = vld [vmem:[%s7011_s11 + $0x60] sm:$0xff]  }
 0x121   : > { %v8529_v4 = vsel %vm7289_vm5, %v5769_v33, %v4638_v19  ;;  %v4640_v60 = vrot.slane %v4638_v19, 4  ;;  %v4568_v49 = vrot.slane %v6912_v48, 5  ;;  %v4575_v23 = vrot.slane %v6913_v36, 5  ;;  %v6915_v33 = vld [vmem:[%s7011_s11 + $0x2c] sm:$0x1] }
 0x122   : > { %v4565_v16 = vsel %vm7289_vm5, %v4563_v52, %v4564_v56  ;;  %v5770_v47 = vrot.slane %v5754_v11, 9  ;;  %v5733_v28 = vcombine.low %v4162_v0, %v4172_v24  ;;  %v5759_v18 = vrot.slane %v5743_v55, 9  ;;  %v6857_v52 = vld [vmem:[%s7011_s11 + $0x6c] sm:$0xff]   ;;  %v5755_v11 = vld [vmem:[%s7011_s11 + $0xb4] sm:$0xe] }
 0x123   : > { %6475 = vmatpush3.bf16.msra.mxu1 %v6909_v40  ;;  %v8543_v57 = vsel %vm7289_vm5, %v4640_v60, %v4641_v7  ;;  %v8868_v40 = vld [vmem:[#allocation16_spill] sm:$0xff]  ;;  %v5790_v34 = vcombine.low %v4562_v25, %v4565_v16  ;;  %v4570_v19 = vrot.slane %v4568_v49, 4  ;;  %v5760_v2 = vrot.slane %v5744_v12, 9  ;;  %v5745_v0 = vld [vmem:[%s7011_s11 + $0x3c] sm:$0xe] }
 0x124   : > { %6468 = vmatprep.subr.bf16.mxu1 %v6911_v1  ;;  %v5801_v53 = vcombine.low %v8529_v4, %v8543_v57  ;;  %v4645_v14 = vrot.slane %v8868_v40, 5  ;;  %v4577_v56 = vrot.slane %v4575_v23, 4  ;;  %v6917_v24 = vld [vmem:[%s7011_s11 + $0x40] sm:$0xf]  ;;  %v4569_v48 = vsel %vm7289_vm5, %v5759_v18, %v4568_v49  ;;  %v6919_v18 = vld [vmem:[%s7011_s11 + $0x44] sm:$0x1] }
 0x125   : > { %6409 = vmatmul.mubr.bf16.gmra.mrb[24].mxu0 %v5731_v6  ;;  %v6914_v6 = vld [vmem:[%s8800_s1 + $0x128] sm:$0xff]   ;;  %v4582_v55 = vrot.slane %v6917_v24, 5  ;;  %v4652_v12 = vrot.slane %v8248_v10, 5  ;;  %v4576_v49 = vsel %vm7289_vm5, %v5760_v2, %v4575_v23  ;;  %v6920_v10 = vld [vmem:[%s8800_s1 + $0x138] sm:$0xff]   ;;  %v5756_v23 = vld [vmem:[%s7011_s11 + $0xc0] sm:$0xe] }
 0x126   : > { %6201 = vmatmul.mubr.bf16.gmra.mrb[8].mxu1 %v6852_v39  ;;  %6412 = vmatprep.mubr.bf16.mxu0 %v5732_v3  ;;  %v4571_v39 = vrot.slane %v6915_v33, 5  ;;  %v4648_v3 = vrot.slane %v8236_v21, 5  ;;  %v8560_v7 = vsel %vm7289_vm5, %v5770_v47, %v4645_v14  ;;  %v6918_v21 = vld [vmem:[%s8800_s1 + $0x130] sm:$0xff]   ;;  %v5771_v47 = vrot.slane %v5755_v11, 9 }
 0x127   : > { %6204 = vmatprep.mubr.bf16.mxu1 %v6854_v46  ;;  %6476 = vmatpush3.bf16.msra.mxu1 %v6911_v1  ;;  %v4647_v46 = vrot.slane %v4645_v14, 4  ;;  %v6916_v1 = vld [vmem:[%s7011_s11 + $0x38] sm:$0x1]  ;;  %v5761_v14 = vrot.slane %v5745_v0, 9  ;;  %v4585_v33 = vrot.slane %v6919_v18, 5  ;;  %v4659_v11 = vrot.slane %v8330_v51, 5 }
 0x128   : > { %6469 = vmatprep.subr.bf16.mxu1 %v6914_v6  ;;  %v4578_v60 = vrot.slane %v6916_v1, 5  ;;  %v4572_v36 = vsel %vm7289_vm5, %v4570_v19, %v4571_v39  ;;  %v4654_v39 = vrot.slane %v4652_v12, 4  ;;  %v5446_v19 = vld [vmem:[%s7011_s11 + $0x6c] sm:$0xf]  ;;  %v6860_v18 = vld [vmem:[%s7011_s11 + $0x90] sm:$0xff]   ;;  %v2410_v20 = vshll.u32 %v6926_v63, 16 }
 0x129   : > { %v8572_v25 = vsel %vm7289_vm5, %v4647_v46, %v4648_v3  ;;  %v5791_v3 = vcombine.low %v4569_v48, %v4572_v36  ;;  %v4583_v1 = vsel %vm7289_vm5, %v5761_v14, %v4582_v55  ;;  %v2343_v0 = vshrl.u32 %v5446_v19, 16  ;;  %v5757_v51 = vld [vmem:[%s7011_s11 + $0xcc] sm:$0xe] }
 0x12a   : > { %v5802_v16 = vcombine.low %v8560_v7, %v8572_v25  ;;  %v4579_v40 = vsel %vm7289_vm5, %v4577_v56, %v4578_v60  ;;  %v5772_v56 = vrot.slane %v5756_v23, 9  ;;  %v2346_v24 = vshll.u32 %v5446_v19, 16 }
 0x12b   : > { %6477 = vmatpush3.bf16.msra.mxu1 %v6914_v6  ;;  %v4655_v6 = vrot.slane %v8269_v27, 5  ;;  %v8592_v27 = vsel %vm7289_vm5, %v5771_v47, %v4652_v12  ;;  %v4662_v36 = vrot.slane %v8381_v26, 5  ;;  %v4661_v12 = vrot.slane %v4659_v11, 4 }
 0x12c   : > { %6470 = vmatprep.subr.bf16.mxu1 %v6918_v21  ;;  %v2348_v26 = vrot.slane %v2346_v24, 5  ;;  %v4669_v23 = vrot.slane %v8471_v13, 5 }
 0x12d   : > { %6413 = vmatmul.mubr.bf16.gmra.mrb[28].mxu0 %v5733_v28  ;;  %v4584_v28 = vrot.slane %v4582_v55, 4  ;;  %v8599_v46 = vsel %vm7289_vm5, %v4654_v39, %v4655_v6  ;;  %v8613_v55 = vsel %vm7289_vm5, %v5772_v56, %v4659_v11  ;;  %v4666_v39 = vrot.slane %v8433_v31, 5  ;;  %v6922_v56 = vld [vmem:[%s7011_s11 + $0x74] sm:$0x1] }
 0x12e   : > { %6205 = vmatmul.mubr.bf16.gmra.mrb[12].mxu1 %v6855_v30  ;;  %6432 = vmatprep.mubr.bf16.mxu0 %v5790_v34  ;;  %v6858_v30 = vld [vmem:[%s7011_s11 + $0x78] sm:$0xff]   ;;  %v5792_v34 = vcombine.low %v4576_v49, %v4579_v40  ;;  %v5803_v2 = vcombine.low %v8592_v27, %v8599_v46  ;;  %v8618_v49 = vsel %vm7289_vm5, %v4661_v12, %v4662_v36  ;;  %v2345_v40 = vrot.slane %v2343_v0, 4  ;;  %v6923_v0 = vld [vmem:[%s7011_s11 + $0x88] sm:$0xf] }
 0x12f   : > { %6208 = vmatprep.mubr.bf16.mxu1 %v6857_v52  ;;  %6478 = vmatpush3.bf16.msra.mxu1 %v6918_v21  ;;  %v6859_v52 = vld [vmem:[%s7011_s11 + $0x84] sm:$0xff]   ;;  %v4586_v60 = vsel %vm7289_vm5, %v4584_v28, %v4585_v33  ;;  %v6921_v21 = vld [vmem:[%s7011_s11 + $0x70] sm:$0xf]  ;;  %v5804_v28 = vcombine.low %v8613_v55, %v8618_v49  ;;  %v4668_v19 = vrot.slane %v4666_v39, 4  ;;  %v2400_v24 = vshll.u32 %v6923_v0, 16 }
 0x130   : > { %6471 = vmatprep.subr.bf16.mxu1 %v6920_v10  ;;  %v2352_v48 = vshll.u32 %v6921_v21, 16  ;;  %v2356_v47 = vshrl.u32 %v6921_v21, 16  ;;  %v5793_v6 = vcombine.low %v4583_v1, %v4586_v60  ;;  %v2362_v1 = vshll.u32 %v6922_v56, 16 }
 0x131   : > { %v8640_v11 = vsel %vm7289_vm5, %v4668_v19, %v4669_v23  ;;  %v2404_v21 = vshrl.u32 %v6923_v0, 16  ;;  %v6925_v19 = vld [vmem:[%s7011_s11 + $0xa0] sm:$0xf] }
 0x132   : > { %v8620_v14 = vrot.slane %v2352_v48, 5  ;;  %v2358_v33 = vrot.slane %v2356_v47, 4  ;;  %v2452_v56 = vshrl.u32 %v6925_v19, 16 }
 0x133   : > { %6479 = vmatpush3.bf16.msra.mxu1 %v6920_v10  ;;  %v5773_v10 = vrot.slane %v5757_v51, 9 }
 0x134   : > { %v2359_v31 = vor.u32 %v2358_v33, %v8620_v14  ;;  %v2418_v33 = vshll.u32 %v5455_v61, 16 }
 0x135   : > { %6433 = vmatmul.mubr.bf16.vlgmr.msra.gmra.mrb[0].mxu0 %v5791_v3  ;;  %v6861_v3 = vld [vmem:[%s7011_s11 + $0x9c] sm:$0xff]  }
 0x136   : > { %6209 = vmatmul.mubr.bf16.gmra.mrb[16].mxu1 %v6858_v30  ;;  %6436 = vmatprep.mubr.bf16.mxu0 %v5792_v34  ;;  %v5452_v30 = vld [vmem:[%s7011_s11 + $0x84] sm:$0xf]  ;;  %v8631_v34 = vsel %vm7289_vm5, %v5773_v10, %v4666_v39  ;;  %v2360_v47 = vrot.slane %v2359_v31, 4  ;;  %v6924_v10 = vld [vmem:[%s7011_s11 + $0x94] sm:$0xf]  ;;  %v2420_v0 = vrot.slane %v2418_v33, 5 }
 0x137   : > { %6212 = vmatprep.mubr.bf16.mxu1 %v6859_v52  ;;  %v2349_v52 = vor.u32 %v2348_v26, %v2345_v40  ;;  %v2391_v13 = vshrl.u32 %v5452_v30, 16  ;;  %v2394_v60 = vshll.u32 %v5452_v30, 16  ;;  %v5805_v48 = vcombine.low %v8631_v34, %v8640_v11 }
 0x138   : > { %v8649_v40 = vrot.slane %v2400_v24, 5  ;;  %v2406_v26 = vrot.slane %v2404_v21, 4  ;;  %v2424_v39 = vshll.u32 %v6924_v10, 16  ;;  %v2428_v23 = vshrl.u32 %v6924_v10, 16  ;;  %v6928_v10 = vld [vmem:[%s7011_s11 + $0xa4] sm:$0x1] }
 0x139   : > { %v2350_v36 = vrot.slane %v2349_v52, 4  ;;  %v2393_v12 = vrot.slane %v2391_v13, 4  ;;  %v2396_v51 = vrot.slane %v2394_v60, 5  ;;  %v2448_v52 = vshll.u32 %v6925_v19, 16  ;;  %v6929_v19 = vld [vmem:[%s7011_s11 + $0xac] sm:$0xf] }
 0x13a   : > { %v2407_v13 = vor.u32 %v2406_v26, %v8649_v40  ;;  %v8666_v41 = vrot.slane %v2424_v39, 5  ;;  %v2430_v42 = vrot.slane %v2428_v23, 4  ;;  %v2454_v21 = vrot.slane %v2452_v56, 4  ;;  %v5464_v23 = vld [vmem:[%s7011_s11 + $0xb4] sm:$0xf] }
 0x13b   : > { %v2458_v39 = vshll.u32 %v6928_v10, 16  ;;  %v2476_v15 = vshrl.u32 %v6929_v19, 16  ;;  %v2490_v63 = vshll.u32 %v5464_v23, 16 }
 0x13c   : > { %v2431_v26 = vor.u32 %v2430_v42, %v8666_v41 }
 0x13d   : > { %6437 = vmatmul.mubr.bf16.gmra.mrb[4].mxu0 %v5793_v6  ;;  %v5458_v6 = vld [vmem:[%s7011_s11 + $0x9c] sm:$0xf] }
 0x13e   : > { %6213 = vmatmul.mubr.bf16.gmra.mrb[20].mxu1 %v6860_v18  ;;  %6440 = vmatprep.mubr.bf16.mxu0 %v5794_v8  ;;  %v2364_v8 = vrot.slane %v2362_v1, 5  ;;  %v2415_v18 = vshrl.u32 %v5455_v61, 16  ;;  %v2442_v30 = vshll.u32 %v5458_v6, 16  ;;  %v2355_v1 = vsel %vm7043_vm2, %v2350_v36, %v8620_v14  ;;  %v6864_v61 = vld [vmem:[%s7011_s11 + $0xc0] sm:$0xff]  }
 0x13f   : > { %6216 = vmatprep.mubr.bf16.mxu1 %v6861_v3  ;;  %v2439_v3 = vshrl.u32 %v5458_v6, 16  ;;  %v8668_v14 = vrot.slane %v2448_v52, 5  ;;  %v2472_v52 = vshll.u32 %v6929_v19, 16 }
 0x140   : > { %v2365_v31 = vsel %vm7043_vm2, %v2360_v47, %v2364_v8  ;;  %v2417_v60 = vrot.slane %v2415_v18, 4  ;;  %v2444_v24 = vrot.slane %v2442_v30, 5  ;;  %v2412_v8 = vrot.slane %v2410_v20, 5  ;;  %v6930_v20 = vld [vmem:[%s7011_s11 + $0xb8] sm:$0xf] }
 0x141   : > { %v2408_v47 = vrot.slane %v2407_v13, 4  ;;  %v2455_v33 = vor.u32 %v2454_v21, %v8668_v14  ;;  %v2496_v29 = vshll.u32 %v6930_v20, 16  ;;  %v2500_v44 = vshrl.u32 %v6930_v20, 16 }
 0x143   : > { %v2456_v13 = vrot.slane %v2455_v33, 4 }
 0x145   : > { %6441 = vmatmul.mubr.bf16.gmra.mrb[8].mxu0 %v5795_v54  ;;  %v2397_v54 = vor.u32 %v2396_v51, %v2393_v12  ;;  %v2421_v12 = vor.u32 %v2420_v0, %v2417_v60  ;;  %v6927_v51 = vld [vmem:[%s7011_s11 + $0x98] sm:$0x1]  ;;  %v2460_v60 = vrot.slane %v2458_v39, 5 }
 0x146   : > { %6217 = vmatmul.mubr.bf16.gmra.mrb[24].mxu1 %v6862_v45  ;;  %6444 = vmatprep.mubr.bf16.mxu0 %v5796_v17  ;;  %v2441_v17 = vrot.slane %v2439_v3, 4  ;;  %v5494_v45 = vcombine.low %v2355_v1, %v2365_v31  ;;  %v2434_v6 = vshll.u32 %v6927_v51, 16  ;;  %v2487_v31 = vshrl.u32 %v5464_v23, 16 }
 0x147   : > { %6220 = vmatprep.mubr.bf16.mxu1 %v6863_v9  ;;  %v2398_v36 = vrot.slane %v2397_v54, 4  ;;  %v5461_v9 = vld [vmem:[%s7011_s11 + $0xa8] sm:$0xf]  ;;  %v2422_v56 = vrot.slane %v2421_v12, 4  ;;  %v2461_v32 = vsel %vm7043_vm2, %v2456_v13, %v2460_v60 }
 0x148   : > { %v2445_v18 = vor.u32 %v2444_v24, %v2441_v17  ;;  %v2463_v3 = vshrl.u32 %v5461_v9, 16  ;;  %v2466_v30 = vshll.u32 %v5461_v9, 16  ;;  %v2436_v1 = vrot.slane %v2434_v6, 5 }
 0x149   : > { %v2403_v43 = vsel %vm7043_vm2, %v2398_v36, %v8649_v40  ;;  %v2474_v17 = vrot.slane %v2472_v52, 5  ;;  %v2478_v24 = vrot.slane %v2476_v15, 4  ;;  %v2489_v21 = vrot.slane %v2487_v31, 4  ;;  %v5467_v36 = vld [vmem:[%s7011_s11 + $0xc0] sm:$0xf] }
 0x14a   : > { %v2446_v54 = vrot.slane %v2445_v18, 4  ;;  %v2465_v0 = vrot.slane %v2463_v3, 4  ;;  %v2468_v42 = vrot.slane %v2466_v30, 5  ;;  %v2511_v9 = vshrl.u32 %v5467_v36, 16  ;;  %v6932_v18 = vld [vmem:[%s7011_s11 + $0xc4] sm:$0xf] }
 0x14b   : > { %v2520_v33 = vshll.u32 %v6932_v18, 16 }
 0x14c   : > { %v2451_v51 = vsel %vm7043_vm2, %v2446_v54, %v8668_v14  ;;  %v2469_v5 = vor.u32 %v2468_v42, %v2465_v0  ;;  %v2524_v14 = vshrl.u32 %v6932_v18, 16  ;;  %v2513_v19 = vrot.slane %v2511_v9, 4 }
 0x14d   : > { %6445 = vmatmul.mubr.bf16.gmra.mrb[12].mxu0 %v5797_v38  ;;  %v2413_v38 = vsel %vm7043_vm2, %v2408_v47, %v2412_v8  ;;  %v2502_v8 = vrot.slane %v2500_v44, 4  ;;  %v2427_v47 = vsel %vm7043_vm2, %v2422_v56, %v8666_v41  ;;  %v6931_v41 = vld [vmem:[%s7011_s11 + $0xb0] sm:$0x1]  ;;  %v5498_v58 = vcombine.low %v2451_v51, %v2461_v32  ;;  %v6934_v44 = vld [vmem:[%s7011_s11 + $0xc8] sm:$0x1] }
 0x14e   : > { %6221 = vmatmul.mubr.bf16.gmra.mrb[28].mxu1 %v6864_v61  ;;  %6448 = vmatprep.mubr.bf16.mxu0 %v5798_v35  ;;  %v2432_v35 = vrot.slane %v2431_v26, 4  ;;  %v5496_v40 = vcombine.low %v2403_v43, %v2413_v38  ;;  %v2492_v61 = vrot.slane %v2490_v63, 5  ;;  %v2482_v6 = vshll.u32 %v6931_v41, 16 }
 0x14f   : > { %6256 = vmatprep.mubr.bf16.mxu1 %v5494_v45  ;;  %v2498_v45 = vrot.slane %v2496_v29, 5  ;;  %v2514_v26 = vshll.u32 %v5467_v36, 16  ;;  %v2470_v22 = vrot.slane %v2469_v5, 4  ;;  %v2522_v15 = vrot.slane %v2520_v33, 5 }
 0x150   : > { %v2437_v12 = vsel %vm7043_vm2, %v2432_v35, %v2436_v1  ;;  %v2493_v10 = vor.u32 %v2492_v61, %v2489_v21  ;;  %v2484_v30 = vrot.slane %v2482_v6, 5  ;;  %v2526_v43 = vrot.slane %v2524_v14, 4 }
 0x151   : > { %v2503_v39 = vor.u32 %v2502_v8, %v2498_v45  ;;  %v5497_v3 = vcombine.low %v2427_v47, %v2437_v12  ;;  %v2516_v52 = vrot.slane %v2514_v26, 5  ;;  %v2475_v31 = vsel %vm7043_vm2, %v2470_v22, %v2474_v17 }
 0x152   : > { %v2494_v38 = vrot.slane %v2493_v10, 4  ;;  %v2527_v29 = vor.u32 %v2526_v43, %v2522_v15  ;;  %v2530_v35 = vshll.u32 %v6934_v44, 16 }
 0x153   : > { %v2504_v56 = vrot.slane %v2503_v39, 4  ;;  %v2517_v20 = vor.u32 %v2516_v52, %v2513_v19 }
 0x154   : > { %v2499_v4 = vsel %vm7043_vm2, %v2494_v38, %v2498_v45  ;;  %v2532_v54 = vrot.slane %v2530_v35, 5 }
 0x155   : > { %6449 = vmatmul.mubr.bf16.gmra.mrb[16].mxu0 %v5799_v62  ;;  %v2479_v62 = vor.u32 %v2478_v24, %v2474_v17  ;;  %v2518_v25 = vrot.slane %v2517_v20, 4 }
 0x156   : > { %6257 = vmatmul.mubr.bf16.vlgmr.msra.gmra.mrb[16].mxu1 %v8491_v50  ;;  %6452 = vmatprep.mubr.bf16.mxu0 %v5800_v59  ;;  %v6933_v50 = vld [vmem:[%s7011_s11 + $0xbc] sm:$0x1]  ;;  %s5227_s11 = sshll.u32 %s6969_s13, 5  ;;  %s5229_s13 = sshll.u32 %s6993_s26, 1 }
 0x157   : > { %6260 = vmatprep.mubr.bf16.mxu1 %v5496_v40  ;;  %v2506_v23 = vshll.u32 %v6933_v50, 16  ;;  %v2480_v59 = vrot.slane %v2479_v62, 4  ;;  %v2523_v13 = vsel %vm7043_vm2, %v2518_v25, %v2522_v15  ;;  %p174_p4 = scmp.lt.s32.totalorder %s5227_s11, 63  ;;  %s182_s22 = scalar_lea.vmem %s8802_s3, %s5229_s13 }
 0x159   : > { %v2508_v1 = vrot.slane %v2506_v23, 5  ;;  %v2485_v63 = vsel %vm7043_vm2, %v2480_v59, %v2484_v30  ;;  %s8870_s11 = smov (!%p174_p4, %s5227_s11), 63 }
 0x15a   : > { %s5228_s16 = sshll.u32 %s8870_s11, 3 }
 0x15b   : > { %v2509_v57 = vsel %vm7043_vm2, %v2504_v56, %v2508_v1  ;;  %s8753_s19 = scalar_lea.vmem %s8801_s2, %s5228_s16 }
 0x15c   : > { %v5500_v7 = vcombine.low %v2499_v4, %v2509_v57 }
 0x15d   : > { %6453 = vmatmul.mubr.bf16.gmra.mrb[20].mxu0 %v5801_v53  ;;  %v5499_v53 = vcombine.low %v2475_v31, %v2485_v63 }
 0x15e   : > { %6261 = vmatmul.mubr.bf16.gmra.mrb[20].mxu1 %v5497_v3  ;;  %6456 = vmatprep.mubr.bf16.mxu0 %v5802_v16  ;;  %v2528_v16 = vrot.slane %v2527_v29, 4 }
 0x15f   : > { %6264 = vmatprep.mubr.bf16.mxu1 %v5498_v58 }
 0x160   : > { %v2533_v60 = vsel %vm7043_vm2, %v2528_v16, %v2532_v54 }
 0x161   : > { %v5501_v0 = vcombine.low %v2523_v13, %v2533_v60 }
 0x165   : > { %6457 = vmatmul.mubr.bf16.gmra.mrb[24].mxu0 %v5803_v2 }
 0x166   : > { %6265 = vmatmul.mubr.bf16.gmra.mrb[24].mxu1 %v5499_v53  ;;  %6460 = vmatprep.mubr.bf16.mxu0 %v5804_v28 }
 0x167   : > { %6268 = vmatprep.mubr.bf16.mxu1 %v5500_v7 }
 0x16d   : > { %6461 = vmatmul.mubr.bf16.gmra.mrb[28].mxu0 %v5805_v48 }
 0x16e   : > { %6269 = vmatmul.mubr.bf16.gmra.mrb[28].mxu1 %v5501_v0 }
 0x1e9   : > { %v6194_v27 = vpop.f32.mrb[0].mxu1 }
 0x1ea   : > { %v1943_v46 = vpop.f32.mrb[1].mxu1 }
 0x1eb   : > { %v6195_v2 = vpop.f32.mrb[2].mxu1 }
 0x1ec   : > { %v1946_v42 = vpop.f32.mrb[3].mxu1 }
 0x1f1   : > { %v6198_v55 = vpop.f32.mrb[4].mxu1 }
 0x1f2   : > { %v1959_v49 = vpop.f32.mrb[5].mxu1 }
 0x1f3   : > { %v6199_v28 = vpop.f32.mrb[6].mxu1 }
 0x1f4   : > { %v1962_v17 = vpop.f32.mrb[7].mxu1 }
 0x1f9   : > { %v6202_v24 = vpop.f32.mrb[8].mxu1 }
 0x1fa   : > { %v1975_v40 = vpop.f32.mrb[9].mxu1 }
 0x1fb   : > { %v6203_v21 = vpop.f32.mrb[10].mxu1 }
 0x1fc   : > { %v8740_v37 = vpop.f32.mrb[11].mxu1 }
 0x201   : > { %v8742_v61 = vpop.f32.mrb[12].mxu1 }
 0x202   : > { %v8744_v34 = vpop.f32.mrb[13].mxu1 }
 0x203   : > { %v8746_v11 = vpop.f32.mrb[14].mxu1 }
 0x204   : > { %v8748_v48 = vpop.f32.mrb[15].mxu1 }
 0x208   : > { %v6434_v45 = vpop.f32.mrb[0].mxu0 }
 0x209   : > { %v6480_v8 = vadd.f32 %v6434_v45, %v6194_v27  ;;  %v4834_v36 = vpop.f32.mrb[1].mxu0 }
 0x20a   : > { %v6481_v47 = vadd.f32 %v4834_v36, %v1943_v46  ;;  %v6435_v12 = vpop.f32.mrb[2].mxu0 }
 0x20b   : > { %4995 = vst [vmem:[%s8753_s19 + $0x10] sm:$0xff] %v6480_v8  ;;  %v6482_v51 = vadd.f32 %v6435_v12, %v6195_v2  ;;  %v4837_v32 = vpop.f32.mrb[3].mxu0  ;;  %v5064_v9 = vmul.f32 %v6480_v8, %v6480_v8 }
 0x20c   : > { %4993 = vst [vmem:[%s8753_s19] sm:$0xff] %v6481_v47  ;;  %v6483_v5 = vadd.f32 %v4837_v32, %v1946_v42  ;;  %v5062_v62 = vmul.f32 %v6481_v47, %v6481_v47 }
 0x20d   : > { %4996 = vst [vmem:[%s8753_s19 + $0x18] sm:$0xff] %v6482_v51  ;;  %v5065_v39 = vmul.f32 %v6482_v51, %v6482_v51 }
 0x20e   : > { %4994 = vst [vmem:[%s8753_s19 + $0x8] sm:$0xff] %v6483_v5  ;;  %v5025_v41 = vadd.f32 %v6483_v5, %v6481_v47  ;;  %v5063_v6 = vmul.f32 %v6483_v5, %v6483_v5 }
 0x210   : > { %v5026_v26 = vadd.f32 %v6480_v8, %v5025_v41  ;;  %v5094_v18 = vadd.f32 %v5063_v6, %v5062_v62  ;;  %v6438_v33 = vpop.f32.mrb[4].mxu0 }
 0x211   : > { %v6484_v14 = vadd.f32 %v6438_v33, %v6198_v55  ;;  %v4850_v10 = vpop.f32.mrb[5].mxu0 }
 0x212   : > { %v5095_v50 = vadd.f32 %v5094_v18, %v5064_v9  ;;  %v6485_v23 = vadd.f32 %v4850_v10, %v1959_v49  ;;  %v5027_v3 = vadd.f32 %v6482_v51, %v5026_v26  ;;  %v6439_v58 = vpop.f32.mrb[6].mxu0 }
 0x213   : > { %4999 = vst [vmem:[%s8753_s19 + $0x30] sm:$0xff] %v6484_v14  ;;  %v6486_v22 = vadd.f32 %v6439_v58, %v6199_v28  ;;  %v4853_v59 = vpop.f32.mrb[7].mxu0  ;;  %v5068_v1 = vmul.f32 %v6484_v14, %v6484_v14 }
 0x214   : > { %4997 = vst [vmem:[%s8753_s19 + $0x20] sm:$0xff] %v6485_v23  ;;  %v5028_v30 = vadd.f32 %v6485_v23, %v5027_v3  ;;  %v5066_v19 = vmul.f32 %v6485_v23, %v6485_v23  ;;  %v5096_v52 = vadd.f32 %v5095_v50, %v5065_v39  ;;  %v6487_v15 = vadd.f32 %v4853_v59, %v1962_v17 }
 0x215   : > { %5000 = vst [vmem:[%s8753_s19 + $0x38] sm:$0xff] %v6486_v22  ;;  %v5069_v35 = vmul.f32 %v6486_v22, %v6486_v22 }
 0x216   : > { %v5097_v43 = vadd.f32 %v5096_v52, %v5066_v19  ;;  %4998 = vst [vmem:[%s8753_s19 + $0x28] sm:$0xff] %v6487_v15  ;;  %v5029_v38 = vadd.f32 %v6487_v15, %v5028_v30  ;;  %v5067_v56 = vmul.f32 %v6487_v15, %v6487_v15 }
 0x218   : > { %v5030_v31 = vadd.f32 %v6484_v14, %v5029_v38  ;;  %v5098_v63 = vadd.f32 %v5097_v43, %v5067_v56  ;;  %v6442_v20 = vpop.f32.mrb[8].mxu0 }
 0x219   : > { %v6488_v29 = vadd.f32 %v6442_v20, %v6202_v24  ;;  %v4866_v44 = vpop.f32.mrb[9].mxu0 }
 0x21a   : > { %v5099_v4 = vadd.f32 %v5098_v63, %v5068_v1  ;;  %v6489_v57 = vadd.f32 %v4866_v44, %v1975_v40  ;;  %v5031_v53 = vadd.f32 %v6486_v22, %v5030_v31  ;;  %v6443_v7 = vpop.f32.mrb[10].mxu0 }
 0x21b   : > { %5003 = vst [vmem:[%s8753_s19 + $0x50] sm:$0xff] %v6488_v29  ;;  %v6490_v25 = vadd.f32 %v6443_v7, %v6203_v21  ;;  %v4869_v16 = vpop.f32.mrb[11].mxu0  ;;  %v5072_v42 = vmul.f32 %v6488_v29, %v6488_v29 }
 0x21c   : > { %5001 = vst [vmem:[%s8753_s19 + $0x40] sm:$0xff] %v6489_v57  ;;  %v5032_v54 = vadd.f32 %v6489_v57, %v5031_v53  ;;  %v5070_v13 = vmul.f32 %v6489_v57, %v6489_v57  ;;  %v5100_v60 = vadd.f32 %v5099_v4, %v5069_v35  ;;  %v6491_v0 = vadd.f32 %v4869_v16, %v8740_v37 }
 0x21d   : > { %5004 = vst [vmem:[%s8753_s19 + $0x58] sm:$0xff] %v6490_v25  ;;  %v5073_v40 = vmul.f32 %v6490_v25, %v6490_v25 }
 0x21e   : > { %v5101_v27 = vadd.f32 %v5100_v60, %v5070_v13  ;;  %5002 = vst [vmem:[%s8753_s19 + $0x48] sm:$0xff] %v6491_v0  ;;  %v5033_v46 = vadd.f32 %v6491_v0, %v5032_v54  ;;  %v5071_v2 = vmul.f32 %v6491_v0, %v6491_v0 }
 0x220   : > { %v5034_v55 = vadd.f32 %v6488_v29, %v5033_v46  ;;  %v5102_v49 = vadd.f32 %v5101_v27, %v5071_v2  ;;  %v6446_v28 = vpop.f32.mrb[12].mxu0 }
 0x221   : > { %v6492_v17 = vadd.f32 %v6446_v28, %v8742_v61  ;;  %v4882_v24 = vpop.f32.mrb[13].mxu0 }
 0x222   : > { %v5103_v21 = vadd.f32 %v5102_v49, %v5072_v42  ;;  %v6493_v37 = vadd.f32 %v4882_v24, %v8744_v34  ;;  %v5035_v45 = vadd.f32 %v6490_v25, %v5034_v55  ;;  %v6447_v8 = vpop.f32.mrb[14].mxu0 }
 0x223   : > { %5007 = vst [vmem:[%s8753_s19 + $0x70] sm:$0xff] %v6492_v17  ;;  %v6494_v36 = vadd.f32 %v6447_v8, %v8746_v11  ;;  %v4885_v47 = vpop.f32.mrb[15].mxu0  ;;  %v5076_v6 = vmul.f32 %v6492_v17, %v6492_v17 }
 0x224   : > { %5005 = vst [vmem:[%s8753_s19 + $0x60] sm:$0xff] %v6493_v37  ;;  %v5036_v12 = vadd.f32 %v6493_v37, %v5035_v45  ;;  %v5074_v51 = vmul.f32 %v6493_v37, %v6493_v37  ;;  %v5104_v32 = vadd.f32 %v5103_v21, %v5073_v40  ;;  %v6495_v5 = vadd.f32 %v4885_v47, %v8748_v48 }
 0x225   : > { %5008 = vst [vmem:[%s8753_s19 + $0x78] sm:$0xff] %v6494_v36  ;;  %v5077_v33 = vmul.f32 %v6494_v36, %v6494_v36 }
 0x226   : > { %v5105_v61 = vadd.f32 %v5104_v32, %v5074_v51  ;;  %5006 = vst [vmem:[%s8753_s19 + $0x68] sm:$0xff] %v6495_v5  ;;  %v5037_v62 = vadd.f32 %v6495_v5, %v5036_v12  ;;  %v5075_v41 = vmul.f32 %v6495_v5, %v6495_v5 }
 0x228   : > { %v5038_v34 = vadd.f32 %v6492_v17, %v5037_v62  ;;  %v5106_v9 = vadd.f32 %v5105_v61, %v5075_v41  ;;  %v6450_v26 = vpop.f32.mrb[16].mxu0 }
 0x229   : > { %v6258_v18 = vpop.f32.mrb[16].mxu1  ;;  %v4898_v11 = vpop.f32.mrb[17].mxu0 }
 0x22a   : > { %v5107_v14 = vadd.f32 %v5106_v9, %v5076_v6  ;;  %v6496_v10 = vadd.f32 %v6450_v26, %v6258_v18  ;;  %v2761_v39 = vpop.f32.mrb[17].mxu1  ;;  %v5039_v48 = vadd.f32 %v6494_v36, %v5038_v34  ;;  %v6451_v50 = vpop.f32.mrb[18].mxu0 }
 0x22b   : > { %v6497_v23 = vadd.f32 %v4898_v11, %v2761_v39  ;;  %v6259_v3 = vpop.f32.mrb[18].mxu1  ;;  %v4901_v58 = vpop.f32.mrb[19].mxu0 }
 0x22c   : > { %5011 = vst [vmem:[%s8753_s19 + $0x90] sm:$0xff] %v6496_v10  ;;  %v5108_v22 = vadd.f32 %v5107_v14, %v5077_v33  ;;  %v6498_v59 = vadd.f32 %v6451_v50, %v6259_v3  ;;  %v2764_v30 = vpop.f32.mrb[19].mxu1  ;;  %v5080_v31 = vmul.f32 %v6496_v10, %v6496_v10 }
 0x22d   : > { %5009 = vst [vmem:[%s8753_s19 + $0x80] sm:$0xff] %v6497_v23  ;;  %v5040_v19 = vadd.f32 %v6497_v23, %v5039_v48  ;;  %v5078_v52 = vmul.f32 %v6497_v23, %v6497_v23  ;;  %v6499_v15 = vadd.f32 %v4901_v58, %v2764_v30 }
 0x22e   : > { %5012 = vst [vmem:[%s8753_s19 + $0x98] sm:$0xff] %v6498_v59  ;;  %v5081_v53 = vmul.f32 %v6498_v59, %v6498_v59 }
 0x22f   : > { %v5109_v43 = vadd.f32 %v5108_v22, %v5078_v52  ;;  %5010 = vst [vmem:[%s8753_s19 + $0x88] sm:$0xff] %v6499_v15  ;;  %v5041_v38 = vadd.f32 %v6499_v15, %v5040_v19  ;;  %v5079_v56 = vmul.f32 %v6499_v15, %v6499_v15 }
 0x230   : > { %v6454_v1 = vpop.f32.mrb[20].mxu0 }
 0x231   : > { %v5042_v63 = vadd.f32 %v6496_v10, %v5041_v38  ;;  %v5110_v20 = vadd.f32 %v5109_v43, %v5079_v56  ;;  %v6262_v29 = vpop.f32.mrb[20].mxu1  ;;  %v4914_v44 = vpop.f32.mrb[21].mxu0 }
 0x232   : > { %v6500_v35 = vadd.f32 %v6454_v1, %v6262_v29  ;;  %v2777_v4 = vpop.f32.mrb[21].mxu1  ;;  %v6455_v57 = vpop.f32.mrb[22].mxu0 }
 0x233   : > { %v5111_v7 = vadd.f32 %v5110_v20, %v5080_v31  ;;  %v6501_v25 = vadd.f32 %v4914_v44, %v2777_v4  ;;  %v5043_v16 = vadd.f32 %v6498_v59, %v5042_v63  ;;  %v6263_v54 = vpop.f32.mrb[22].mxu1  ;;  %v4917_v13 = vpop.f32.mrb[23].mxu0 }
 0x234   : > { %5015 = vst [vmem:[%s8753_s19 + $0xb0] sm:$0xff] %v6500_v35  ;;  %v6502_v60 = vadd.f32 %v6455_v57, %v6263_v54  ;;  %v2780_v0 = vpop.f32.mrb[23].mxu1  ;;  %v5084_v24 = vmul.f32 %v6500_v35, %v6500_v35 }
 0x235   : > { %5013 = vst [vmem:[%s8753_s19 + $0xa0] sm:$0xff] %v6501_v25  ;;  %v5044_v27 = vadd.f32 %v6501_v25, %v5043_v16  ;;  %v5082_v46 = vmul.f32 %v6501_v25, %v6501_v25  ;;  %v5112_v2 = vadd.f32 %v5111_v7, %v5081_v53  ;;  %v6503_v42 = vadd.f32 %v4917_v13, %v2780_v0 }
 0x236   : > { %5016 = vst [vmem:[%s8753_s19 + $0xb8] sm:$0xff] %v6502_v60  ;;  %v5085_v12 = vmul.f32 %v6502_v60, %v6502_v60 }
 0x237   : > { %v5113_v55 = vadd.f32 %v5112_v2, %v5082_v46  ;;  %5014 = vst [vmem:[%s8753_s19 + $0xa8] sm:$0xff] %v6503_v42  ;;  %v5045_v49 = vadd.f32 %v6503_v42, %v5044_v27  ;;  %v5083_v28 = vmul.f32 %v6503_v42, %v6503_v42 }
 0x238   : > { %v6458_v17 = vpop.f32.mrb[24].mxu0 }
 0x239   : > { %v5046_v40 = vadd.f32 %v6500_v35, %v5045_v49  ;;  %v5114_v21 = vadd.f32 %v5113_v55, %v5083_v28  ;;  %v6266_v37 = vpop.f32.mrb[24].mxu1  ;;  %v4930_v45 = vpop.f32.mrb[25].mxu0 }
 0x23a   : > { %v6504_v8 = vadd.f32 %v6458_v17, %v6266_v37  ;;  %v2793_v36 = vpop.f32.mrb[25].mxu1  ;;  %v6459_v47 = vpop.f32.mrb[26].mxu0 }
 0x23b   : > { %v5115_v51 = vadd.f32 %v5114_v21, %v5084_v24  ;;  %v6505_v32 = vadd.f32 %v4930_v45, %v2793_v36  ;;  %v5047_v5 = vadd.f32 %v6502_v60, %v5046_v40  ;;  %v6267_v61 = vpop.f32.mrb[26].mxu1  ;;  %v4933_v62 = vpop.f32.mrb[27].mxu0 }
 0x23c   : > { %5019 = vst [vmem:[%s8753_s19 + $0xd0] sm:$0xff] %v6504_v8  ;;  %v6506_v41 = vadd.f32 %v6459_v47, %v6267_v61  ;;  %v2796_v6 = vpop.f32.mrb[27].mxu1  ;;  %v5088_v39 = vmul.f32 %v6504_v8, %v6504_v8 }
 0x23d   : > { %5017 = vst [vmem:[%s8753_s19 + $0xc0] sm:$0xff] %v6505_v32  ;;  %v5048_v34 = vadd.f32 %v6505_v32, %v5047_v5  ;;  %v5086_v9 = vmul.f32 %v6505_v32, %v6505_v32  ;;  %v5116_v26 = vadd.f32 %v5115_v51, %v5085_v12  ;;  %v6507_v18 = vadd.f32 %v4933_v62, %v2796_v6 }
 0x23e   : > { %5020 = vst [vmem:[%s8753_s19 + $0xd8] sm:$0xff] %v6506_v41  ;;  %v5089_v30 = vmul.f32 %v6506_v41, %v6506_v41 }
 0x23f   : > { %v5117_v11 = vadd.f32 %v5116_v26, %v5086_v9  ;;  %5018 = vst [vmem:[%s8753_s19 + $0xc8] sm:$0xff] %v6507_v18  ;;  %v5049_v33 = vadd.f32 %v6507_v18, %v5048_v34  ;;  %v5087_v14 = vmul.f32 %v6507_v18, %v6507_v18 }
 0x240   : > { %v6462_v10 = vpop.f32.mrb[28].mxu0 }
 0x241   : > { %v5050_v48 = vadd.f32 %v6504_v8, %v5049_v33  ;;  %v5118_v50 = vadd.f32 %v5117_v11, %v5087_v14  ;;  %v6270_v23 = vpop.f32.mrb[28].mxu1  ;;  %v4946_v3 = vpop.f32.mrb[29].mxu0 }
 0x242   : > { %v6508_v58 = vadd.f32 %v6462_v10, %v6270_v23  ;;  %v2809_v22 = vpop.f32.mrb[29].mxu1  ;;  %v6463_v59 = vpop.f32.mrb[30].mxu0 }
 0x243   : > { %v5119_v19 = vadd.f32 %v5118_v50, %v5088_v39  ;;  %v6509_v52 = vadd.f32 %v4946_v3, %v2809_v22  ;;  %v5051_v15 = vadd.f32 %v6506_v41, %v5050_v48  ;;  %v6271_v43 = vpop.f32.mrb[30].mxu1  ;;  %v4949_v38 = vpop.f32.mrb[31].mxu0 }
 0x244   : > { %5023 = vst [vmem:[%s8753_s19 + $0xf0] sm:$0xff] %v6508_v58  ;;  %v6510_v56 = vadd.f32 %v6463_v59, %v6271_v43  ;;  %v2812_v1 = vpop.f32.mrb[31].mxu1  ;;  %v5092_v57 = vmul.f32 %v6508_v58, %v6508_v58 }
 0x245   : > { %5021 = vst [vmem:[%s8753_s19 + $0xe0] sm:$0xff] %v6509_v52  ;;  %v5052_v31 = vadd.f32 %v6509_v52, %v5051_v15  ;;  %v5090_v63 = vmul.f32 %v6509_v52, %v6509_v52  ;;  %v5120_v20 = vadd.f32 %v5119_v19, %v5089_v30  ;;  %v6511_v29 = vadd.f32 %v4949_v38, %v2812_v1 }
 0x246   : > { %5024 = vst [vmem:[%s8753_s19 + $0xf8] sm:$0xff] %v6510_v56  ;;  %v5093_v25 = vmul.f32 %v6510_v56, %v6510_v56 }
 0x247   : > { %v5121_v44 = vadd.f32 %v5120_v20, %v5090_v63  ;;  %5022 = vst [vmem:[%s8753_s19 + $0xe8] sm:$0xff] %v6511_v29  ;;  %v5053_v35 = vadd.f32 %v6511_v29, %v5052_v31  ;;  %v5091_v4 = vmul.f32 %v6511_v29, %v6511_v29 }
 0x249   : > { %v5054_v53 = vadd.f32 %v6508_v58, %v5053_v35  ;;  %v5122_v7 = vadd.f32 %v5121_v44, %v5091_v4 }
 0x24b   : > { %v5055_v16 = vadd.f32 %v6510_v56, %v5054_v53  ;;  %v5123_v54 = vadd.f32 %v5122_v7, %v5092_v57 }
 0x24d   : > { %v5056_v13 = vrot.slane %v5055_v16, 4  ;;  %v5124_v60 = vadd.f32 %v5123_v54, %v5093_v25 }
 0x24f   : > { %v5057_v0 = vadd.f32 %v5056_v13, %v5055_v16  ;;  %v5125_v27 = vrot.slane %v5124_v60, 4 }
 0x251   : > { %v5058_v46 = vrot.slane %v5057_v0, 2  ;;  %v5126_v2 = vadd.f32 %v5125_v27, %v5124_v60 }
 0x253   : > { %v5059_v42 = vadd.f32 %v5058_v46, %v5057_v0  ;;  %v5127_v55 = vrot.slane %v5126_v2, 2 }
 0x255   : > { %v5060_v49 = vrot.slane %v5059_v42, 1  ;;  %v5128_v28 = vadd.f32 %v5127_v55, %v5126_v2 }
 0x257   : > { %v5129_v17 = vrot.slane %v5128_v28, 1  ;;  %v5061_v24 = vadd.f32 %v5060_v49, %v5059_v42 }
 0x259   : > { %v5130_v40 = vadd.f32 %v5129_v17, %v5128_v28 }
 0x25b   : > { %v5132_v21 = vsel %vm5131_vm6, %v5061_v24, %v5130_v40 }
 0x25c   : > { %5133 = vst [vmem:[%s182_s22] sm:$0x3] %v5132_v21 }
 0x25d PF: > { %s14_s12 = sadd.s32 1, %s6941_s12  }
 0x25e   : > { %p11_p5 = scmp.ge.s32.totalorder %s14_s12, 4  }
 0x260   :  { %13 = sbr.rel (!%p11_p5) target bundleno = 1 (0x1), region = 80 }

</bundles_post_ra>
